<compile_context>
chip_gen: v7x
topology: tpu7x:2x2x1
jax: 0.10.0
libtpu: 0.0.40
codegen_flags: <defaults>
</compile_context>

<pallas_src>
import functools
from math import sqrt

import jax
import jax.numpy as jnp
from jax.experimental import pallas as pl
from jax.experimental.pallas import tpu as pltpu

_PADL = 128          # lane margin of the shifted-window scratch (keeps stores 128-aligned)
_NEG = -1e30         # finite "-inf" for the partial-ReLU floor (avoids 0 * inf -> nan)


def _round_up(x, m):
    return (x + m - 1) // m * m


# ----------------------------------------------------------------------------
# In-kernel helpers (traced inside the Pallas kernels)
# ----------------------------------------------------------------------------
def _conv3x3_s1(xpad_ref, x, w9_ref, b_ref, *, mp, wp):
    """3x3 stride-1 pad-1 conv on a padded-flat (cin, mp) activation.

    x (f32) has zeros on its spatial ring / lane tail, so the nine tap windows
    (static lane-shifted views of the zero-margined VMEM scratch) already see
    the correct conv zero padding.  Returns conv(x) + bias in f32.
    """
    xpad_ref[:, pl.ds(_PADL, mp)] = x.astype(xpad_ref.dtype)   # bf16 MXU input
    acc = None
    t = 0
    for di in (-1, 0, 1):
        for dj in (-1, 0, 1):
            win = xpad_ref[:, pl.ds(_PADL + di * wp + dj, mp)]   # (cin, mp) bf16
            part = jnp.dot(w9_ref[t], win, preferred_element_type=jnp.float32)
            acc = part if acc is None else acc + part
            t += 1
    return acc + b_ref[...]


def _block_s1(xpad_ref, x, w1, b1, w2, b2, mask, *, mp, wp):
    """BasicBlock, stride 1: relu(conv) -> conv + residual -> relu, all f32."""
    y = jnp.maximum(_conv3x3_s1(xpad_ref, x, w1, b1, mp=mp, wp=wp), 0.0) * mask
    z = _conv3x3_s1(xpad_ref, y, w2, b2, mp=mp, wp=wp)
    return jnp.maximum(z + x, 0.0) * mask


# ----------------------------------------------------------------------------
# Pallas kernels (one per fused stage)
# ----------------------------------------------------------------------------
def _conv1_kernel(w_ref, b_ref, p_ref, o_ref):
    """conv1(7x7, s2) + folded BN + ReLU as one matmul over im2col patches."""
    y = jnp.dot(w_ref[...], p_ref[...], preferred_element_type=jnp.float32)
    o_ref[...] = jnp.maximum(y + b_ref[...], 0.0).astype(o_ref.dtype)


def _layer1_kernel(slabs_ref, mask_ref,
                   w1a, b1a, w2a, b2a, w1b, b1b, w2b, b2b,
                   o_ref, xpad_ref, *, mp, wp):
    """Fused maxpool(3,2,1) + both stride-1 BasicBlocks of layer1 (VMEM resident)."""
    xpad_ref[...] = jnp.zeros_like(xpad_ref)          # zero margins once
    m = slabs_ref[0].astype(jnp.float32)
    for t in range(1, 9):
        m = jnp.maximum(m, slabs_ref[t].astype(jnp.float32))
    mask = mask_ref[...]
    x = _block_s1(xpad_ref, m, w1a, b1a, w2a, b2a, mask, mp=mp, wp=wp)
    x = _block_s1(xpad_ref, x, w1b, b1b, w2b, b2b, mask, mp=mp, wp=wp)
    o_ref[...] = x.astype(o_ref.dtype)


def _stage_kernel(p_ref, mask_ref, wm, bm, floor,
                  w2, b2, w3, b3, w4, b4,
                  o_ref, xpad_ref, *, cout, mp, wp):
    """Fused downsample stage (layer2 / layer3).

    Merged stride-2 conv (main 3x3 + downsample 1x1 concatenated along cout,
    one matmul) -> partial ReLU via floor operand -> rest of block0 and all of
    block1 with in-kernel stride-1 convs and VMEM-resident activations.
    """
    xpad_ref[...] = jnp.zeros_like(xpad_ref)
    mask = mask_ref[...]
    y = jnp.dot(wm[...], p_ref[...], preferred_element_type=jnp.float32) + bm[...]
    y = jnp.maximum(y, floor[...]) * mask             # ReLU on main rows only; ring -> 0
    x_main, ident = y[:cout], y[cout:]
    z = _conv3x3_s1(xpad_ref, x_main, w2, b2, mp=mp, wp=wp)
    x = jnp.maximum(z + ident, 0.0) * mask            # block0 done
    x = _block_s1(xpad_ref, x, w3, b3, w4, b4, mask, mp=mp, wp=wp)   # block1
    o_ref[...] = x.astype(o_ref.dtype)


# ----------------------------------------------------------------------------
# Wrapper-side layout helpers (XLA glue only at stride-2 boundaries)
# ----------------------------------------------------------------------------
def _to_padded_flat(v, mp):
    """(C, N, H, W) -> (C, mp): flatten with a zero spatial ring + zero lane tail."""
    c, n, h, w = v.shape
    vp = jnp.pad(v, ((0, 0), (0, 0), (1, 1), (1, 1)))
    flat = vp.reshape(c, n * (h + 2) * (w + 2))
    return jnp.pad(flat, ((0, 0), (0, mp - flat.shape[1])))


def _interior_mask(n, h, w, mp):
    m = jnp.zeros((n, h + 2, w + 2), jnp.float32).at[:, 1:h + 1, 1:w + 1].set(1.0)
    m = m.reshape(1, n * (h + 2) * (w + 2))
    return jnp.pad(m, ((0, 0), (0, mp - m.shape[1])))


def _s2_tap_slabs(x4, ho, wo, mp_out):
    """Nine stride-2 tap slabs of a spatially padded (C, N, Hp, Wp) tensor,
    each repacked into the padded-flat layout of the (ho, wo) output grid."""
    c, n, _, _ = x4.shape
    slabs = []
    for i in range(3):
        for j in range(3):
            v = jax.lax.slice(
                x4, (0, 0, i, j),
                (c, n, i + 2 * (ho - 1) + 1, j + 2 * (wo - 1) + 1),
                (1, 1, 2, 2))                                   # (c, n, ho, wo)
            slabs.append(_to_padded_flat(v, mp_out))
    return slabs


# ----------------------------------------------------------------------------
# Stage wrappers
# ----------------------------------------------------------------------------
def conv1_stage(x_nchw, w, b):
    """conv1(7x7, s2, p3) + folded BN + ReLU.  Returns (c1, N*Ho*Wo) bf16."""
    n, c_in, h_in, _ = x_nchw.shape
    ho = wo = h_in // 2
    xp = jnp.pad(jnp.transpose(x_nchw, (1, 0, 2, 3)),
                 ((0, 0), (0, 0), (3, 3), (3, 3)))
    slabs = []
    for i in range(7):
        for j in range(7):
            v = jax.lax.slice(
                xp, (0, 0, i, j),
                (c_in, n, i + 2 * (ho - 1) + 1, j + 2 * (wo - 1) + 1),
                (1, 1, 2, 2))
            slabs.append(v.reshape(c_in, n * ho * wo))
    k = 49 * c_in
    kp = _round_up(k, 16)                       # pad K for bf16 sublane packing
    if kp > k:
        slabs.append(jnp.zeros((kp - k, n * ho * wo), x_nchw.dtype))
    patches = jnp.concatenate(slabs, axis=0).astype(jnp.bfloat16)
    c1 = w.shape[0]
    out = pl.pallas_call(
        _conv1_kernel,
        out_shape=jax.ShapeDtypeStruct((c1, n * ho * wo), jnp.bfloat16),
    )(w, b, patches)
    return out, (n, ho, wo)


def layer1_stage(y_conv1, dims, blocks):
    """Fused maxpool(3,2,1) + layer1 (two stride-1 blocks)."""
    n, h, w = dims
    c1 = y_conv1.shape[0]
    ho, wo = h // 2, w // 2
    mp = _round_up(n * (ho + 2) * (wo + 2), 128)
    mask = _interior_mask(n, ho, wo, mp)
    y4 = jnp.pad(y_conv1.reshape(c1, n, h, w), ((0, 0), (0, 0), (1, 1), (1, 1)))
    slabs = jnp.stack(_s2_tap_slabs(y4, ho, wo, mp), axis=0).astype(jnp.bfloat16)
    blk0, blk1 = blocks
    out = pl.pallas_call(
        functools.partial(_layer1_kernel, mp=mp, wp=wo + 2),
        out_shape=jax.ShapeDtypeStruct((c1, mp), jnp.bfloat16),
        scratch_shapes=[pltpu.VMEM((c1, mp + 2 * _PADL), jnp.bfloat16)],
    )(slabs, mask,
      blk0["w1"], blk0["b1"], blk0["w2"], blk0["b2"],
      blk1["w1"], blk1["b1"], blk1["w2"], blk1["b2"])
    return out, (n, ho, wo)


def down_stage(x_prev, dims, blocks, c_out, out_dtype):
    """Fused layer2 / layer3 (merged stride-2 conv + 3 stride-1 convs)."""
    n, h, w = dims
    c_in = x_prev.shape[0]
    x4 = x_prev[:, :n * (h + 2) * (w + 2)].reshape(c_in, n, h + 2, w + 2)
    ho, wo = h // 2, w // 2
    mp = _round_up(n * (ho + 2) * (wo + 2), 128)
    mask = _interior_mask(n, ho, wo, mp)
    patches = jnp.concatenate(_s2_tap_slabs(x4, ho, wo, mp), axis=0).astype(jnp.bfloat16)
    blk0, blk1 = blocks
    out = pl.pallas_call(
        functools.partial(_stage_kernel, cout=c_out, mp=mp, wp=wo + 2),
        out_shape=jax.ShapeDtypeStruct((c_out, mp), out_dtype),
        scratch_shapes=[pltpu.VMEM((c_out, mp + 2 * _PADL), jnp.bfloat16)],
    )(patches, mask,
      blk0["wm"], blk0["bm"], blk0["floor"], blk0["w2"], blk0["b2"],
      blk1["w1"], blk1["b1"], blk1["w2"], blk1["b2"])
    return out, (n, ho, wo)


# ----------------------------------------------------------------------------
# Parameter construction (deterministic, synthetic); frozen BN folded in.
# ----------------------------------------------------------------------------
def _bn_fold(gamma, beta, mean, var, eps=1e-5):
    scale = gamma / jnp.sqrt(var + eps)
    return scale, beta - mean * scale


def _init_conv(key, kh, kw, cin, cout):
    return jax.random.normal(key, (kh, kw, cin, cout), jnp.float32) / sqrt(kh * kw * cin)


def _init_bn(key, c):
    k1, k2, k3, k4 = jax.random.split(key, 4)
    gamma = 1.0 + 0.1 * jax.random.normal(k1, (c,), jnp.float32)
    beta = 0.1 * jax.random.normal(k2, (c,), jnp.float32)
    mean = 0.1 * jax.random.normal(k3, (c,), jnp.float32)
    var = jnp.abs(jax.random.normal(k4, (c,), jnp.float32)) + 0.5
    return _bn_fold(gamma, beta, mean, var)


def _tap_major(w_hwio):
    """(3,3,cin,cout) -> (9, cout, cin) tap-major weight, bf16."""
    kh, kw, cin, cout = w_hwio.shape
    return jnp.transpose(w_hwio.reshape(kh * kw, cin, cout), (0, 2, 1)).astype(jnp.bfloat16)


def _init_block_plain(key, cin, cout):
    k = jax.random.split(key, 4)
    w1 = _init_conv(k[0], 3, 3, cin, cout); s1, b1 = _init_bn(k[1], cout)
    w2 = _init_conv(k[2], 3, 3, cout, cout); s2, b2 = _init_bn(k[3], cout)
    return {"w1": _tap_major(w1 * s1), "b1": b1.reshape(cout, 1),
            "w2": _tap_major(w2 * s2), "b2": b2.reshape(cout, 1)}


def _init_block_down(key, cin, cout):
    k = jax.random.split(key, 6)
    w1 = _init_conv(k[0], 3, 3, cin, cout); s1, b1 = _init_bn(k[1], cout)
    w2 = _init_conv(k[2], 3, 3, cout, cout); s2, b2 = _init_bn(k[3], cout)
    wd = _init_conv(k[4], 1, 1, cin, cout); sd, bd = _init_bn(k[5], cout)
    # Embed the 1x1 stride-2 downsample conv at the centre tap of a zero 3x3
    # kernel and concatenate along cout: both branches share one matmul.
    wd3 = jnp.zeros((3, 3, cin, cout), jnp.float32).at[1, 1].set((wd * sd)[0, 0])
    wm = jnp.concatenate([w1 * s1, wd3], axis=3)                      # (3,3,cin,2c)
    wm = jnp.transpose(wm, (3, 0, 1, 2)).reshape(2 * cout, 9 * cin).astype(jnp.bfloat16)
    bm = jnp.concatenate([b1, bd]).reshape(2 * cout, 1)
    floor = jnp.concatenate([jnp.zeros((cout,), jnp.float32),
                             jnp.full((cout,), _NEG, jnp.float32)]).reshape(2 * cout, 1)
    return {"wm": wm, "bm": bm, "floor": floor,
            "w2": _tap_major(w2 * s2), "b2": b2.reshape(cout, 1)}


def init_params(key, c_in=3, c1=8):
    c2, c3 = 2 * c1, 4 * c1
    keys = jax.random.split(key, 8)
    w7 = _init_conv(keys[0], 7, 7, c_in, c1)
    s, b = _init_bn(keys[1], c1)
    k = 49 * c_in
    kp = _round_up(k, 16)
    conv1_w = jnp.transpose(w7 * s, (3, 0, 1, 2)).reshape(c1, k)
    conv1_w = jnp.pad(conv1_w, ((0, 0), (0, kp - k))).astype(jnp.bfloat16)
    return {
        "conv1_w": conv1_w, "conv1_b": b.reshape(c1, 1),
        "layer1": [_init_block_plain(keys[2], c1, c1),
                   _init_block_plain(keys[3], c1, c1)],
        "layer2": [_init_block_down(keys[4], c1, c2),
                   _init_block_plain(keys[5], c2, c2)],
        "layer3": [_init_block_down(keys[6], c2, c3),
                   _init_block_plain(keys[7], c3, c3)],
    }


# ----------------------------------------------------------------------------
# Model forward (equivalent of FeatureExtractor.forward)
# ----------------------------------------------------------------------------
def feature_extractor(params, image_data_nchw):
    # TODO(synk): train()/freeze logic is a training-time no-op for this forward
    # pass (frozen BN in eval mode is folded into weights/bias at init).
    c1 = params["conv1_b"].shape[0]
    x, dims = conv1_stage(image_data_nchw, params["conv1_w"], params["conv1_b"])
    x, dims = layer1_stage(x, dims, params["layer1"])                 # maxpool + layer1
    x, dims = down_stage(x, dims, params["layer2"], 2 * c1, jnp.bfloat16)
    x, dims = down_stage(x, dims, params["layer3"], 4 * c1, jnp.float32)
    # padded-flat (C, Mp) -> NCHW
    n, hf, wf = dims
    c3 = 4 * c1
    xf = x[:, :n * (hf + 2) * (wf + 2)].reshape(c3, n, hf + 2, wf + 2)
    y = jnp.transpose(xf[:, :, 1:hf + 1, 1:wf + 1], (1, 0, 2, 3))
    return y, y                                                       # forward returns (y, y)


if __name__ == "__main__":
    key = jax.random.PRNGKey(0)
    k_params, k_x = jax.random.split(key)
    params = init_params(k_params, c_in=3, c1=8)
    x = jax.random.normal(k_x, (2, 3, 32, 32), jnp.float32)   # small NCHW image

    fwd = jax.jit(functools.partial(feature_extractor, params))
    y1, y2 = fwd(x)
    jax.block_until_ready((y1, y2))

    # 32x32 -> conv1 s2 (16) -> maxpool s2 (8) -> layer2 s2 (4) -> layer3 s2 (2)
    assert y1.shape == (2, 32, 2, 2), y1.shape
    assert y2.shape == y1.shape
    assert bool(jnp.all(jnp.isfinite(y1)))
    print("KERNEL_OK")
</pallas_src>

<mosaic_0001>
module attributes {stable_mosaic.version = 11 : i64} {
  func.func @_conv1_kernel(%arg0: memref<8x160xbf16, #tpu.memory_space<vmem>>, %arg1: memref<8x1xf32, #tpu.memory_space<vmem>>, %arg2: memref<160x512xbf16, #tpu.memory_space<vmem>>, %arg3: memref<8x512xbf16, #tpu.memory_space<vmem>>) attributes {dimension_semantics = [], scalar_prefetch = 0 : i64, scratch_operands = 0 : i64, tpu.core_type = #tpu.core_type<tc>} {
    %c0 = arith.constant 0 : index
    %c0_0 = arith.constant 0 : index
    %0 = vector.load %arg0[%c0, %c0_0] : memref<8x160xbf16, #tpu.memory_space<vmem>>, vector<8x160xbf16>
    %c0_1 = arith.constant 0 : index
    %c0_2 = arith.constant 0 : index
    %1 = vector.load %arg2[%c0_1, %c0_2] : memref<160x512xbf16, #tpu.memory_space<vmem>>, vector<160x512xbf16>
    %cst = arith.constant dense<0.000000e+00> : vector<8x512xf32>
    %2 = tpu.matmul %0, %1, %cst {dimension_numbers = #tpu.dot_dimension_numbers<[1], [0], [0], [1], [0, 0, 1, 1], [], []>} : vector<8x160xbf16>, vector<160x512xbf16>, vector<8x512xf32> -> vector<8x512xf32>
    %c0_3 = arith.constant 0 : index
    %c0_4 = arith.constant 0 : index
    %3 = vector.load %arg1[%c0_3, %c0_4] : memref<8x1xf32, #tpu.memory_space<vmem>>, vector<8x1xf32>
    %4 = vector.broadcast %3 : vector<8x1xf32> to vector<8x512xf32>
    %5 = arith.addf %2, %4 : vector<8x512xf32>
    %cst_5 = arith.constant 0.000000e+00 : f32
    %6 = vector.broadcast %cst_5 : f32 to vector<8x512xf32>
    %7 = arith.maximumf %5, %6 : vector<8x512xf32>
    %8 = arith.truncf %7 : vector<8x512xf32> to vector<8x512xbf16>
    %c0_6 = arith.constant 0 : index
    %c0_7 = arith.constant 0 : index
    %9 = vector.load %arg3[%c0_6, %c0_7] : memref<8x512xbf16, #tpu.memory_space<vmem>>, vector<8x512xbf16>
    tpu.vector_store %arg3[%c0_6, %c0_7], %8 {strides = array<i32>} : memref<8x512xbf16, #tpu.memory_space<vmem>>, vector<8x512xbf16>,
    return
  }
}

module attributes {stable_mosaic.version = 11 : i64} {
  func.func @_layer1_kernel(%arg0: memref<9x8x256xbf16, #tpu.memory_space<vmem>>, %arg1: memref<1x256xf32, #tpu.memory_space<vmem>>, %arg2: memref<9x8x8xbf16, #tpu.memory_space<vmem>>, %arg3: memref<8x1xf32, #tpu.memory_space<vmem>>, %arg4: memref<9x8x8xbf16, #tpu.memory_space<vmem>>, %arg5: memref<8x1xf32, #tpu.memory_space<vmem>>, %arg6: memref<9x8x8xbf16, #tpu.memory_space<vmem>>, %arg7: memref<8x1xf32, #tpu.memory_space<vmem>>, %arg8: memref<9x8x8xbf16, #tpu.memory_space<vmem>>, %arg9: memref<8x1xf32, #tpu.memory_space<vmem>>, %arg10: memref<8x256xbf16, #tpu.memory_space<vmem>>, %arg11: memref<8x512xbf16, #tpu.memory_space<vmem>>) attributes {dimension_semantics = [], scalar_prefetch = 0 : i64, scratch_operands = 1 : i64, tpu.core_type = #tpu.core_type<tc>} {
    %cst = arith.constant 0.000000e+00 : bf16
    %0 = vector.broadcast %cst : bf16 to vector<8x512xbf16>
    %c0 = arith.constant 0 : index
    %c0_0 = arith.constant 0 : index
    %1 = vector.load %arg11[%c0, %c0_0] : memref<8x512xbf16, #tpu.memory_space<vmem>>, vector<8x512xbf16>
    tpu.vector_store %arg11[%c0, %c0_0], %0 {strides = array<i32>} : memref<8x512xbf16, #tpu.memory_space<vmem>>, vector<8x512xbf16>,
    %c0_1 = arith.constant 0 : index
    %c0_2 = arith.constant 0 : index
    %c0_3 = arith.constant 0 : index
    %2 = vector.load %arg0[%c0_1, %c0_2, %c0_3] : memref<9x8x256xbf16, #tpu.memory_space<vmem>>, vector<1x8x256xbf16>
    %3 = vector.shape_cast %2 : vector<1x8x256xbf16> to vector<8x256xbf16>
    %4 = arith.extf %3 : vector<8x256xbf16> to vector<8x256xf32>
    %c1 = arith.constant 1 : index
    %c0_4 = arith.constant 0 : index
    %c0_5 = arith.constant 0 : index
    %5 = vector.load %arg0[%c1, %c0_4, %c0_5] : memref<9x8x256xbf16, #tpu.memory_space<vmem>>, vector<1x8x256xbf16>
    %6 = vector.shape_cast %5 : vector<1x8x256xbf16> to vector<8x256xbf16>
    %7 = arith.extf %6 : vector<8x256xbf16> to vector<8x256xf32>
    %8 = arith.maximumf %4, %7 : vector<8x256xf32>
    %c2 = arith.constant 2 : index
    %c0_6 = arith.constant 0 : index
    %c0_7 = arith.constant 0 : index
    %9 = vector.load %arg0[%c2, %c0_6, %c0_7] : memref<9x8x256xbf16, #tpu.memory_space<vmem>>, vector<1x8x256xbf16>
    %10 = vector.shape_cast %9 : vector<1x8x256xbf16> to vector<8x256xbf16>
    %11 = arith.extf %10 : vector<8x256xbf16> to vector<8x256xf32>
    %12 = arith.maximumf %8, %11 : vector<8x256xf32>
    %c3 = arith.constant 3 : index
    %c0_8 = arith.constant 0 : index
    %c0_9 = arith.constant 0 : index
    %13 = vector.load %arg0[%c3, %c0_8, %c0_9] : memref<9x8x256xbf16, #tpu.memory_space<vmem>>, vector<1x8x256xbf16>
    %14 = vector.shape_cast %13 : vector<1x8x256xbf16> to vector<8x256xbf16>
    %15 = arith.extf %14 : vector<8x256xbf16> to vector<8x256xf32>
    %16 = arith.maximumf %12, %15 : vector<8x256xf32>
    %c4 = arith.constant 4 : index
    %c0_10 = arith.constant 0 : index
    %c0_11 = arith.constant 0 : index
    %17 = vector.load %arg0[%c4, %c0_10, %c0_11] : memref<9x8x256xbf16, #tpu.memory_space<vmem>>, vector<1x8x256xbf16>
    %18 = vector.shape_cast %17 : vector<1x8x256xbf16> to vector<8x256xbf16>
    %19 = arith.extf %18 : vector<8x256xbf16> to vector<8x256xf32>
    %20 = arith.maximumf %16, %19 : vector<8x256xf32>
    %c5 = arith.constant 5 : index
    %c0_12 = arith.constant 0 : index
    %c0_13 = arith.constant 0 : index
    %21 = vector.load %arg0[%c5, %c0_12, %c0_13] : memref<9x8x256xbf16, #tpu.memory_space<vmem>>, vector<1x8x256xbf16>
    %22 = vector.shape_cast %21 : vector<1x8x256xbf16> to vector<8x256xbf16>
    %23 = arith.extf %22 : vector<8x256xbf16> to vector<8x256xf32>
    %24 = arith.maximumf %20, %23 : vector<8x256xf32>
    %c6 = arith.constant 6 : index
    %c0_14 = arith.constant 0 : index
    %c0_15 = arith.constant 0 : index
    %25 = vector.load %arg0[%c6, %c0_14, %c0_15] : memref<9x8x256xbf16, #tpu.memory_space<vmem>>, vector<1x8x256xbf16>
    %26 = vector.shape_cast %25 : vector<1x8x256xbf16> to vector<8x256xbf16>
    %27 = arith.extf %26 : vector<8x256xbf16> to vector<8x256xf32>
    %28 = arith.maximumf %24, %27 : vector<8x256xf32>
    %c7 = arith.constant 7 : index
    %c0_16 = arith.constant 0 : index
    %c0_17 = arith.constant 0 : index
    %29 = vector.load %arg0[%c7, %c0_16, %c0_17] : memref<9x8x256xbf16, #tpu.memory_space<vmem>>, vector<1x8x256xbf16>
    %30 = vector.shape_cast %29 : vector<1x8x256xbf16> to vector<8x256xbf16>
    %31 = arith.extf %30 : vector<8x256xbf16> to vector<8x256xf32>
    %32 = arith.maximumf %28, %31 : vector<8x256xf32>
    %c8 = arith.constant 8 : index
    %c0_18 = arith.constant 0 : index
    %c0_19 = arith.constant 0 : index
    %33 = vector.load %arg0[%c8, %c0_18, %c0_19] : memref<9x8x256xbf16, #tpu.memory_space<vmem>>, vector<1x8x256xbf16>
    %34 = vector.shape_cast %33 : vector<1x8x256xbf16> to vector<8x256xbf16>
    %35 = arith.extf %34 : vector<8x256xbf16> to vector<8x256xf32>
    %36 = arith.maximumf %32, %35 : vector<8x256xf32>
    %c0_20 = arith.constant 0 : index
    %c0_21 = arith.constant 0 : index
    %37 = vector.load %arg1[%c0_20, %c0_21] : memref<1x256xf32, #tpu.memory_space<vmem>>, vector<1x256xf32>
    %38 = arith.truncf %36 : vector<8x256xf32> to vector<8x256xbf16>
    %c0_22 = arith.constant 0 : index
    %c128 = arith.constant 128 : index
    %39 = vector.load %arg11[%c0_22, %c128] : memref<8x512xbf16, #tpu.memory_space<vmem>>, vector<8x256xbf16>
    tpu.vector_store %arg11[%c0_22, %c128], %38 {strides = array<i32>} : memref<8x512xbf16, #tpu.memory_space<vmem>>, vector<8x256xbf16>,
    %c0_23 = arith.constant 0 : index
    %c117 = arith.constant 117 : index
    %40 = vector.load %arg11[%c0_23, %c117] : memref<8x512xbf16, #tpu.memory_space<vmem>>, vector<8x256xbf16>
    %c0_24 = arith.constant 0 : index
    %c0_25 = arith.constant 0 : index
    %c0_26 = arith.constant 0 : index
    %41 = vector.load %arg2[%c0_24, %c0_25, %c0_26] : memref<9x8x8xbf16, #tpu.memory_space<vmem>>, vector<1x8x8xbf16>
    %42 = vector.shape_cast %41 : vector<1x8x8xbf16> to vector<8x8xbf16>
    %cst_27 = arith.constant dense<0.000000e+00> : vector<8x256xf32>
    %43 = tpu.matmul %42, %40, %cst_27 {dimension_numbers = #tpu.dot_dimension_numbers<[1], [0], [0], [1], [0, 0, 1, 1], [], []>} : vector<8x8xbf16>, vector<8x256xbf16>, vector<8x256xf32> -> vector<8x256xf32>
    %c0_28 = arith.constant 0 : index
    %c118 = arith.constant 118 : index
    %44 = vector.load %arg11[%c0_28, %c118] : memref<8x512xbf16, #tpu.memory_space<vmem>>, vector<8x256xbf16>
    %c1_29 = arith.constant 1 : index
    %c0_30 = arith.constant 0 : index
    %c0_31 = arith.constant 0 : index
    %45 = vector.load %arg2[%c1_29, %c0_30, %c0_31] : memref<9x8x8xbf16, #tpu.memory_space<vmem>>, vector<1x8x8xbf16>
    %46 = vector.shape_cast %45 : vector<1x8x8xbf16> to vector<8x8xbf16>
    %cst_32 = arith.constant dense<0.000000e+00> : vector<8x256xf32>
    %47 = tpu.matmul %46, %44, %cst_32 {dimension_numbers = #tpu.dot_dimension_numbers<[1], [0], [0], [1], [0, 0, 1, 1], [], []>} : vector<8x8xbf16>, vector<8x256xbf16>, vector<8x256xf32> -> vector<8x256xf32>
    %48 = arith.addf %43, %47 : vector<8x256xf32>
    %c0_33 = arith.constant 0 : index
    %c119 = arith.constant 119 : index
    %49 = vector.load %arg11[%c0_33, %c119] : memref<8x512xbf16, #tpu.memory_space<vmem>>, vector<8x256xbf16>
    %c2_34 = arith.constant 2 : index
    %c0_35 = arith.constant 0 : index
    %c0_36 = arith.constant 0 : index
    %50 = vector.load %arg2[%c2_34, %c0_35, %c0_36] : memref<9x8x8xbf16, #tpu.memory_space<vmem>>, vector<1x8x8xbf16>
    %51 = vector.shape_cast %50 : vector<1x8x8xbf16> to vector<8x8xbf16>
    %cst_37 = arith.constant dense<0.000000e+00> : vector<8x256xf32>
    %52 = tpu.matmul %51, %49, %cst_37 {dimension_numbers = #tpu.dot_dimension_numbers<[1], [0], [0], [1], [0, 0, 1, 1], [], []>} : vector<8x8xbf16>, vector<8x256xbf16>, vector<8x256xf32> -> vector<8x256xf32>
    %53 = arith.addf %48, %52 : vector<8x256xf32>
    %c0_38 = arith.constant 0 : index
    %c127 = arith.constant 127 : index
    %54 = vector.load %arg11[%c0_38, %c127] : memref<8x512xbf16, #tpu.memory_space<vmem>>, vector<8x256xbf16>
    %c3_39 = arith.constant 3 : index
    %c0_40 = arith.constant 0 : index
    %c0_41 = arith.constant 0 : index
    %55 = vector.load %arg2[%c3_39, %c0_40, %c0_41] : memref<9x8x8xbf16, #tpu.memory_space<vmem>>, vector<1x8x8xbf16>
    %56 = vector.shape_cast %55 : vector<1x8x8xbf16> to vector<8x8xbf16>
    %cst_42 = arith.constant dense<0.000000e+00> : vector<8x256xf32>
    %57 = tpu.matmul %56, %54, %cst_42 {dimension_numbers = #tpu.dot_dimension_numbers<[1], [0], [0], [1], [0, 0, 1, 1], [], []>} : vector<8x8xbf16>, vector<8x256xbf16>, vector<8x256xf32> -> vector<8x256xf32>
    %58 = arith.addf %53, %57 : vector<8x256xf32>
    %c0_43 = arith.constant 0 : index
    %c128_44 = arith.constant 128 : index
    %59 = vector.load %arg11[%c0_43, %c128_44] : memref<8x512xbf16, #tpu.memory_space<vmem>>, vector<8x256xbf16>
    %c4_45 = arith.constant 4 : index
    %c0_46 = arith.constant 0 : index
    %c0_47 = arith.constant 0 : index
    %60 = vector.load %arg2[%c4_45, %c0_46, %c0_47] : memref<9x8x8xbf16, #tpu.memory_space<vmem>>, vector<1x8x8xbf16>
    %61 = vector.shape_cast %60 : vector<1x8x8xbf16> to vector<8x8xbf16>
    %cst_48 = arith.constant dense<0.000000e+00> : vector<8x256xf32>
    %62 = tpu.matmul %61, %59, %cst_48 {dimension_numbers = #tpu.dot_dimension_numbers<[1], [0], [0], [1], [0, 0, 1, 1], [], []>} : vector<8x8xbf16>, vector<8x256xbf16>, vector<8x256xf32> -> vector<8x256xf32>
    %63 = arith.addf %58, %62 : vector<8x256xf32>
    %c0_49 = arith.constant 0 : index
    %c129 = arith.constant 129 : index
    %64 = vector.load %arg11[%c0_49, %c129] : memref<8x512xbf16, #tpu.memory_space<vmem>>, vector<8x256xbf16>
    %c5_50 = arith.constant 5 : index
    %c0_51 = arith.constant 0 : index
    %c0_52 = arith.constant 0 : index
    %65 = vector.load %arg2[%c5_50, %c0_51, %c0_52] : memref<9x8x8xbf16, #tpu.memory_space<vmem>>, vector<1x8x8xbf16>
    %66 = vector.shape_cast %65 : vector<1x8x8xbf16> to vector<8x8xbf16>
    %cst_53 = arith.constant dense<0.000000e+00> : vector<8x256xf32>
    %67 = tpu.matmul %66, %64, %cst_53 {dimension_numbers = #tpu.dot_dimension_numbers<[1], [0], [0], [1], [0, 0, 1, 1], [], []>} : vector<8x8xbf16>, vector<8x256xbf16>, vector<8x256xf32> -> vector<8x256xf32>
    %68 = arith.addf %63, %67 : vector<8x256xf32>
    %c0_54 = arith.constant 0 : index
    %c137 = arith.constant 137 : index
    %69 = vector.load %arg11[%c0_54, %c137] : memref<8x512xbf16, #tpu.memory_space<vmem>>, vector<8x256xbf16>
    %c6_55 = arith.constant 6 : index
    %c0_56 = arith.constant 0 : index
    %c0_57 = arith.constant 0 : index
    %70 = vector.load %arg2[%c6_55, %c0_56, %c0_57] : memref<9x8x8xbf16, #tpu.memory_space<vmem>>, vector<1x8x8xbf16>
    %71 = vector.shape_cast %70 : vector<1x8x8xbf16> to vector<8x8xbf16>
    %cst_58 = arith.constant dense<0.000000e+00> : vector<8x256xf32>
    %72 = tpu.matmul %71, %69, %cst_58 {dimension_numbers = #tpu.dot_dimension_numbers<[1], [0], [0], [1], [0, 0, 1, 1], [], []>} : vector<8x8xbf16>, vector<8x256xbf16>, vector<8x256xf32> -> vector<8x256xf32>
    %73 = arith.addf %68, %72 : vector<8x256xf32>
    %c0_59 = arith.constant 0 : index
    %c138 = arith.constant 138 : index
    %74 = vector.load %arg11[%c0_59, %c138] : memref<8x512xbf16, #tpu.memory_space<vmem>>, vector<8x256xbf16>
    %c7_60 = arith.constant 7 : index
    %c0_61 = arith.constant 0 : index
    %c0_62 = arith.constant 0 : index
    %75 = vector.load %arg2[%c7_60, %c0_61, %c0_62] : memref<9x8x8xbf16, #tpu.memory_space<vmem>>, vector<1x8x8xbf16>
    %76 = vector.shape_cast %75 : vector<1x8x8xbf16> to vector<8x8xbf16>
    %cst_63 = arith.constant dense<0.000000e+00> : vector<8x256xf32>
    %77 = tpu.matmul %76, %74, %cst_63 {dimension_numbers = #tpu.dot_dimension_numbers<[1], [0], [0], [1], [0, 0, 1, 1], [], []>} : vector<8x8xbf16>, vector<8x256xbf16>, vector<8x256xf32> -> vector<8x256xf32>
    %78 = arith.addf %73, %77 : vector<8x256xf32>
    %c0_64 = arith.constant 0 : index
    %c139 = arith.constant 139 : index
    %79 = vector.load %arg11[%c0_64, %c139] : memref<8x512xbf16, #tpu.memory_space<vmem>>, vector<8x256xbf16>
    %c8_65 = arith.constant 8 : index
    %c0_66 = arith.constant 0 : index
    %c0_67 = arith.constant 0 : index
    %80 = vector.load %arg2[%c8_65, %c0_66, %c0_67] : memref<9x8x8xbf16, #tpu.memory_space<vmem>>, vector<1x8x8xbf16>
    %81 = vector.shape_cast %80 : vector<1x8x8xbf16> to vector<8x8xbf16>
    %cst_68 = arith.constant dense<0.000000e+00> : vector<8x256xf32>
    %82 = tpu.matmul %81, %79, %cst_68 {dimension_numbers = #tpu.dot_dimension_numbers<[1], [0], [0], [1], [0, 0, 1, 1], [], []>} : vector<8x8xbf16>, vector<8x256xbf16>, vector<8x256xf32> -> vector<8x256xf32>
    %83 = arith.addf %78, %82 : vector<8x256xf32>
    %c0_69 = arith.constant 0 : index
    %c0_70 = arith.constant 0 : index
    %84 = vector.load %arg3[%c0_69, %c0_70] : memref<8x1xf32, #tpu.memory_space<vmem>>, vector<8x1xf32>
    %85 = vector.broadcast %84 : vector<8x1xf32> to vector<8x256xf32>
    %86 = arith.addf %83, %85 : vector<8x256xf32>
    %cst_71 = arith.constant 0.000000e+00 : f32
    %87 = vector.broadcast %cst_71 : f32 to vector<8x256xf32>
    %88 = arith.maximumf %86, %87 : vector<8x256xf32>
    %89 = vector.broadcast %37 : vector<1x256xf32> to vector<8x256xf32>
    %90 = arith.mulf %88, %89 : vector<8x256xf32>
    %91 = arith.truncf %90 : vector<8x256xf32> to vector<8x256xbf16>
    %c0_72 = arith.constant 0 : index
    %c128_73 = arith.constant 128 : index
    %92 = vector.load %arg11[%c0_72, %c128_73] : memref<8x512xbf16, #tpu.memory_space<vmem>>, vector<8x256xbf16>
    tpu.vector_store %arg11[%c0_72, %c128_73], %91 {strides = array<i32>} : memref<8x512xbf16, #tpu.memory_space<vmem>>, vector<8x256xbf16>,
    %c0_74 = arith.constant 0 : index
    %c117_75 = arith.constant 117 : index
    %93 = vector.load %arg11[%c0_74, %c117_75] : memref<8x512xbf16, #tpu.memory_space<vmem>>, vector<8x256xbf16>
    %c0_76 = arith.constant 0 : index
    %c0_77 = arith.constant 0 : index
    %c0_78 = arith.constant 0 : index
    %94 = vector.load %arg4[%c0_76, %c0_77, %c0_78] : memref<9x8x8xbf16, #tpu.memory_space<vmem>>, vector<1x8x8xbf16>
    %95 = vector.shape_cast %94 : vector<1x8x8xbf16> to vector<8x8xbf16>
    %cst_79 = arith.constant dense<0.000000e+00> : vector<8x256xf32>
    %96 = tpu.matmul %95, %93, %cst_79 {dimension_numbers = #tpu.dot_dimension_numbers<[1], [0], [0], [1], [0, 0, 1, 1], [], []>} : vector<8x8xbf16>, vector<8x256xbf16>, vector<8x256xf32> -> vector<8x256xf32>
    %c0_80 = arith.constant 0 : index
    %c118_81 = arith.constant 118 : index
    %97 = vector.load %arg11[%c0_80, %c118_81] : memref<8x512xbf16, #tpu.memory_space<vmem>>, vector<8x256xbf16>
    %c1_82 = arith.constant 1 : index
    %c0_83 = arith.constant 0 : index
    %c0_84 = arith.constant 0 : index
    %98 = vector.load %arg4[%c1_82, %c0_83, %c0_84] : memref<9x8x8xbf16, #tpu.memory_space<vmem>>, vector<1x8x8xbf16>
    %99 = vector.shape_cast %98 : vector<1x8x8xbf16> to vector<8x8xbf16>
    %cst_85 = arith.constant dense<0.000000e+00> : vector<8x256xf32>
    %100 = tpu.matmul %99, %97, %cst_85 {dimension_numbers = #tpu.dot_dimension_numbers<[1], [0], [0], [1], [0, 0, 1, 1], [], []>} : vector<8x8xbf16>, vector<8x256xbf16>, vector<8x256xf32> -> vector<8x256xf32>
    %101 = arith.addf %96, %100 : vector<8x256xf32>
    %c0_86 = arith.constant 0 : index
    %c119_87 = arith.constant 119 : index
    %102 = vector.load %arg11[%c0_86, %c119_87] : memref<8x512xbf16, #tpu.memory_space<vmem>>, vector<8x256xbf16>
    %c2_88 = arith.constant 2 : index
    %c0_89 = arith.constant 0 : index
    %c0_90 = arith.constant 0 : index
    %103 = vector.load %arg4[%c2_88, %c0_89, %c0_90] : memref<9x8x8xbf16, #tpu.memory_space<vmem>>, vector<1x8x8xbf16>
    %104 = vector.shape_cast %103 : vector<1x8x8xbf16> to vector<8x8xbf16>
    %cst_91 = arith.constant dense<0.000000e+00> : vector<8x256xf32>
    %105 = tpu.matmul %104, %102, %cst_91 {dimension_numbers = #tpu.dot_dimension_numbers<[1], [0], [0], [1], [0, 0, 1, 1], [], []>} : vector<8x8xbf16>, vector<8x256xbf16>, vector<8x256xf32> -> vector<8x256xf32>
    %106 = arith.addf %101, %105 : vector<8x256xf32>
    %c0_92 = arith.constant 0 : index
    %c127_93 = arith.constant 127 : index
    %107 = vector.load %arg11[%c0_92, %c127_93] : memref<8x512xbf16, #tpu.memory_space<vmem>>, vector<8x256xbf16>
    %c3_94 = arith.constant 3 : index
    %c0_95 = arith.constant 0 : index
    %c0_96 = arith.constant 0 : index
    %108 = vector.load %arg4[%c3_94, %c0_95, %c0_96] : memref<9x8x8xbf16, #tpu.memory_space<vmem>>, vector<1x8x8xbf16>
    %109 = vector.shape_cast %108 : vector<1x8x8xbf16> to vector<8x8xbf16>
    %cst_97 = arith.constant dense<0.000000e+00> : vector<8x256xf32>
    %110 = tpu.matmul %109, %107, %cst_97 {dimension_numbers = #tpu.dot_dimension_numbers<[1], [0], [0], [1], [0, 0, 1, 1], [], []>} : vector<8x8xbf16>, vector<8x256xbf16>, vector<8x256xf32> -> vector<8x256xf32>
    %111 = arith.addf %106, %110 : vector<8x256xf32>
    %c0_98 = arith.constant 0 : index
    %c128_99 = arith.constant 128 : index
    %112 = vector.load %arg11[%c0_98, %c128_99] : memref<8x512xbf16, #tpu.memory_space<vmem>>, vector<8x256xbf16>
    %c4_100 = arith.constant 4 : index
    %c0_101 = arith.constant 0 : index
    %c0_102 = arith.constant 0 : index
    %113 = vector.load %arg4[%c4_100, %c0_101, %c0_102] : memref<9x8x8xbf16, #tpu.memory_space<vmem>>, vector<1x8x8xbf16>
    %114 = vector.shape_cast %113 : vector<1x8x8xbf16> to vector<8x8xbf16>
    %cst_103 = arith.constant dense<0.000000e+00> : vector<8x256xf32>
    %115 = tpu.matmul %114, %112, %cst_103 {dimension_numbers = #tpu.dot_dimension_numbers<[1], [0], [0], [1], [0, 0, 1, 1], [], []>} : vector<8x8xbf16>, vector<8x256xbf16>, vector<8x256xf32> -> vector<8x256xf32>
    %116 = arith.addf %111, %115 : vector<8x256xf32>
    %c0_104 = arith.constant 0 : index
    %c129_105 = arith.constant 129 : index
    %117 = vector.load %arg11[%c0_104, %c129_105] : memref<8x512xbf16, #tpu.memory_space<vmem>>, vector<8x256xbf16>
    %c5_106 = arith.constant 5 : index
    %c0_107 = arith.constant 0 : index
    %c0_108 = arith.constant 0 : index
    %118 = vector.load %arg4[%c5_106, %c0_107, %c0_108] : memref<9x8x8xbf16, #tpu.memory_space<vmem>>, vector<1x8x8xbf16>
    %119 = vector.shape_cast %118 : vector<1x8x8xbf16> to vector<8x8xbf16>
    %cst_109 = arith.constant dense<0.000000e+00> : vector<8x256xf32>
    %120 = tpu.matmul %119, %117, %cst_109 {dimension_numbers = #tpu.dot_dimension_numbers<[1], [0], [0], [1], [0, 0, 1, 1], [], []>} : vector<8x8xbf16>, vector<8x256xbf16>, vector<8x256xf32> -> vector<8x256xf32>
    %121 = arith.addf %116, %120 : vector<8x256xf32>
    %c0_110 = arith.constant 0 : index
    %c137_111 = arith.constant 137 : index
    %122 = vector.load %arg11[%c0_110, %c137_111] : memref<8x512xbf16, #tpu.memory_space<vmem>>, vector<8x256xbf16>
    %c6_112 = arith.constant 6 : index
    %c0_113 = arith.constant 0 : index
    %c0_114 = arith.constant 0 : index
    %123 = vector.load %arg4[%c6_112, %c0_113, %c0_114] : memref<9x8x8xbf16, #tpu.memory_space<vmem>>, vector<1x8x8xbf16>
    %124 = vector.shape_cast %123 : vector<1x8x8xbf16> to vector<8x8xbf16>
    %cst_115 = arith.constant dense<0.000000e+00> : vector<8x256xf32>
    %125 = tpu.matmul %124, %122, %cst_115 {dimension_numbers = #tpu.dot_dimension_numbers<[1], [0], [0], [1], [0, 0, 1, 1], [], []>} : vector<8x8xbf16>, vector<8x256xbf16>, vector<8x256xf32> -> vector<8x256xf32>
    %126 = arith.addf %121, %125 : vector<8x256xf32>
    %c0_116 = arith.constant 0 : index
    %c138_117 = arith.constant 138 : index
    %127 = vector.load %arg11[%c0_116, %c138_117] : memref<8x512xbf16, #tpu.memory_space<vmem>>, vector<8x256xbf16>
    %c7_118 = arith.constant 7 : index
    %c0_119 = arith.constant 0 : index
    %c0_120 = arith.constant 0 : index
    %128 = vector.load %arg4[%c7_118, %c0_119, %c0_120] : memref<9x8x8xbf16, #tpu.memory_space<vmem>>, vector<1x8x8xbf16>
    %129 = vector.shape_cast %128 : vector<1x8x8xbf16> to vector<8x8xbf16>
    %cst_121 = arith.constant dense<0.000000e+00> : vector<8x256xf32>
    %130 = tpu.matmul %129, %127, %cst_121 {dimension_numbers = #tpu.dot_dimension_numbers<[1], [0], [0], [1], [0, 0, 1, 1], [], []>} : vector<8x8xbf16>, vector<8x256xbf16>, vector<8x256xf32> -> vector<8x256xf32>
    %131 = arith.addf %126, %130 : vector<8x256xf32>
    %c0_122 = arith.constant 0 : index
    %c139_123 = arith.constant 139 : index
    %132 = vector.load %arg11[%c0_122, %c139_123] : memref<8x512xbf16, #tpu.memory_space<vmem>>, vector<8x256xbf16>
    %c8_124 = arith.constant 8 : index
    %c0_125 = arith.constant 0 : index
    %c0_126 = arith.constant 0 : index
    %133 = vector.load %arg4[%c8_124, %c0_125, %c0_126] : memref<9x8x8xbf16, #tpu.memory_space<vmem>>, vector<1x8x8xbf16>
    %134 = vector.shape_cast %133 : vector<1x8x8xbf16> to vector<8x8xbf16>
    %cst_127 = arith.constant dense<0.000000e+00> : vector<8x256xf32>
    %135 = tpu.matmul %134, %132, %cst_127 {dimension_numbers = #tpu.dot_dimension_numbers<[1], [0], [0], [1], [0, 0, 1, 1], [], []>} : vector<8x8xbf16>, vector<8x256xbf16>, vector<8x256xf32> -> vector<8x256xf32>
    %136 = arith.addf %131, %135 : vector<8x256xf32>
    %c0_128 = arith.constant 0 : index
    %c0_129 = arith.constant 0 : index
    %137 = vector.load %arg5[%c0_128, %c0_129] : memref<8x1xf32, #tpu.memory_space<vmem>>, vector<8x1xf32>
    %138 = vector.broadcast %137 : vector<8x1xf32> to vector<8x256xf32>
    %139 = arith.addf %136, %138 : vector<8x256xf32>
    %140 = arith.addf %139, %36 : vector<8x256xf32>
    %cst_130 = arith.constant 0.000000e+00 : f32
    %141 = vector.broadcast %cst_130 : f32 to vector<8x256xf32>
    %142 = arith.maximumf %140, %141 : vector<8x256xf32>
    %143 = vector.broadcast %37 : vector<1x256xf32> to vector<8x256xf32>
    %144 = arith.mulf %142, %143 : vector<8x256xf32>
    %145 = arith.truncf %144 : vector<8x256xf32> to vector<8x256xbf16>
    %c0_131 = arith.constant 0 : index
    %c128_132 = arith.constant 128 : index
    %146 = vector.load %arg11[%c0_131, %c128_132] : memref<8x512xbf16, #tpu.memory_space<vmem>>, vector<8x256xbf16>
    tpu.vector_store %arg11[%c0_131, %c128_132], %145 {strides = array<i32>} : memref<8x512xbf16, #tpu.memory_space<vmem>>, vector<8x256xbf16>,
    %c0_133 = arith.constant 0 : index
    %c117_134 = arith.constant 117 : index
    %147 = vector.load %arg11[%c0_133, %c117_134] : memref<8x512xbf16, #tpu.memory_space<vmem>>, vector<8x256xbf16>
    %c0_135 = arith.constant 0 : index
    %c0_136 = arith.constant 0 : index
    %c0_137 = arith.constant 0 : index
    %148 = vector.load %arg6[%c0_135, %c0_136, %c0_137] : memref<9x8x8xbf16, #tpu.memory_space<vmem>>, vector<1x8x8xbf16>
    %149 = vector.shape_cast %148 : vector<1x8x8xbf16> to vector<8x8xbf16>
    %cst_138 = arith.constant dense<0.000000e+00> : vector<8x256xf32>
    %150 = tpu.matmul %149, %147, %cst_138 {dimension_numbers = #tpu.dot_dimension_numbers<[1], [0], [0], [1], [0, 0, 1, 1], [], []>} : vector<8x8xbf16>, vector<8x256xbf16>, vector<8x256xf32> -> vector<8x256xf32>
    %c0_139 = arith.constant 0 : index
    %c118_140 = arith.constant 118 : index
    %151 = vector.load %arg11[%c0_139, %c118_140] : memref<8x512xbf16, #tpu.memory_space<vmem>>, vector<8x256xbf16>
    %c1_141 = arith.constant 1 : index
    %c0_142 = arith.constant 0 : index
    %c0_143 = arith.constant 0 : index
    %152 = vector.load %arg6[%c1_141, %c0_142, %c0_143] : memref<9x8x8xbf16, #tpu.memory_space<vmem>>, vector<1x8x8xbf16>
    %153 = vector.shape_cast %152 : vector<1x8x8xbf16> to vector<8x8xbf16>
    %cst_144 = arith.constant dense<0.000000e+00> : vector<8x256xf32>
    %154 = tpu.matmul %153, %151, %cst_144 {dimension_numbers = #tpu.dot_dimension_numbers<[1], [0], [0], [1], [0, 0, 1, 1], [], []>} : vector<8x8xbf16>, vector<8x256xbf16>, vector<8x256xf32> -> vector<8x256xf32>
    %155 = arith.addf %150, %154 : vector<8x256xf32>
    %c0_145 = arith.constant 0 : index
    %c119_146 = arith.constant 119 : index
    %156 = vector.load %arg11[%c0_145, %c119_146] : memref<8x512xbf16, #tpu.memory_space<vmem>>, vector<8x256xbf16>
    %c2_147 = arith.constant 2 : index
    %c0_148 = arith.constant 0 : index
    %c0_149 = arith.constant 0 : index
    %157 = vector.load %arg6[%c2_147, %c0_148, %c0_149] : memref<9x8x8xbf16, #tpu.memory_space<vmem>>, vector<1x8x8xbf16>
    %158 = vector.shape_cast %157 : vector<1x8x8xbf16> to vector<8x8xbf16>
    %cst_150 = arith.constant dense<0.000000e+00> : vector<8x256xf32>
    %159 = tpu.matmul %158, %156, %cst_150 {dimension_numbers = #tpu.dot_dimension_numbers<[1], [0], [0], [1], [0, 0, 1, 1], [], []>} : vector<8x8xbf16>, vector<8x256xbf16>, vector<8x256xf32> -> vector<8x256xf32>
    %160 = arith.addf %155, %159 : vector<8x256xf32>
    %c0_151 = arith.constant 0 : index
    %c127_152 = arith.constant 127 : index
    %161 = vector.load %arg11[%c0_151, %c127_152] : memref<8x512xbf16, #tpu.memory_space<vmem>>, vector<8x256xbf16>
    %c3_153 = arith.constant 3 : index
    %c0_154 = arith.constant 0 : index
    %c0_155 = arith.constant 0 : index
    %162 = vector.load %arg6[%c3_153, %c0_154, %c0_155] : memref<9x8x8xbf16, #tpu.memory_space<vmem>>, vector<1x8x8xbf16>
    %163 = vector.shape_cast %162 : vector<1x8x8xbf16> to vector<8x8xbf16>
    %cst_156 = arith.constant dense<0.000000e+00> : vector<8x256xf32>
    %164 = tpu.matmul %163, %161, %cst_156 {dimension_numbers = #tpu.dot_dimension_numbers<[1], [0], [0], [1], [0, 0, 1, 1], [], []>} : vector<8x8xbf16>, vector<8x256xbf16>, vector<8x256xf32> -> vector<8x256xf32>
    %165 = arith.addf %160, %164 : vector<8x256xf32>
    %c0_157 = arith.constant 0 : index
    %c128_158 = arith.constant 128 : index
    %166 = vector.load %arg11[%c0_157, %c128_158] : memref<8x512xbf16, #tpu.memory_space<vmem>>, vector<8x256xbf16>
    %c4_159 = arith.constant 4 : index
    %c0_160 = arith.constant 0 : index
    %c0_161 = arith.constant 0 : index
    %167 = vector.load %arg6[%c4_159, %c0_160, %c0_161] : memref<9x8x8xbf16, #tpu.memory_space<vmem>>, vector<1x8x8xbf16>
    %168 = vector.shape_cast %167 : vector<1x8x8xbf16> to vector<8x8xbf16>
    %cst_162 = arith.constant dense<0.000000e+00> : vector<8x256xf32>
    %169 = tpu.matmul %168, %166, %cst_162 {dimension_numbers = #tpu.dot_dimension_numbers<[1], [0], [0], [1], [0, 0, 1, 1], [], []>} : vector<8x8xbf16>, vector<8x256xbf16>, vector<8x256xf32> -> vector<8x256xf32>
    %170 = arith.addf %165, %169 : vector<8x256xf32>
    %c0_163 = arith.constant 0 : index
    %c129_164 = arith.constant 129 : index
    %171 = vector.load %arg11[%c0_163, %c129_164] : memref<8x512xbf16, #tpu.memory_space<vmem>>, vector<8x256xbf16>
    %c5_165 = arith.constant 5 : index
    %c0_166 = arith.constant 0 : index
    %c0_167 = arith.constant 0 : index
    %172 = vector.load %arg6[%c5_165, %c0_166, %c0_167] : memref<9x8x8xbf16, #tpu.memory_space<vmem>>, vector<1x8x8xbf16>
    %173 = vector.shape_cast %172 : vector<1x8x8xbf16> to vector<8x8xbf16>
    %cst_168 = arith.constant dense<0.000000e+00> : vector<8x256xf32>
    %174 = tpu.matmul %173, %171, %cst_168 {dimension_numbers = #tpu.dot_dimension_numbers<[1], [0], [0], [1], [0, 0, 1, 1], [], []>} : vector<8x8xbf16>, vector<8x256xbf16>, vector<8x256xf32> -> vector<8x256xf32>
    %175 = arith.addf %170, %174 : vector<8x256xf32>
    %c0_169 = arith.constant 0 : index
    %c137_170 = arith.constant 137 : index
    %176 = vector.load %arg11[%c0_169, %c137_170] : memref<8x512xbf16, #tpu.memory_space<vmem>>, vector<8x256xbf16>
    %c6_171 = arith.constant 6 : index
    %c0_172 = arith.constant 0 : index
    %c0_173 = arith.constant 0 : index
    %177 = vector.load %arg6[%c6_171, %c0_172, %c0_173] : memref<9x8x8xbf16, #tpu.memory_space<vmem>>, vector<1x8x8xbf16>
    %178 = vector.shape_cast %177 : vector<1x8x8xbf16> to vector<8x8xbf16>
    %cst_174 = arith.constant dense<0.000000e+00> : vector<8x256xf32>
    %179 = tpu.matmul %178, %176, %cst_174 {dimension_numbers = #tpu.dot_dimension_numbers<[1], [0], [0], [1], [0, 0, 1, 1], [], []>} : vector<8x8xbf16>, vector<8x256xbf16>, vector<8x256xf32> -> vector<8x256xf32>
    %180 = arith.addf %175, %179 : vector<8x256xf32>
    %c0_175 = arith.constant 0 : index
    %c138_176 = arith.constant 138 : index
    %181 = vector.load %arg11[%c0_175, %c138_176] : memref<8x512xbf16, #tpu.memory_space<vmem>>, vector<8x256xbf16>
    %c7_177 = arith.constant 7 : index
    %c0_178 = arith.constant 0 : index
    %c0_179 = arith.constant 0 : index
    %182 = vector.load %arg6[%c7_177, %c0_178, %c0_179] : memref<9x8x8xbf16, #tpu.memory_space<vmem>>, vector<1x8x8xbf16>
    %183 = vector.shape_cast %182 : vector<1x8x8xbf16> to vector<8x8xbf16>
    %cst_180 = arith.constant dense<0.000000e+00> : vector<8x256xf32>
    %184 = tpu.matmul %183, %181, %cst_180 {dimension_numbers = #tpu.dot_dimension_numbers<[1], [0], [0], [1], [0, 0, 1, 1], [], []>} : vector<8x8xbf16>, vector<8x256xbf16>, vector<8x256xf32> -> vector<8x256xf32>
    %185 = arith.addf %180, %184 : vector<8x256xf32>
    %c0_181 = arith.constant 0 : index
    %c139_182 = arith.constant 139 : index
    %186 = vector.load %arg11[%c0_181, %c139_182] : memref<8x512xbf16, #tpu.memory_space<vmem>>, vector<8x256xbf16>
    %c8_183 = arith.constant 8 : index
    %c0_184 = arith.constant 0 : index
    %c0_185 = arith.constant 0 : index
    %187 = vector.load %arg6[%c8_183, %c0_184, %c0_185] : memref<9x8x8xbf16, #tpu.memory_space<vmem>>, vector<1x8x8xbf16>
    %188 = vector.shape_cast %187 : vector<1x8x8xbf16> to vector<8x8xbf16>
    %cst_186 = arith.constant dense<0.000000e+00> : vector<8x256xf32>
    %189 = tpu.matmul %188, %186, %cst_186 {dimension_numbers = #tpu.dot_dimension_numbers<[1], [0], [0], [1], [0, 0, 1, 1], [], []>} : vector<8x8xbf16>, vector<8x256xbf16>, vector<8x256xf32> -> vector<8x256xf32>
    %190 = arith.addf %185, %189 : vector<8x256xf32>
    %c0_187 = arith.constant 0 : index
    %c0_188 = arith.constant 0 : index
    %191 = vector.load %arg7[%c0_187, %c0_188] : memref<8x1xf32, #tpu.memory_space<vmem>>, vector<8x1xf32>
    %192 = vector.broadcast %191 : vector<8x1xf32> to vector<8x256xf32>
    %193 = arith.addf %190, %192 : vector<8x256xf32>
    %cst_189 = arith.constant 0.000000e+00 : f32
    %194 = vector.broadcast %cst_189 : f32 to vector<8x256xf32>
    %195 = arith.maximumf %193, %194 : vector<8x256xf32>
    %196 = vector.broadcast %37 : vector<1x256xf32> to vector<8x256xf32>
    %197 = arith.mulf %195, %196 : vector<8x256xf32>
    %198 = arith.truncf %197 : vector<8x256xf32> to vector<8x256xbf16>
    %c0_190 = arith.constant 0 : index
    %c128_191 = arith.constant 128 : index
    %199 = vector.load %arg11[%c0_190, %c128_191] : memref<8x512xbf16, #tpu.memory_space<vmem>>, vector<8x256xbf16>
    tpu.vector_store %arg11[%c0_190, %c128_191], %198 {strides = array<i32>} : memref<8x512xbf16, #tpu.memory_space<vmem>>, vector<8x256xbf16>,
    %c0_192 = arith.constant 0 : index
    %c117_193 = arith.constant 117 : index
    %200 = vector.load %arg11[%c0_192, %c117_193] : memref<8x512xbf16, #tpu.memory_space<vmem>>, vector<8x256xbf16>
    %c0_194 = arith.constant 0 : index
    %c0_195 = arith.constant 0 : index
    %c0_196 = arith.constant 0 : index
    %201 = vector.load %arg8[%c0_194, %c0_195, %c0_196] : memref<9x8x8xbf16, #tpu.memory_space<vmem>>, vector<1x8x8xbf16>
    %202 = vector.shape_cast %201 : vector<1x8x8xbf16> to vector<8x8xbf16>
    %cst_197 = arith.constant dense<0.000000e+00> : vector<8x256xf32>
    %203 = tpu.matmul %202, %200, %cst_197 {dimension_numbers = #tpu.dot_dimension_numbers<[1], [0], [0], [1], [0, 0, 1, 1], [], []>} : vector<8x8xbf16>, vector<8x256xbf16>, vector<8x256xf32> -> vector<8x256xf32>
    %c0_198 = arith.constant 0 : index
    %c118_199 = arith.constant 118 : index
    %204 = vector.load %arg11[%c0_198, %c118_199] : memref<8x512xbf16, #tpu.memory_space<vmem>>, vector<8x256xbf16>
    %c1_200 = arith.constant 1 : index
    %c0_201 = arith.constant 0 : index
    %c0_202 = arith.constant 0 : index
    %205 = vector.load %arg8[%c1_200, %c0_201, %c0_202] : memref<9x8x8xbf16, #tpu.memory_space<vmem>>, vector<1x8x8xbf16>
    %206 = vector.shape_cast %205 : vector<1x8x8xbf16> to vector<8x8xbf16>
    %cst_203 = arith.constant dense<0.000000e+00> : vector<8x256xf32>
    %207 = tpu.matmul %206, %204, %cst_203 {dimension_numbers = #tpu.dot_dimension_numbers<[1], [0], [0], [1], [0, 0, 1, 1], [], []>} : vector<8x8xbf16>, vector<8x256xbf16>, vector<8x256xf32> -> vector<8x256xf32>
    %208 = arith.addf %203, %207 : vector<8x256xf32>
    %c0_204 = arith.constant 0 : index
    %c119_205 = arith.constant 119 : index
    %209 = vector.load %arg11[%c0_204, %c119_205] : memref<8x512xbf16, #tpu.memory_space<vmem>>, vector<8x256xbf16>
    %c2_206 = arith.constant 2 : index
    %c0_207 = arith.constant 0 : index
    %c0_208 = arith.constant 0 : index
    %210 = vector.load %arg8[%c2_206, %c0_207, %c0_208] : memref<9x8x8xbf16, #tpu.memory_space<vmem>>, vector<1x8x8xbf16>
    %211 = vector.shape_cast %210 : vector<1x8x8xbf16> to vector<8x8xbf16>
    %cst_209 = arith.constant dense<0.000000e+00> : vector<8x256xf32>
    %212 = tpu.matmul %211, %209, %cst_209 {dimension_numbers = #tpu.dot_dimension_numbers<[1], [0], [0], [1], [0, 0, 1, 1], [], []>} : vector<8x8xbf16>, vector<8x256xbf16>, vector<8x256xf32> -> vector<8x256xf32>
    %213 = arith.addf %208, %212 : vector<8x256xf32>
    %c0_210 = arith.constant 0 : index
    %c127_211 = arith.constant 127 : index
    %214 = vector.load %arg11[%c0_210, %c127_211] : memref<8x512xbf16, #tpu.memory_space<vmem>>, vector<8x256xbf16>
    %c3_212 = arith.constant 3 : index
    %c0_213 = arith.constant 0 : index
    %c0_214 = arith.constant 0 : index
    %215 = vector.load %arg8[%c3_212, %c0_213, %c0_214] : memref<9x8x8xbf16, #tpu.memory_space<vmem>>, vector<1x8x8xbf16>
    %216 = vector.shape_cast %215 : vector<1x8x8xbf16> to vector<8x8xbf16>
    %cst_215 = arith.constant dense<0.000000e+00> : vector<8x256xf32>
    %217 = tpu.matmul %216, %214, %cst_215 {dimension_numbers = #tpu.dot_dimension_numbers<[1], [0], [0], [1], [0, 0, 1, 1], [], []>} : vector<8x8xbf16>, vector<8x256xbf16>, vector<8x256xf32> -> vector<8x256xf32>
    %218 = arith.addf %213, %217 : vector<8x256xf32>
    %c0_216 = arith.constant 0 : index
    %c128_217 = arith.constant 128 : index
    %219 = vector.load %arg11[%c0_216, %c128_217] : memref<8x512xbf16, #tpu.memory_space<vmem>>, vector<8x256xbf16>
    %c4_218 = arith.constant 4 : index
    %c0_219 = arith.constant 0 : index
    %c0_220 = arith.constant 0 : index
    %220 = vector.load %arg8[%c4_218, %c0_219, %c0_220] : memref<9x8x8xbf16, #tpu.memory_space<vmem>>, vector<1x8x8xbf16>
    %221 = vector.shape_cast %220 : vector<1x8x8xbf16> to vector<8x8xbf16>
    %cst_221 = arith.constant dense<0.000000e+00> : vector<8x256xf32>
    %222 = tpu.matmul %221, %219, %cst_221 {dimension_numbers = #tpu.dot_dimension_numbers<[1], [0], [0], [1], [0, 0, 1, 1], [], []>} : vector<8x8xbf16>, vector<8x256xbf16>, vector<8x256xf32> -> vector<8x256xf32>
    %223 = arith.addf %218, %222 : vector<8x256xf32>
    %c0_222 = arith.constant 0 : index
    %c129_223 = arith.constant 129 : index
    %224 = vector.load %arg11[%c0_222, %c129_223] : memref<8x512xbf16, #tpu.memory_space<vmem>>, vector<8x256xbf16>
    %c5_224 = arith.constant 5 : index
    %c0_225 = arith.constant 0 : index
    %c0_226 = arith.constant 0 : index
    %225 = vector.load %arg8[%c5_224, %c0_225, %c0_226] : memref<9x8x8xbf16, #tpu.memory_space<vmem>>, vector<1x8x8xbf16>
    %226 = vector.shape_cast %225 : vector<1x8x8xbf16> to vector<8x8xbf16>
    %cst_227 = arith.constant dense<0.000000e+00> : vector<8x256xf32>
    %227 = tpu.matmul %226, %224, %cst_227 {dimension_numbers = #tpu.dot_dimension_numbers<[1], [0], [0], [1], [0, 0, 1, 1], [], []>} : vector<8x8xbf16>, vector<8x256xbf16>, vector<8x256xf32> -> vector<8x256xf32>
    %228 = arith.addf %223, %227 : vector<8x256xf32>
    %c0_228 = arith.constant 0 : index
    %c137_229 = arith.constant 137 : index
    %229 = vector.load %arg11[%c0_228, %c137_229] : memref<8x512xbf16, #tpu.memory_space<vmem>>, vector<8x256xbf16>
    %c6_230 = arith.constant 6 : index
    %c0_231 = arith.constant 0 : index
    %c0_232 = arith.constant 0 : index
    %230 = vector.load %arg8[%c6_230, %c0_231, %c0_232] : memref<9x8x8xbf16, #tpu.memory_space<vmem>>, vector<1x8x8xbf16>
    %231 = vector.shape_cast %230 : vector<1x8x8xbf16> to vector<8x8xbf16>
    %cst_233 = arith.constant dense<0.000000e+00> : vector<8x256xf32>
    %232 = tpu.matmul %231, %229, %cst_233 {dimension_numbers = #tpu.dot_dimension_numbers<[1], [0], [0], [1], [0, 0, 1, 1], [], []>} : vector<8x8xbf16>, vector<8x256xbf16>, vector<8x256xf32> -> vector<8x256xf32>
    %233 = arith.addf %228, %232 : vector<8x256xf32>
    %c0_234 = arith.constant 0 : index
    %c138_235 = arith.constant 138 : index
    %234 = vector.load %arg11[%c0_234, %c138_235] : memref<8x512xbf16, #tpu.memory_space<vmem>>, vector<8x256xbf16>
    %c7_236 = arith.constant 7 : index
    %c0_237 = arith.constant 0 : index
    %c0_238 = arith.constant 0 : index
    %235 = vector.load %arg8[%c7_236, %c0_237, %c0_238] : memref<9x8x8xbf16, #tpu.memory_space<vmem>>, vector<1x8x8xbf16>
    %236 = vector.shape_cast %235 : vector<1x8x8xbf16> to vector<8x8xbf16>
    %cst_239 = arith.constant dense<0.000000e+00> : vector<8x256xf32>
    %237 = tpu.matmul %236, %234, %cst_239 {dimension_numbers = #tpu.dot_dimension_numbers<[1], [0], [0], [1], [0, 0, 1, 1], [], []>} : vector<8x8xbf16>, vector<8x256xbf16>, vector<8x256xf32> -> vector<8x256xf32>
    %238 = arith.addf %233, %237 : vector<8x256xf32>
    %c0_240 = arith.constant 0 : index
    %c139_241 = arith.constant 139 : index
    %239 = vector.load %arg11[%c0_240, %c139_241] : memref<8x512xbf16, #tpu.memory_space<vmem>>, vector<8x256xbf16>
    %c8_242 = arith.constant 8 : index
    %c0_243 = arith.constant 0 : index
    %c0_244 = arith.constant 0 : index
    %240 = vector.load %arg8[%c8_242, %c0_243, %c0_244] : memref<9x8x8xbf16, #tpu.memory_space<vmem>>, vector<1x8x8xbf16>
    %241 = vector.shape_cast %240 : vector<1x8x8xbf16> to vector<8x8xbf16>
    %cst_245 = arith.constant dense<0.000000e+00> : vector<8x256xf32>
    %242 = tpu.matmul %241, %239, %cst_245 {dimension_numbers = #tpu.dot_dimension_numbers<[1], [0], [0], [1], [0, 0, 1, 1], [], []>} : vector<8x8xbf16>, vector<8x256xbf16>, vector<8x256xf32> -> vector<8x256xf32>
    %243 = arith.addf %238, %242 : vector<8x256xf32>
    %c0_246 = arith.constant 0 : index
    %c0_247 = arith.constant 0 : index
    %244 = vector.load %arg9[%c0_246, %c0_247] : memref<8x1xf32, #tpu.memory_space<vmem>>, vector<8x1xf32>
    %245 = vector.broadcast %244 : vector<8x1xf32> to vector<8x256xf32>
    %246 = arith.addf %243, %245 : vector<8x256xf32>
    %247 = arith.addf %246, %144 : vector<8x256xf32>
    %cst_248 = arith.constant 0.000000e+00 : f32
    %248 = vector.broadcast %cst_248 : f32 to vector<8x256xf32>
    %249 = arith.maximumf %247, %248 : vector<8x256xf32>
    %250 = vector.broadcast %37 : vector<1x256xf32> to vector<8x256xf32>
    %251 = arith.mulf %249, %250 : vector<8x256xf32>
    %252 = arith.truncf %251 : vector<8x256xf32> to vector<8x256xbf16>
    %c0_249 = arith.constant 0 : index
    %c0_250 = arith.constant 0 : index
    %253 = vector.load %arg10[%c0_249, %c0_250] : memref<8x256xbf16, #tpu.memory_space<vmem>>, vector<8x256xbf16>
    tpu.vector_store %arg10[%c0_249, %c0_250], %252 {strides = array<i32>} : memref<8x256xbf16, #tpu.memory_space<vmem>>, vector<8x256xbf16>,
    return
  }
}

module attributes {stable_mosaic.version = 11 : i64} {
  func.func @_stage_kernel(%arg0: memref<72x128xbf16, #tpu.memory_space<vmem>>, %arg1: memref<1x128xf32, #tpu.memory_space<vmem>>, %arg2: memref<32x72xbf16, #tpu.memory_space<vmem>>, %arg3: memref<32x1xf32, #tpu.memory_space<vmem>>, %arg4: memref<32x1xf32, #tpu.memory_space<vmem>>, %arg5: memref<9x16x16xbf16, #tpu.memory_space<vmem>>, %arg6: memref<16x1xf32, #tpu.memory_space<vmem>>, %arg7: memref<9x16x16xbf16, #tpu.memory_space<vmem>>, %arg8: memref<16x1xf32, #tpu.memory_space<vmem>>, %arg9: memref<9x16x16xbf16, #tpu.memory_space<vmem>>, %arg10: memref<16x1xf32, #tpu.memory_space<vmem>>, %arg11: memref<16x128xbf16, #tpu.memory_space<vmem>>, %arg12: memref<16x384xbf16, #tpu.memory_space<vmem>>) attributes {dimension_semantics = [], scalar_prefetch = 0 : i64, scratch_operands = 1 : i64, tpu.core_type = #tpu.core_type<tc>} {
    %cst = arith.constant 0.000000e+00 : bf16
    %0 = vector.broadcast %cst : bf16 to vector<16x384xbf16>
    %c0 = arith.constant 0 : index
    %c0_0 = arith.constant 0 : index
    %1 = vector.load %arg12[%c0, %c0_0] : memref<16x384xbf16, #tpu.memory_space<vmem>>, vector<16x384xbf16>
    tpu.vector_store %arg12[%c0, %c0_0], %0 {strides = array<i32>} : memref<16x384xbf16, #tpu.memory_space<vmem>>, vector<16x384xbf16>,
    %c0_1 = arith.constant 0 : index
    %c0_2 = arith.constant 0 : index
    %2 = vector.load %arg1[%c0_1, %c0_2] : memref<1x128xf32, #tpu.memory_space<vmem>>, vector<1x128xf32>
    %c0_3 = arith.constant 0 : index
    %c0_4 = arith.constant 0 : index
    %3 = vector.load %arg2[%c0_3, %c0_4] : memref<32x72xbf16, #tpu.memory_space<vmem>>, vector<32x72xbf16>
    %c0_5 = arith.constant 0 : index
    %c0_6 = arith.constant 0 : index
    %4 = vector.load %arg0[%c0_5, %c0_6] : memref<72x128xbf16, #tpu.memory_space<vmem>>, vector<72x128xbf16>
    %cst_7 = arith.constant dense<0.000000e+00> : vector<32x128xf32>
    %5 = tpu.matmul %3, %4, %cst_7 {dimension_numbers = #tpu.dot_dimension_numbers<[1], [0], [0], [1], [0, 0, 1, 1], [], []>} : vector<32x72xbf16>, vector<72x128xbf16>, vector<32x128xf32> -> vector<32x128xf32>
    %c0_8 = arith.constant 0 : index
    %c0_9 = arith.constant 0 : index
    %6 = vector.load %arg3[%c0_8, %c0_9] : memref<32x1xf32, #tpu.memory_space<vmem>>, vector<32x1xf32>
    %7 = vector.broadcast %6 : vector<32x1xf32> to vector<32x128xf32>
    %8 = arith.addf %5, %7 : vector<32x128xf32>
    %c0_10 = arith.constant 0 : index
    %c0_11 = arith.constant 0 : index
    %9 = vector.load %arg4[%c0_10, %c0_11] : memref<32x1xf32, #tpu.memory_space<vmem>>, vector<32x1xf32>
    %10 = vector.broadcast %9 : vector<32x1xf32> to vector<32x128xf32>
    %11 = arith.maximumf %8, %10 : vector<32x128xf32>
    %12 = vector.broadcast %2 : vector<1x128xf32> to vector<32x128xf32>
    %13 = arith.mulf %11, %12 : vector<32x128xf32>
    %14 = vector.extract_strided_slice %13 {offsets = [0, 0], sizes = [16, 128], strides = [1, 1]} : vector<32x128xf32> to vector<16x128xf32>
    %15 = vector.extract_strided_slice %13 {offsets = [16, 0], sizes = [16, 128], strides = [1, 1]} : vector<32x128xf32> to vector<16x128xf32>
    %16 = arith.truncf %14 : vector<16x128xf32> to vector<16x128xbf16>
    %c0_12 = arith.constant 0 : index
    %c128 = arith.constant 128 : index
    %17 = vector.load %arg12[%c0_12, %c128] : memref<16x384xbf16, #tpu.memory_space<vmem>>, vector<16x128xbf16>
    tpu.vector_store %arg12[%c0_12, %c128], %16 {strides = array<i32>} : memref<16x384xbf16, #tpu.memory_space<vmem>>, vector<16x128xbf16>,
    %c0_13 = arith.constant 0 : index
    %c121 = arith.constant 121 : index
    %18 = vector.load %arg12[%c0_13, %c121] : memref<16x384xbf16, #tpu.memory_space<vmem>>, vector<16x128xbf16>
    %c0_14 = arith.constant 0 : index
    %c0_15 = arith.constant 0 : index
    %c0_16 = arith.constant 0 : index
    %19 = vector.load %arg5[%c0_14, %c0_15, %c0_16] : memref<9x16x16xbf16, #tpu.memory_space<vmem>>, vector<1x16x16xbf16>
    %20 = vector.shape_cast %19 : vector<1x16x16xbf16> to vector<16x16xbf16>
    %cst_17 = arith.constant dense<0.000000e+00> : vector<16x128xf32>
    %21 = tpu.matmul %20, %18, %cst_17 {dimension_numbers = #tpu.dot_dimension_numbers<[1], [0], [0], [1], [0, 0, 1, 1], [], []>} : vector<16x16xbf16>, vector<16x128xbf16>, vector<16x128xf32> -> vector<16x128xf32>
    %c0_18 = arith.constant 0 : index
    %c122 = arith.constant 122 : index
    %22 = vector.load %arg12[%c0_18, %c122] : memref<16x384xbf16, #tpu.memory_space<vmem>>, vector<16x128xbf16>
    %c1 = arith.constant 1 : index
    %c0_19 = arith.constant 0 : index
    %c0_20 = arith.constant 0 : index
    %23 = vector.load %arg5[%c1, %c0_19, %c0_20] : memref<9x16x16xbf16, #tpu.memory_space<vmem>>, vector<1x16x16xbf16>
    %24 = vector.shape_cast %23 : vector<1x16x16xbf16> to vector<16x16xbf16>
    %cst_21 = arith.constant dense<0.000000e+00> : vector<16x128xf32>
    %25 = tpu.matmul %24, %22, %cst_21 {dimension_numbers = #tpu.dot_dimension_numbers<[1], [0], [0], [1], [0, 0, 1, 1], [], []>} : vector<16x16xbf16>, vector<16x128xbf16>, vector<16x128xf32> -> vector<16x128xf32>
    %26 = arith.addf %21, %25 : vector<16x128xf32>
    %c0_22 = arith.constant 0 : index
    %c123 = arith.constant 123 : index
    %27 = vector.load %arg12[%c0_22, %c123] : memref<16x384xbf16, #tpu.memory_space<vmem>>, vector<16x128xbf16>
    %c2 = arith.constant 2 : index
    %c0_23 = arith.constant 0 : index
    %c0_24 = arith.constant 0 : index
    %28 = vector.load %arg5[%c2, %c0_23, %c0_24] : memref<9x16x16xbf16, #tpu.memory_space<vmem>>, vector<1x16x16xbf16>
    %29 = vector.shape_cast %28 : vector<1x16x16xbf16> to vector<16x16xbf16>
    %cst_25 = arith.constant dense<0.000000e+00> : vector<16x128xf32>
    %30 = tpu.matmul %29, %27, %cst_25 {dimension_numbers = #tpu.dot_dimension_numbers<[1], [0], [0], [1], [0, 0, 1, 1], [], []>} : vector<16x16xbf16>, vector<16x128xbf16>, vector<16x128xf32> -> vector<16x128xf32>
    %31 = arith.addf %26, %30 : vector<16x128xf32>
    %c0_26 = arith.constant 0 : index
    %c127 = arith.constant 127 : index
    %32 = vector.load %arg12[%c0_26, %c127] : memref<16x384xbf16, #tpu.memory_space<vmem>>, vector<16x128xbf16>
    %c3 = arith.constant 3 : index
    %c0_27 = arith.constant 0 : index
    %c0_28 = arith.constant 0 : index
    %33 = vector.load %arg5[%c3, %c0_27, %c0_28] : memref<9x16x16xbf16, #tpu.memory_space<vmem>>, vector<1x16x16xbf16>
    %34 = vector.shape_cast %33 : vector<1x16x16xbf16> to vector<16x16xbf16>
    %cst_29 = arith.constant dense<0.000000e+00> : vector<16x128xf32>
    %35 = tpu.matmul %34, %32, %cst_29 {dimension_numbers = #tpu.dot_dimension_numbers<[1], [0], [0], [1], [0, 0, 1, 1], [], []>} : vector<16x16xbf16>, vector<16x128xbf16>, vector<16x128xf32> -> vector<16x128xf32>
    %36 = arith.addf %31, %35 : vector<16x128xf32>
    %c0_30 = arith.constant 0 : index
    %c128_31 = arith.constant 128 : index
    %37 = vector.load %arg12[%c0_30, %c128_31] : memref<16x384xbf16, #tpu.memory_space<vmem>>, vector<16x128xbf16>
    %c4 = arith.constant 4 : index
    %c0_32 = arith.constant 0 : index
    %c0_33 = arith.constant 0 : index
    %38 = vector.load %arg5[%c4, %c0_32, %c0_33] : memref<9x16x16xbf16, #tpu.memory_space<vmem>>, vector<1x16x16xbf16>
    %39 = vector.shape_cast %38 : vector<1x16x16xbf16> to vector<16x16xbf16>
    %cst_34 = arith.constant dense<0.000000e+00> : vector<16x128xf32>
    %40 = tpu.matmul %39, %37, %cst_34 {dimension_numbers = #tpu.dot_dimension_numbers<[1], [0], [0], [1], [0, 0, 1, 1], [], []>} : vector<16x16xbf16>, vector<16x128xbf16>, vector<16x128xf32> -> vector<16x128xf32>
    %41 = arith.addf %36, %40 : vector<16x128xf32>
    %c0_35 = arith.constant 0 : index
    %c129 = arith.constant 129 : index
    %42 = vector.load %arg12[%c0_35, %c129] : memref<16x384xbf16, #tpu.memory_space<vmem>>, vector<16x128xbf16>
    %c5 = arith.constant 5 : index
    %c0_36 = arith.constant 0 : index
    %c0_37 = arith.constant 0 : index
    %43 = vector.load %arg5[%c5, %c0_36, %c0_37] : memref<9x16x16xbf16, #tpu.memory_space<vmem>>, vector<1x16x16xbf16>
    %44 = vector.shape_cast %43 : vector<1x16x16xbf16> to vector<16x16xbf16>
    %cst_38 = arith.constant dense<0.000000e+00> : vector<16x128xf32>
    %45 = tpu.matmul %44, %42, %cst_38 {dimension_numbers = #tpu.dot_dimension_numbers<[1], [0], [0], [1], [0, 0, 1, 1], [], []>} : vector<16x16xbf16>, vector<16x128xbf16>, vector<16x128xf32> -> vector<16x128xf32>
    %46 = arith.addf %41, %45 : vector<16x128xf32>
    %c0_39 = arith.constant 0 : index
    %c133 = arith.constant 133 : index
    %47 = vector.load %arg12[%c0_39, %c133] : memref<16x384xbf16, #tpu.memory_space<vmem>>, vector<16x128xbf16>
    %c6 = arith.constant 6 : index
    %c0_40 = arith.constant 0 : index
    %c0_41 = arith.constant 0 : index
    %48 = vector.load %arg5[%c6, %c0_40, %c0_41] : memref<9x16x16xbf16, #tpu.memory_space<vmem>>, vector<1x16x16xbf16>
    %49 = vector.shape_cast %48 : vector<1x16x16xbf16> to vector<16x16xbf16>
    %cst_42 = arith.constant dense<0.000000e+00> : vector<16x128xf32>
    %50 = tpu.matmul %49, %47, %cst_42 {dimension_numbers = #tpu.dot_dimension_numbers<[1], [0], [0], [1], [0, 0, 1, 1], [], []>} : vector<16x16xbf16>, vector<16x128xbf16>, vector<16x128xf32> -> vector<16x128xf32>
    %51 = arith.addf %46, %50 : vector<16x128xf32>
    %c0_43 = arith.constant 0 : index
    %c134 = arith.constant 134 : index
    %52 = vector.load %arg12[%c0_43, %c134] : memref<16x384xbf16, #tpu.memory_space<vmem>>, vector<16x128xbf16>
    %c7 = arith.constant 7 : index
    %c0_44 = arith.constant 0 : index
    %c0_45 = arith.constant 0 : index
    %53 = vector.load %arg5[%c7, %c0_44, %c0_45] : memref<9x16x16xbf16, #tpu.memory_space<vmem>>, vector<1x16x16xbf16>
    %54 = vector.shape_cast %53 : vector<1x16x16xbf16> to vector<16x16xbf16>
    %cst_46 = arith.constant dense<0.000000e+00> : vector<16x128xf32>
    %55 = tpu.matmul %54, %52, %cst_46 {dimension_numbers = #tpu.dot_dimension_numbers<[1], [0], [0], [1], [0, 0, 1, 1], [], []>} : vector<16x16xbf16>, vector<16x128xbf16>, vector<16x128xf32> -> vector<16x128xf32>
    %56 = arith.addf %51, %55 : vector<16x128xf32>
    %c0_47 = arith.constant 0 : index
    %c135 = arith.constant 135 : index
    %57 = vector.load %arg12[%c0_47, %c135] : memref<16x384xbf16, #tpu.memory_space<vmem>>, vector<16x128xbf16>
    %c8 = arith.constant 8 : index
    %c0_48 = arith.constant 0 : index
    %c0_49 = arith.constant 0 : index
    %58 = vector.load %arg5[%c8, %c0_48, %c0_49] : memref<9x16x16xbf16, #tpu.memory_space<vmem>>, vector<1x16x16xbf16>
    %59 = vector.shape_cast %58 : vector<1x16x16xbf16> to vector<16x16xbf16>
    %cst_50 = arith.constant dense<0.000000e+00> : vector<16x128xf32>
    %60 = tpu.matmul %59, %57, %cst_50 {dimension_numbers = #tpu.dot_dimension_numbers<[1], [0], [0], [1], [0, 0, 1, 1], [], []>} : vector<16x16xbf16>, vector<16x128xbf16>, vector<16x128xf32> -> vector<16x128xf32>
    %61 = arith.addf %56, %60 : vector<16x128xf32>
    %c0_51 = arith.constant 0 : index
    %c0_52 = arith.constant 0 : index
    %62 = vector.load %arg6[%c0_51, %c0_52] : memref<16x1xf32, #tpu.memory_space<vmem>>, vector<16x1xf32>
    %63 = vector.broadcast %62 : vector<16x1xf32> to vector<16x128xf32>
    %64 = arith.addf %61, %63 : vector<16x128xf32>
    %65 = arith.addf %64, %15 : vector<16x128xf32>
    %cst_53 = arith.constant 0.000000e+00 : f32
    %66 = vector.broadcast %cst_53 : f32 to vector<16x128xf32>
    %67 = arith.maximumf %65, %66 : vector<16x128xf32>
    %68 = vector.broadcast %2 : vector<1x128xf32> to vector<16x128xf32>
    %69 = arith.mulf %67, %68 : vector<16x128xf32>
    %70 = arith.truncf %69 : vector<16x128xf32> to vector<16x128xbf16>
    %c0_54 = arith.constant 0 : index
    %c128_55 = arith.constant 128 : index
    %71 = vector.load %arg12[%c0_54, %c128_55] : memref<16x384xbf16, #tpu.memory_space<vmem>>, vector<16x128xbf16>
    tpu.vector_store %arg12[%c0_54, %c128_55], %70 {strides = array<i32>} : memref<16x384xbf16, #tpu.memory_space<vmem>>, vector<16x128xbf16>,
    %c0_56 = arith.constant 0 : index
    %c121_57 = arith.constant 121 : index
    %72 = vector.load %arg12[%c0_56, %c121_57] : memref<16x384xbf16, #tpu.memory_space<vmem>>, vector<16x128xbf16>
    %c0_58 = arith.constant 0 : index
    %c0_59 = arith.constant 0 : index
    %c0_60 = arith.constant 0 : index
    %73 = vector.load %arg7[%c0_58, %c0_59, %c0_60] : memref<9x16x16xbf16, #tpu.memory_space<vmem>>, vector<1x16x16xbf16>
    %74 = vector.shape_cast %73 : vector<1x16x16xbf16> to vector<16x16xbf16>
    %cst_61 = arith.constant dense<0.000000e+00> : vector<16x128xf32>
    %75 = tpu.matmul %74, %72, %cst_61 {dimension_numbers = #tpu.dot_dimension_numbers<[1], [0], [0], [1], [0, 0, 1, 1], [], []>} : vector<16x16xbf16>, vector<16x128xbf16>, vector<16x128xf32> -> vector<16x128xf32>
    %c0_62 = arith.constant 0 : index
    %c122_63 = arith.constant 122 : index
    %76 = vector.load %arg12[%c0_62, %c122_63] : memref<16x384xbf16, #tpu.memory_space<vmem>>, vector<16x128xbf16>
    %c1_64 = arith.constant 1 : index
    %c0_65 = arith.constant 0 : index
    %c0_66 = arith.constant 0 : index
    %77 = vector.load %arg7[%c1_64, %c0_65, %c0_66] : memref<9x16x16xbf16, #tpu.memory_space<vmem>>, vector<1x16x16xbf16>
    %78 = vector.shape_cast %77 : vector<1x16x16xbf16> to vector<16x16xbf16>
    %cst_67 = arith.constant dense<0.000000e+00> : vector<16x128xf32>
    %79 = tpu.matmul %78, %76, %cst_67 {dimension_numbers = #tpu.dot_dimension_numbers<[1], [0], [0], [1], [0, 0, 1, 1], [], []>} : vector<16x16xbf16>, vector<16x128xbf16>, vector<16x128xf32> -> vector<16x128xf32>
    %80 = arith.addf %75, %79 : vector<16x128xf32>
    %c0_68 = arith.constant 0 : index
    %c123_69 = arith.constant 123 : index
    %81 = vector.load %arg12[%c0_68, %c123_69] : memref<16x384xbf16, #tpu.memory_space<vmem>>, vector<16x128xbf16>
    %c2_70 = arith.constant 2 : index
    %c0_71 = arith.constant 0 : index
    %c0_72 = arith.constant 0 : index
    %82 = vector.load %arg7[%c2_70, %c0_71, %c0_72] : memref<9x16x16xbf16, #tpu.memory_space<vmem>>, vector<1x16x16xbf16>
    %83 = vector.shape_cast %82 : vector<1x16x16xbf16> to vector<16x16xbf16>
    %cst_73 = arith.constant dense<0.000000e+00> : vector<16x128xf32>
    %84 = tpu.matmul %83, %81, %cst_73 {dimension_numbers = #tpu.dot_dimension_numbers<[1], [0], [0], [1], [0, 0, 1, 1], [], []>} : vector<16x16xbf16>, vector<16x128xbf16>, vector<16x128xf32> -> vector<16x128xf32>
    %85 = arith.addf %80, %84 : vector<16x128xf32>
    %c0_74 = arith.constant 0 : index
    %c127_75 = arith.constant 127 : index
    %86 = vector.load %arg12[%c0_74, %c127_75] : memref<16x384xbf16, #tpu.memory_space<vmem>>, vector<16x128xbf16>
    %c3_76 = arith.constant 3 : index
    %c0_77 = arith.constant 0 : index
    %c0_78 = arith.constant 0 : index
    %87 = vector.load %arg7[%c3_76, %c0_77, %c0_78] : memref<9x16x16xbf16, #tpu.memory_space<vmem>>, vector<1x16x16xbf16>
    %88 = vector.shape_cast %87 : vector<1x16x16xbf16> to vector<16x16xbf16>
    %cst_79 = arith.constant dense<0.000000e+00> : vector<16x128xf32>
    %89 = tpu.matmul %88, %86, %cst_79 {dimension_numbers = #tpu.dot_dimension_numbers<[1], [0], [0], [1], [0, 0, 1, 1], [], []>} : vector<16x16xbf16>, vector<16x128xbf16>, vector<16x128xf32> -> vector<16x128xf32>
    %90 = arith.addf %85, %89 : vector<16x128xf32>
    %c0_80 = arith.constant 0 : index
    %c128_81 = arith.constant 128 : index
    %91 = vector.load %arg12[%c0_80, %c128_81] : memref<16x384xbf16, #tpu.memory_space<vmem>>, vector<16x128xbf16>
    %c4_82 = arith.constant 4 : index
    %c0_83 = arith.constant 0 : index
    %c0_84 = arith.constant 0 : index
    %92 = vector.load %arg7[%c4_82, %c0_83, %c0_84] : memref<9x16x16xbf16, #tpu.memory_space<vmem>>, vector<1x16x16xbf16>
    %93 = vector.shape_cast %92 : vector<1x16x16xbf16> to vector<16x16xbf16>
    %cst_85 = arith.constant dense<0.000000e+00> : vector<16x128xf32>
    %94 = tpu.matmul %93, %91, %cst_85 {dimension_numbers = #tpu.dot_dimension_numbers<[1], [0], [0], [1], [0, 0, 1, 1], [], []>} : vector<16x16xbf16>, vector<16x128xbf16>, vector<16x128xf32> -> vector<16x128xf32>
    %95 = arith.addf %90, %94 : vector<16x128xf32>
    %c0_86 = arith.constant 0 : index
    %c129_87 = arith.constant 129 : index
    %96 = vector.load %arg12[%c0_86, %c129_87] : memref<16x384xbf16, #tpu.memory_space<vmem>>, vector<16x128xbf16>
    %c5_88 = arith.constant 5 : index
    %c0_89 = arith.constant 0 : index
    %c0_90 = arith.constant 0 : index
    %97 = vector.load %arg7[%c5_88, %c0_89, %c0_90] : memref<9x16x16xbf16, #tpu.memory_space<vmem>>, vector<1x16x16xbf16>
    %98 = vector.shape_cast %97 : vector<1x16x16xbf16> to vector<16x16xbf16>
    %cst_91 = arith.constant dense<0.000000e+00> : vector<16x128xf32>
    %99 = tpu.matmul %98, %96, %cst_91 {dimension_numbers = #tpu.dot_dimension_numbers<[1], [0], [0], [1], [0, 0, 1, 1], [], []>} : vector<16x16xbf16>, vector<16x128xbf16>, vector<16x128xf32> -> vector<16x128xf32>
    %100 = arith.addf %95, %99 : vector<16x128xf32>
    %c0_92 = arith.constant 0 : index
    %c133_93 = arith.constant 133 : index
    %101 = vector.load %arg12[%c0_92, %c133_93] : memref<16x384xbf16, #tpu.memory_space<vmem>>, vector<16x128xbf16>
    %c6_94 = arith.constant 6 : index
    %c0_95 = arith.constant 0 : index
    %c0_96 = arith.constant 0 : index
    %102 = vector.load %arg7[%c6_94, %c0_95, %c0_96] : memref<9x16x16xbf16, #tpu.memory_space<vmem>>, vector<1x16x16xbf16>
    %103 = vector.shape_cast %102 : vector<1x16x16xbf16> to vector<16x16xbf16>
    %cst_97 = arith.constant dense<0.000000e+00> : vector<16x128xf32>
    %104 = tpu.matmul %103, %101, %cst_97 {dimension_numbers = #tpu.dot_dimension_numbers<[1], [0], [0], [1], [0, 0, 1, 1], [], []>} : vector<16x16xbf16>, vector<16x128xbf16>, vector<16x128xf32> -> vector<16x128xf32>
    %105 = arith.addf %100, %104 : vector<16x128xf32>
    %c0_98 = arith.constant 0 : index
    %c134_99 = arith.constant 134 : index
    %106 = vector.load %arg12[%c0_98, %c134_99] : memref<16x384xbf16, #tpu.memory_space<vmem>>, vector<16x128xbf16>
    %c7_100 = arith.constant 7 : index
    %c0_101 = arith.constant 0 : index
    %c0_102 = arith.constant 0 : index
    %107 = vector.load %arg7[%c7_100, %c0_101, %c0_102] : memref<9x16x16xbf16, #tpu.memory_space<vmem>>, vector<1x16x16xbf16>
    %108 = vector.shape_cast %107 : vector<1x16x16xbf16> to vector<16x16xbf16>
    %cst_103 = arith.constant dense<0.000000e+00> : vector<16x128xf32>
    %109 = tpu.matmul %108, %106, %cst_103 {dimension_numbers = #tpu.dot_dimension_numbers<[1], [0], [0], [1], [0, 0, 1, 1], [], []>} : vector<16x16xbf16>, vector<16x128xbf16>, vector<16x128xf32> -> vector<16x128xf32>
    %110 = arith.addf %105, %109 : vector<16x128xf32>
    %c0_104 = arith.constant 0 : index
    %c135_105 = arith.constant 135 : index
    %111 = vector.load %arg12[%c0_104, %c135_105] : memref<16x384xbf16, #tpu.memory_space<vmem>>, vector<16x128xbf16>
    %c8_106 = arith.constant 8 : index
    %c0_107 = arith.constant 0 : index
    %c0_108 = arith.constant 0 : index
    %112 = vector.load %arg7[%c8_106, %c0_107, %c0_108] : memref<9x16x16xbf16, #tpu.memory_space<vmem>>, vector<1x16x16xbf16>
    %113 = vector.shape_cast %112 : vector<1x16x16xbf16> to vector<16x16xbf16>
    %cst_109 = arith.constant dense<0.000000e+00> : vector<16x128xf32>
    %114 = tpu.matmul %113, %111, %cst_109 {dimension_numbers = #tpu.dot_dimension_numbers<[1], [0], [0], [1], [0, 0, 1, 1], [], []>} : vector<16x16xbf16>, vector<16x128xbf16>, vector<16x128xf32> -> vector<16x128xf32>
    %115 = arith.addf %110, %114 : vector<16x128xf32>
    %c0_110 = arith.constant 0 : index
    %c0_111 = arith.constant 0 : index
    %116 = vector.load %arg8[%c0_110, %c0_111] : memref<16x1xf32, #tpu.memory_space<vmem>>, vector<16x1xf32>
    %117 = vector.broadcast %116 : vector<16x1xf32> to vector<16x128xf32>
    %118 = arith.addf %115, %117 : vector<16x128xf32>
    %cst_112 = arith.constant 0.000000e+00 : f32
    %119 = vector.broadcast %cst_112 : f32 to vector<16x128xf32>
    %120 = arith.maximumf %118, %119 : vector<16x128xf32>
    %121 = vector.broadcast %2 : vector<1x128xf32> to vector<16x128xf32>
    %122 = arith.mulf %120, %121 : vector<16x128xf32>
    %123 = arith.truncf %122 : vector<16x128xf32> to vector<16x128xbf16>
    %c0_113 = arith.constant 0 : index
    %c128_114 = arith.constant 128 : index
    %124 = vector.load %arg12[%c0_113, %c128_114] : memref<16x384xbf16, #tpu.memory_space<vmem>>, vector<16x128xbf16>
    tpu.vector_store %arg12[%c0_113, %c128_114], %123 {strides = array<i32>} : memref<16x384xbf16, #tpu.memory_space<vmem>>, vector<16x128xbf16>,
    %c0_115 = arith.constant 0 : index
    %c121_116 = arith.constant 121 : index
    %125 = vector.load %arg12[%c0_115, %c121_116] : memref<16x384xbf16, #tpu.memory_space<vmem>>, vector<16x128xbf16>
    %c0_117 = arith.constant 0 : index
    %c0_118 = arith.constant 0 : index
    %c0_119 = arith.constant 0 : index
    %126 = vector.load %arg9[%c0_117, %c0_118, %c0_119] : memref<9x16x16xbf16, #tpu.memory_space<vmem>>, vector<1x16x16xbf16>
    %127 = vector.shape_cast %126 : vector<1x16x16xbf16> to vector<16x16xbf16>
    %cst_120 = arith.constant dense<0.000000e+00> : vector<16x128xf32>
    %128 = tpu.matmul %127, %125, %cst_120 {dimension_numbers = #tpu.dot_dimension_numbers<[1], [0], [0], [1], [0, 0, 1, 1], [], []>} : vector<16x16xbf16>, vector<16x128xbf16>, vector<16x128xf32> -> vector<16x128xf32>
    %c0_121 = arith.constant 0 : index
    %c122_122 = arith.constant 122 : index
    %129 = vector.load %arg12[%c0_121, %c122_122] : memref<16x384xbf16, #tpu.memory_space<vmem>>, vector<16x128xbf16>
    %c1_123 = arith.constant 1 : index
    %c0_124 = arith.constant 0 : index
    %c0_125 = arith.constant 0 : index
    %130 = vector.load %arg9[%c1_123, %c0_124, %c0_125] : memref<9x16x16xbf16, #tpu.memory_space<vmem>>, vector<1x16x16xbf16>
    %131 = vector.shape_cast %130 : vector<1x16x16xbf16> to vector<16x16xbf16>
    %cst_126 = arith.constant dense<0.000000e+00> : vector<16x128xf32>
    %132 = tpu.matmul %131, %129, %cst_126 {dimension_numbers = #tpu.dot_dimension_numbers<[1], [0], [0], [1], [0, 0, 1, 1], [], []>} : vector<16x16xbf16>, vector<16x128xbf16>, vector<16x128xf32> -> vector<16x128xf32>
    %133 = arith.addf %128, %132 : vector<16x128xf32>
    %c0_127 = arith.constant 0 : index
    %c123_128 = arith.constant 123 : index
    %134 = vector.load %arg12[%c0_127, %c123_128] : memref<16x384xbf16, #tpu.memory_space<vmem>>, vector<16x128xbf16>
    %c2_129 = arith.constant 2 : index
    %c0_130 = arith.constant 0 : index
    %c0_131 = arith.constant 0 : index
    %135 = vector.load %arg9[%c2_129, %c0_130, %c0_131] : memref<9x16x16xbf16, #tpu.memory_space<vmem>>, vector<1x16x16xbf16>
    %136 = vector.shape_cast %135 : vector<1x16x16xbf16> to vector<16x16xbf16>
    %cst_132 = arith.constant dense<0.000000e+00> : vector<16x128xf32>
    %137 = tpu.matmul %136, %134, %cst_132 {dimension_numbers = #tpu.dot_dimension_numbers<[1], [0], [0], [1], [0, 0, 1, 1], [], []>} : vector<16x16xbf16>, vector<16x128xbf16>, vector<16x128xf32> -> vector<16x128xf32>
    %138 = arith.addf %133, %137 : vector<16x128xf32>
    %c0_133 = arith.constant 0 : index
    %c127_134 = arith.constant 127 : index
    %139 = vector.load %arg12[%c0_133, %c127_134] : memref<16x384xbf16, #tpu.memory_space<vmem>>, vector<16x128xbf16>
    %c3_135 = arith.constant 3 : index
    %c0_136 = arith.constant 0 : index
    %c0_137 = arith.constant 0 : index
    %140 = vector.load %arg9[%c3_135, %c0_136, %c0_137] : memref<9x16x16xbf16, #tpu.memory_space<vmem>>, vector<1x16x16xbf16>
    %141 = vector.shape_cast %140 : vector<1x16x16xbf16> to vector<16x16xbf16>
    %cst_138 = arith.constant dense<0.000000e+00> : vector<16x128xf32>
    %142 = tpu.matmul %141, %139, %cst_138 {dimension_numbers = #tpu.dot_dimension_numbers<[1], [0], [0], [1], [0, 0, 1, 1], [], []>} : vector<16x16xbf16>, vector<16x128xbf16>, vector<16x128xf32> -> vector<16x128xf32>
    %143 = arith.addf %138, %142 : vector<16x128xf32>
    %c0_139 = arith.constant 0 : index
    %c128_140 = arith.constant 128 : index
    %144 = vector.load %arg12[%c0_139, %c128_140] : memref<16x384xbf16, #tpu.memory_space<vmem>>, vector<16x128xbf16>
    %c4_141 = arith.constant 4 : index
    %c0_142 = arith.constant 0 : index
    %c0_143 = arith.constant 0 : index
    %145 = vector.load %arg9[%c4_141, %c0_142, %c0_143] : memref<9x16x16xbf16, #tpu.memory_space<vmem>>, vector<1x16x16xbf16>
    %146 = vector.shape_cast %145 : vector<1x16x16xbf16> to vector<16x16xbf16>
    %cst_144 = arith.constant dense<0.000000e+00> : vector<16x128xf32>
    %147 = tpu.matmul %146, %144, %cst_144 {dimension_numbers = #tpu.dot_dimension_numbers<[1], [0], [0], [1], [0, 0, 1, 1], [], []>} : vector<16x16xbf16>, vector<16x128xbf16>, vector<16x128xf32> -> vector<16x128xf32>
    %148 = arith.addf %143, %147 : vector<16x128xf32>
    %c0_145 = arith.constant 0 : index
    %c129_146 = arith.constant 129 : index
    %149 = vector.load %arg12[%c0_145, %c129_146] : memref<16x384xbf16, #tpu.memory_space<vmem>>, vector<16x128xbf16>
    %c5_147 = arith.constant 5 : index
    %c0_148 = arith.constant 0 : index
    %c0_149 = arith.constant 0 : index
    %150 = vector.load %arg9[%c5_147, %c0_148, %c0_149] : memref<9x16x16xbf16, #tpu.memory_space<vmem>>, vector<1x16x16xbf16>
    %151 = vector.shape_cast %150 : vector<1x16x16xbf16> to vector<16x16xbf16>
    %cst_150 = arith.constant dense<0.000000e+00> : vector<16x128xf32>
    %152 = tpu.matmul %151, %149, %cst_150 {dimension_numbers = #tpu.dot_dimension_numbers<[1], [0], [0], [1], [0, 0, 1, 1], [], []>} : vector<16x16xbf16>, vector<16x128xbf16>, vector<16x128xf32> -> vector<16x128xf32>
    %153 = arith.addf %148, %152 : vector<16x128xf32>
    %c0_151 = arith.constant 0 : index
    %c133_152 = arith.constant 133 : index
    %154 = vector.load %arg12[%c0_151, %c133_152] : memref<16x384xbf16, #tpu.memory_space<vmem>>, vector<16x128xbf16>
    %c6_153 = arith.constant 6 : index
    %c0_154 = arith.constant 0 : index
    %c0_155 = arith.constant 0 : index
    %155 = vector.load %arg9[%c6_153, %c0_154, %c0_155] : memref<9x16x16xbf16, #tpu.memory_space<vmem>>, vector<1x16x16xbf16>
    %156 = vector.shape_cast %155 : vector<1x16x16xbf16> to vector<16x16xbf16>
    %cst_156 = arith.constant dense<0.000000e+00> : vector<16x128xf32>
    %157 = tpu.matmul %156, %154, %cst_156 {dimension_numbers = #tpu.dot_dimension_numbers<[1], [0], [0], [1], [0, 0, 1, 1], [], []>} : vector<16x16xbf16>, vector<16x128xbf16>, vector<16x128xf32> -> vector<16x128xf32>
    %158 = arith.addf %153, %157 : vector<16x128xf32>
    %c0_157 = arith.constant 0 : index
    %c134_158 = arith.constant 134 : index
    %159 = vector.load %arg12[%c0_157, %c134_158] : memref<16x384xbf16, #tpu.memory_space<vmem>>, vector<16x128xbf16>
    %c7_159 = arith.constant 7 : index
    %c0_160 = arith.constant 0 : index
    %c0_161 = arith.constant 0 : index
    %160 = vector.load %arg9[%c7_159, %c0_160, %c0_161] : memref<9x16x16xbf16, #tpu.memory_space<vmem>>, vector<1x16x16xbf16>
    %161 = vector.shape_cast %160 : vector<1x16x16xbf16> to vector<16x16xbf16>
    %cst_162 = arith.constant dense<0.000000e+00> : vector<16x128xf32>
    %162 = tpu.matmul %161, %159, %cst_162 {dimension_numbers = #tpu.dot_dimension_numbers<[1], [0], [0], [1], [0, 0, 1, 1], [], []>} : vector<16x16xbf16>, vector<16x128xbf16>, vector<16x128xf32> -> vector<16x128xf32>
    %163 = arith.addf %158, %162 : vector<16x128xf32>
    %c0_163 = arith.constant 0 : index
    %c135_164 = arith.constant 135 : index
    %164 = vector.load %arg12[%c0_163, %c135_164] : memref<16x384xbf16, #tpu.memory_space<vmem>>, vector<16x128xbf16>
    %c8_165 = arith.constant 8 : index
    %c0_166 = arith.constant 0 : index
    %c0_167 = arith.constant 0 : index
    %165 = vector.load %arg9[%c8_165, %c0_166, %c0_167] : memref<9x16x16xbf16, #tpu.memory_space<vmem>>, vector<1x16x16xbf16>
    %166 = vector.shape_cast %165 : vector<1x16x16xbf16> to vector<16x16xbf16>
    %cst_168 = arith.constant dense<0.000000e+00> : vector<16x128xf32>
    %167 = tpu.matmul %166, %164, %cst_168 {dimension_numbers = #tpu.dot_dimension_numbers<[1], [0], [0], [1], [0, 0, 1, 1], [], []>} : vector<16x16xbf16>, vector<16x128xbf16>, vector<16x128xf32> -> vector<16x128xf32>
    %168 = arith.addf %163, %167 : vector<16x128xf32>
    %c0_169 = arith.constant 0 : index
    %c0_170 = arith.constant 0 : index
    %169 = vector.load %arg10[%c0_169, %c0_170] : memref<16x1xf32, #tpu.memory_space<vmem>>, vector<16x1xf32>
    %170 = vector.broadcast %169 : vector<16x1xf32> to vector<16x128xf32>
    %171 = arith.addf %168, %170 : vector<16x128xf32>
    %172 = arith.addf %171, %69 : vector<16x128xf32>
    %cst_171 = arith.constant 0.000000e+00 : f32
    %173 = vector.broadcast %cst_171 : f32 to vector<16x128xf32>
    %174 = arith.maximumf %172, %173 : vector<16x128xf32>
    %175 = vector.broadcast %2 : vector<1x128xf32> to vector<16x128xf32>
    %176 = arith.mulf %174, %175 : vector<16x128xf32>
    %177 = arith.truncf %176 : vector<16x128xf32> to vector<16x128xbf16>
    %c0_172 = arith.constant 0 : index
    %c0_173 = arith.constant 0 : index
    %178 = vector.load %arg11[%c0_172, %c0_173] : memref<16x128xbf16, #tpu.memory_space<vmem>>, vector<16x128xbf16>
    tpu.vector_store %arg11[%c0_172, %c0_173], %177 {strides = array<i32>} : memref<16x128xbf16, #tpu.memory_space<vmem>>, vector<16x128xbf16>,
    return
  }
}

module attributes {stable_mosaic.version = 11 : i64} {
  func.func @_stage_kernel(%arg0: memref<144x128xbf16, #tpu.memory_space<vmem>>, %arg1: memref<1x128xf32, #tpu.memory_space<vmem>>, %arg2: memref<64x144xbf16, #tpu.memory_space<vmem>>, %arg3: memref<64x1xf32, #tpu.memory_space<vmem>>, %arg4: memref<64x1xf32, #tpu.memory_space<vmem>>, %arg5: memref<9x32x32xbf16, #tpu.memory_space<vmem>>, %arg6: memref<32x1xf32, #tpu.memory_space<vmem>>, %arg7: memref<9x32x32xbf16, #tpu.memory_space<vmem>>, %arg8: memref<32x1xf32, #tpu.memory_space<vmem>>, %arg9: memref<9x32x32xbf16, #tpu.memory_space<vmem>>, %arg10: memref<32x1xf32, #tpu.memory_space<vmem>>, %arg11: memref<32x128xf32, #tpu.memory_space<vmem>>, %arg12: memref<32x384xbf16, #tpu.memory_space<vmem>>) attributes {dimension_semantics = [], scalar_prefetch = 0 : i64, scratch_operands = 1 : i64, tpu.core_type = #tpu.core_type<tc>} {
    %cst = arith.constant 0.000000e+00 : bf16
    %0 = vector.broadcast %cst : bf16 to vector<32x384xbf16>
    %c0 = arith.constant 0 : index
    %c0_0 = arith.constant 0 : index
    %1 = vector.load %arg12[%c0, %c0_0] : memref<32x384xbf16, #tpu.memory_space<vmem>>, vector<32x384xbf16>
    tpu.vector_store %arg12[%c0, %c0_0], %0 {strides = array<i32>} : memref<32x384xbf16, #tpu.memory_space<vmem>>, vector<32x384xbf16>,
    %c0_1 = arith.constant 0 : index
    %c0_2 = arith.constant 0 : index
    %2 = vector.load %arg1[%c0_1, %c0_2] : memref<1x128xf32, #tpu.memory_space<vmem>>, vector<1x128xf32>
    %c0_3 = arith.constant 0 : index
    %c0_4 = arith.constant 0 : index
    %3 = vector.load %arg2[%c0_3, %c0_4] : memref<64x144xbf16, #tpu.memory_space<vmem>>, vector<64x144xbf16>
    %c0_5 = arith.constant 0 : index
    %c0_6 = arith.constant 0 : index
    %4 = vector.load %arg0[%c0_5, %c0_6] : memref<144x128xbf16, #tpu.memory_space<vmem>>, vector<144x128xbf16>
    %cst_7 = arith.constant dense<0.000000e+00> : vector<64x128xf32>
    %5 = tpu.matmul %3, %4, %cst_7 {dimension_numbers = #tpu.dot_dimension_numbers<[1], [0], [0], [1], [0, 0, 1, 1], [], []>} : vector<64x144xbf16>, vector<144x128xbf16>, vector<64x128xf32> -> vector<64x128xf32>
    %c0_8 = arith.constant 0 : index
    %c0_9 = arith.constant 0 : index
    %6 = vector.load %arg3[%c0_8, %c0_9] : memref<64x1xf32, #tpu.memory_space<vmem>>, vector<64x1xf32>
    %7 = vector.broadcast %6 : vector<64x1xf32> to vector<64x128xf32>
    %8 = arith.addf %5, %7 : vector<64x128xf32>
    %c0_10 = arith.constant 0 : index
    %c0_11 = arith.constant 0 : index
    %9 = vector.load %arg4[%c0_10, %c0_11] : memref<64x1xf32, #tpu.memory_space<vmem>>, vector<64x1xf32>
    %10 = vector.broadcast %9 : vector<64x1xf32> to vector<64x128xf32>
    %11 = arith.maximumf %8, %10 : vector<64x128xf32>
    %12 = vector.broadcast %2 : vector<1x128xf32> to vector<64x128xf32>
    %13 = arith.mulf %11, %12 : vector<64x128xf32>
    %14 = vector.extract_strided_slice %13 {offsets = [0, 0], sizes = [32, 128], strides = [1, 1]} : vector<64x128xf32> to vector<32x128xf32>
    %15 = vector.extract_strided_slice %13 {offsets = [32, 0], sizes = [32, 128], strides = [1, 1]} : vector<64x128xf32> to vector<32x128xf32>
    %16 = arith.truncf %14 : vector<32x128xf32> to vector<32x128xbf16>
    %c0_12 = arith.constant 0 : index
    %c128 = arith.constant 128 : index
    %17 = vector.load %arg12[%c0_12, %c128] : memref<32x384xbf16, #tpu.memory_space<vmem>>, vector<32x128xbf16>
    tpu.vector_store %arg12[%c0_12, %c128], %16 {strides = array<i32>} : memref<32x384xbf16, #tpu.memory_space<vmem>>, vector<32x128xbf16>,
    %c0_13 = arith.constant 0 : index
    %c123 = arith.constant 123 : index
    %18 = vector.load %arg12[%c0_13, %c123] : memref<32x384xbf16, #tpu.memory_space<vmem>>, vector<32x128xbf16>
    %c0_14 = arith.constant 0 : index
    %c0_15 = arith.constant 0 : index
    %c0_16 = arith.constant 0 : index
    %19 = vector.load %arg5[%c0_14, %c0_15, %c0_16] : memref<9x32x32xbf16, #tpu.memory_space<vmem>>, vector<1x32x32xbf16>
    %20 = vector.shape_cast %19 : vector<1x32x32xbf16> to vector<32x32xbf16>
    %cst_17 = arith.constant dense<0.000000e+00> : vector<32x128xf32>
    %21 = tpu.matmul %20, %18, %cst_17 {dimension_numbers = #tpu.dot_dimension_numbers<[1], [0], [0], [1], [0, 0, 1, 1], [], []>} : vector<32x32xbf16>, vector<32x128xbf16>, vector<32x128xf32> -> vector<32x128xf32>
    %c0_18 = arith.constant 0 : index
    %c124 = arith.constant 124 : index
    %22 = vector.load %arg12[%c0_18, %c124] : memref<32x384xbf16, #tpu.memory_space<vmem>>, vector<32x128xbf16>
    %c1 = arith.constant 1 : index
    %c0_19 = arith.constant 0 : index
    %c0_20 = arith.constant 0 : index
    %23 = vector.load %arg5[%c1, %c0_19, %c0_20] : memref<9x32x32xbf16, #tpu.memory_space<vmem>>, vector<1x32x32xbf16>
    %24 = vector.shape_cast %23 : vector<1x32x32xbf16> to vector<32x32xbf16>
    %cst_21 = arith.constant dense<0.000000e+00> : vector<32x128xf32>
    %25 = tpu.matmul %24, %22, %cst_21 {dimension_numbers = #tpu.dot_dimension_numbers<[1], [0], [0], [1], [0, 0, 1, 1], [], []>} : vector<32x32xbf16>, vector<32x128xbf16>, vector<32x128xf32> -> vector<32x128xf32>
    %26 = arith.addf %21, %25 : vector<32x128xf32>
    %c0_22 = arith.constant 0 : index
    %c125 = arith.constant 125 : index
    %27 = vector.load %arg12[%c0_22, %c125] : memref<32x384xbf16, #tpu.memory_space<vmem>>, vector<32x128xbf16>
    %c2 = arith.constant 2 : index
    %c0_23 = arith.constant 0 : index
    %c0_24 = arith.constant 0 : index
    %28 = vector.load %arg5[%c2, %c0_23, %c0_24] : memref<9x32x32xbf16, #tpu.memory_space<vmem>>, vector<1x32x32xbf16>
    %29 = vector.shape_cast %28 : vector<1x32x32xbf16> to vector<32x32xbf16>
    %cst_25 = arith.constant dense<0.000000e+00> : vector<32x128xf32>
    %30 = tpu.matmul %29, %27, %cst_25 {dimension_numbers = #tpu.dot_dimension_numbers<[1], [0], [0], [1], [0, 0, 1, 1], [], []>} : vector<32x32xbf16>, vector<32x128xbf16>, vector<32x128xf32> -> vector<32x128xf32>
    %31 = arith.addf %26, %30 : vector<32x128xf32>
    %c0_26 = arith.constant 0 : index
    %c127 = arith.constant 127 : index
    %32 = vector.load %arg12[%c0_26, %c127] : memref<32x384xbf16, #tpu.memory_space<vmem>>, vector<32x128xbf16>
    %c3 = arith.constant 3 : index
    %c0_27 = arith.constant 0 : index
    %c0_28 = arith.constant 0 : index
    %33 = vector.load %arg5[%c3, %c0_27, %c0_28] : memref<9x32x32xbf16, #tpu.memory_space<vmem>>, vector<1x32x32xbf16>
    %34 = vector.shape_cast %33 : vector<1x32x32xbf16> to vector<32x32xbf16>
    %cst_29 = arith.constant dense<0.000000e+00> : vector<32x128xf32>
    %35 = tpu.matmul %34, %32, %cst_29 {dimension_numbers = #tpu.dot_dimension_numbers<[1], [0], [0], [1], [0, 0, 1, 1], [], []>} : vector<32x32xbf16>, vector<32x128xbf16>, vector<32x128xf32> -> vector<32x128xf32>
    %36 = arith.addf %31, %35 : vector<32x128xf32>
    %c0_30 = arith.constant 0 : index
    %c128_31 = arith.constant 128 : index
    %37 = vector.load %arg12[%c0_30, %c128_31] : memref<32x384xbf16, #tpu.memory_space<vmem>>, vector<32x128xbf16>
    %c4 = arith.constant 4 : index
    %c0_32 = arith.constant 0 : index
    %c0_33 = arith.constant 0 : index
    %38 = vector.load %arg5[%c4, %c0_32, %c0_33] : memref<9x32x32xbf16, #tpu.memory_space<vmem>>, vector<1x32x32xbf16>
    %39 = vector.shape_cast %38 : vector<1x32x32xbf16> to vector<32x32xbf16>
    %cst_34 = arith.constant dense<0.000000e+00> : vector<32x128xf32>
    %40 = tpu.matmul %39, %37, %cst_34 {dimension_numbers = #tpu.dot_dimension_numbers<[1], [0], [0], [1], [0, 0, 1, 1], [], []>} : vector<32x32xbf16>, vector<32x128xbf16>, vector<32x128xf32> -> vector<32x128xf32>
    %41 = arith.addf %36, %40 : vector<32x128xf32>
    %c0_35 = arith.constant 0 : index
    %c129 = arith.constant 129 : index
    %42 = vector.load %arg12[%c0_35, %c129] : memref<32x384xbf16, #tpu.memory_space<vmem>>, vector<32x128xbf16>
    %c5 = arith.constant 5 : index
    %c0_36 = arith.constant 0 : index
    %c0_37 = arith.constant 0 : index
    %43 = vector.load %arg5[%c5, %c0_36, %c0_37] : memref<9x32x32xbf16, #tpu.memory_space<vmem>>, vector<1x32x32xbf16>
    %44 = vector.shape_cast %43 : vector<1x32x32xbf16> to vector<32x32xbf16>
    %cst_38 = arith.constant dense<0.000000e+00> : vector<32x128xf32>
    %45 = tpu.matmul %44, %42, %cst_38 {dimension_numbers = #tpu.dot_dimension_numbers<[1], [0], [0], [1], [0, 0, 1, 1], [], []>} : vector<32x32xbf16>, vector<32x128xbf16>, vector<32x128xf32> -> vector<32x128xf32>
    %46 = arith.addf %41, %45 : vector<32x128xf32>
    %c0_39 = arith.constant 0 : index
    %c131 = arith.constant 131 : index
    %47 = vector.load %arg12[%c0_39, %c131] : memref<32x384xbf16, #tpu.memory_space<vmem>>, vector<32x128xbf16>
    %c6 = arith.constant 6 : index
    %c0_40 = arith.constant 0 : index
    %c0_41 = arith.constant 0 : index
    %48 = vector.load %arg5[%c6, %c0_40, %c0_41] : memref<9x32x32xbf16, #tpu.memory_space<vmem>>, vector<1x32x32xbf16>
    %49 = vector.shape_cast %48 : vector<1x32x32xbf16> to vector<32x32xbf16>
    %cst_42 = arith.constant dense<0.000000e+00> : vector<32x128xf32>
    %50 = tpu.matmul %49, %47, %cst_42 {dimension_numbers = #tpu.dot_dimension_numbers<[1], [0], [0], [1], [0, 0, 1, 1], [], []>} : vector<32x32xbf16>, vector<32x128xbf16>, vector<32x128xf32> -> vector<32x128xf32>
    %51 = arith.addf %46, %50 : vector<32x128xf32>
    %c0_43 = arith.constant 0 : index
    %c132 = arith.constant 132 : index
    %52 = vector.load %arg12[%c0_43, %c132] : memref<32x384xbf16, #tpu.memory_space<vmem>>, vector<32x128xbf16>
    %c7 = arith.constant 7 : index
    %c0_44 = arith.constant 0 : index
    %c0_45 = arith.constant 0 : index
    %53 = vector.load %arg5[%c7, %c0_44, %c0_45] : memref<9x32x32xbf16, #tpu.memory_space<vmem>>, vector<1x32x32xbf16>
    %54 = vector.shape_cast %53 : vector<1x32x32xbf16> to vector<32x32xbf16>
    %cst_46 = arith.constant dense<0.000000e+00> : vector<32x128xf32>
    %55 = tpu.matmul %54, %52, %cst_46 {dimension_numbers = #tpu.dot_dimension_numbers<[1], [0], [0], [1], [0, 0, 1, 1], [], []>} : vector<32x32xbf16>, vector<32x128xbf16>, vector<32x128xf32> -> vector<32x128xf32>
    %56 = arith.addf %51, %55 : vector<32x128xf32>
    %c0_47 = arith.constant 0 : index
    %c133 = arith.constant 133 : index
    %57 = vector.load %arg12[%c0_47, %c133] : memref<32x384xbf16, #tpu.memory_space<vmem>>, vector<32x128xbf16>
    %c8 = arith.constant 8 : index
    %c0_48 = arith.constant 0 : index
    %c0_49 = arith.constant 0 : index
    %58 = vector.load %arg5[%c8, %c0_48, %c0_49] : memref<9x32x32xbf16, #tpu.memory_space<vmem>>, vector<1x32x32xbf16>
    %59 = vector.shape_cast %58 : vector<1x32x32xbf16> to vector<32x32xbf16>
    %cst_50 = arith.constant dense<0.000000e+00> : vector<32x128xf32>
    %60 = tpu.matmul %59, %57, %cst_50 {dimension_numbers = #tpu.dot_dimension_numbers<[1], [0], [0], [1], [0, 0, 1, 1], [], []>} : vector<32x32xbf16>, vector<32x128xbf16>, vector<32x128xf32> -> vector<32x128xf32>
    %61 = arith.addf %56, %60 : vector<32x128xf32>
    %c0_51 = arith.constant 0 : index
    %c0_52 = arith.constant 0 : index
    %62 = vector.load %arg6[%c0_51, %c0_52] : memref<32x1xf32, #tpu.memory_space<vmem>>, vector<32x1xf32>
    %63 = vector.broadcast %62 : vector<32x1xf32> to vector<32x128xf32>
    %64 = arith.addf %61, %63 : vector<32x128xf32>
    %65 = arith.addf %64, %15 : vector<32x128xf32>
    %cst_53 = arith.constant 0.000000e+00 : f32
    %66 = vector.broadcast %cst_53 : f32 to vector<32x128xf32>
    %67 = arith.maximumf %65, %66 : vector<32x128xf32>
    %68 = vector.broadcast %2 : vector<1x128xf32> to vector<32x128xf32>
    %69 = arith.mulf %67, %68 : vector<32x128xf32>
    %70 = arith.truncf %69 : vector<32x128xf32> to vector<32x128xbf16>
    %c0_54 = arith.constant 0 : index
    %c128_55 = arith.constant 128 : index
    %71 = vector.load %arg12[%c0_54, %c128_55] : memref<32x384xbf16, #tpu.memory_space<vmem>>, vector<32x128xbf16>
    tpu.vector_store %arg12[%c0_54, %c128_55], %70 {strides = array<i32>} : memref<32x384xbf16, #tpu.memory_space<vmem>>, vector<32x128xbf16>,
    %c0_56 = arith.constant 0 : index
    %c123_57 = arith.constant 123 : index
    %72 = vector.load %arg12[%c0_56, %c123_57] : memref<32x384xbf16, #tpu.memory_space<vmem>>, vector<32x128xbf16>
    %c0_58 = arith.constant 0 : index
    %c0_59 = arith.constant 0 : index
    %c0_60 = arith.constant 0 : index
    %73 = vector.load %arg7[%c0_58, %c0_59, %c0_60] : memref<9x32x32xbf16, #tpu.memory_space<vmem>>, vector<1x32x32xbf16>
    %74 = vector.shape_cast %73 : vector<1x32x32xbf16> to vector<32x32xbf16>
    %cst_61 = arith.constant dense<0.000000e+00> : vector<32x128xf32>
    %75 = tpu.matmul %74, %72, %cst_61 {dimension_numbers = #tpu.dot_dimension_numbers<[1], [0], [0], [1], [0, 0, 1, 1], [], []>} : vector<32x32xbf16>, vector<32x128xbf16>, vector<32x128xf32> -> vector<32x128xf32>
    %c0_62 = arith.constant 0 : index
    %c124_63 = arith.constant 124 : index
    %76 = vector.load %arg12[%c0_62, %c124_63] : memref<32x384xbf16, #tpu.memory_space<vmem>>, vector<32x128xbf16>
    %c1_64 = arith.constant 1 : index
    %c0_65 = arith.constant 0 : index
    %c0_66 = arith.constant 0 : index
    %77 = vector.load %arg7[%c1_64, %c0_65, %c0_66] : memref<9x32x32xbf16, #tpu.memory_space<vmem>>, vector<1x32x32xbf16>
    %78 = vector.shape_cast %77 : vector<1x32x32xbf16> to vector<32x32xbf16>
    %cst_67 = arith.constant dense<0.000000e+00> : vector<32x128xf32>
    %79 = tpu.matmul %78, %76, %cst_67 {dimension_numbers = #tpu.dot_dimension_numbers<[1], [0], [0], [1], [0, 0, 1, 1], [], []>} : vector<32x32xbf16>, vector<32x128xbf16>, vector<32x128xf32> -> vector<32x128xf32>
    %80 = arith.addf %75, %79 : vector<32x128xf32>
    %c0_68 = arith.constant 0 : index
    %c125_69 = arith.constant 125 : index
    %81 = vector.load %arg12[%c0_68, %c125_69] : memref<32x384xbf16, #tpu.memory_space<vmem>>, vector<32x128xbf16>
    %c2_70 = arith.constant 2 : index
    %c0_71 = arith.constant 0 : index
    %c0_72 = arith.constant 0 : index
    %82 = vector.load %arg7[%c2_70, %c0_71, %c0_72] : memref<9x32x32xbf16, #tpu.memory_space<vmem>>, vector<1x32x32xbf16>
    %83 = vector.shape_cast %82 : vector<1x32x32xbf16> to vector<32x32xbf16>
    %cst_73 = arith.constant dense<0.000000e+00> : vector<32x128xf32>
    %84 = tpu.matmul %83, %81, %cst_73 {dimension_numbers = #tpu.dot_dimension_numbers<[1], [0], [0], [1], [0, 0, 1, 1], [], []>} : vector<32x32xbf16>, vector<32x128xbf16>, vector<32x128xf32> -> vector<32x128xf32>
    %85 = arith.addf %80, %84 : vector<32x128xf32>
    %c0_74 = arith.constant 0 : index
    %c127_75 = arith.constant 127 : index
    %86 = vector.load %arg12[%c0_74, %c127_75] : memref<32x384xbf16, #tpu.memory_space<vmem>>, vector<32x128xbf16>
    %c3_76 = arith.constant 3 : index
    %c0_77 = arith.constant 0 : index
    %c0_78 = arith.constant 0 : index
    %87 = vector.load %arg7[%c3_76, %c0_77, %c0_78] : memref<9x32x32xbf16, #tpu.memory_space<vmem>>, vector<1x32x32xbf16>
    %88 = vector.shape_cast %87 : vector<1x32x32xbf16> to vector<32x32xbf16>
    %cst_79 = arith.constant dense<0.000000e+00> : vector<32x128xf32>
    %89 = tpu.matmul %88, %86, %cst_79 {dimension_numbers = #tpu.dot_dimension_numbers<[1], [0], [0], [1], [0, 0, 1, 1], [], []>} : vector<32x32xbf16>, vector<32x128xbf16>, vector<32x128xf32> -> vector<32x128xf32>
    %90 = arith.addf %85, %89 : vector<32x128xf32>
    %c0_80 = arith.constant 0 : index
    %c128_81 = arith.constant 128 : index
    %91 = vector.load %arg12[%c0_80, %c128_81] : memref<32x384xbf16, #tpu.memory_space<vmem>>, vector<32x128xbf16>
    %c4_82 = arith.constant 4 : index
    %c0_83 = arith.constant 0 : index
    %c0_84 = arith.constant 0 : index
    %92 = vector.load %arg7[%c4_82, %c0_83, %c0_84] : memref<9x32x32xbf16, #tpu.memory_space<vmem>>, vector<1x32x32xbf16>
    %93 = vector.shape_cast %92 : vector<1x32x32xbf16> to vector<32x32xbf16>
    %cst_85 = arith.constant dense<0.000000e+00> : vector<32x128xf32>
    %94 = tpu.matmul %93, %91, %cst_85 {dimension_numbers = #tpu.dot_dimension_numbers<[1], [0], [0], [1], [0, 0, 1, 1], [], []>} : vector<32x32xbf16>, vector<32x128xbf16>, vector<32x128xf32> -> vector<32x128xf32>
    %95 = arith.addf %90, %94 : vector<32x128xf32>
    %c0_86 = arith.constant 0 : index
    %c129_87 = arith.constant 129 : index
    %96 = vector.load %arg12[%c0_86, %c129_87] : memref<32x384xbf16, #tpu.memory_space<vmem>>, vector<32x128xbf16>
    %c5_88 = arith.constant 5 : index
    %c0_89 = arith.constant 0 : index
    %c0_90 = arith.constant 0 : index
    %97 = vector.load %arg7[%c5_88, %c0_89, %c0_90] : memref<9x32x32xbf16, #tpu.memory_space<vmem>>, vector<1x32x32xbf16>
    %98 = vector.shape_cast %97 : vector<1x32x32xbf16> to vector<32x32xbf16>
    %cst_91 = arith.constant dense<0.000000e+00> : vector<32x128xf32>
    %99 = tpu.matmul %98, %96, %cst_91 {dimension_numbers = #tpu.dot_dimension_numbers<[1], [0], [0], [1], [0, 0, 1, 1], [], []>} : vector<32x32xbf16>, vector<32x128xbf16>, vector<32x128xf32> -> vector<32x128xf32>
    %100 = arith.addf %95, %99 : vector<32x128xf32>
    %c0_92 = arith.constant 0 : index
    %c131_93 = arith.constant 131 : index
    %101 = vector.load %arg12[%c0_92, %c131_93] : memref<32x384xbf16, #tpu.memory_space<vmem>>, vector<32x128xbf16>
    %c6_94 = arith.constant 6 : index
    %c0_95 = arith.constant 0 : index
    %c0_96 = arith.constant 0 : index
    %102 = vector.load %arg7[%c6_94, %c0_95, %c0_96] : memref<9x32x32xbf16, #tpu.memory_space<vmem>>, vector<1x32x32xbf16>
    %103 = vector.shape_cast %102 : vector<1x32x32xbf16> to vector<32x32xbf16>
    %cst_97 = arith.constant dense<0.000000e+00> : vector<32x128xf32>
    %104 = tpu.matmul %103, %101, %cst_97 {dimension_numbers = #tpu.dot_dimension_numbers<[1], [0], [0], [1], [0, 0, 1, 1], [], []>} : vector<32x32xbf16>, vector<32x128xbf16>, vector<32x128xf32> -> vector<32x128xf32>
    %105 = arith.addf %100, %104 : vector<32x128xf32>
    %c0_98 = arith.constant 0 : index
    %c132_99 = arith.constant 132 : index
    %106 = vector.load %arg12[%c0_98, %c132_99] : memref<32x384xbf16, #tpu.memory_space<vmem>>, vector<32x128xbf16>
    %c7_100 = arith.constant 7 : index
    %c0_101 = arith.constant 0 : index
    %c0_102 = arith.constant 0 : index
    %107 = vector.load %arg7[%c7_100, %c0_101, %c0_102] : memref<9x32x32xbf16, #tpu.memory_space<vmem>>, vector<1x32x32xbf16>
    %108 = vector.shape_cast %107 : vector<1x32x32xbf16> to vector<32x32xbf16>
    %cst_103 = arith.constant dense<0.000000e+00> : vector<32x128xf32>
    %109 = tpu.matmul %108, %106, %cst_103 {dimension_numbers = #tpu.dot_dimension_numbers<[1], [0], [0], [1], [0, 0, 1, 1], [], []>} : vector<32x32xbf16>, vector<32x128xbf16>, vector<32x128xf32> -> vector<32x128xf32>
    %110 = arith.addf %105, %109 : vector<32x128xf32>
    %c0_104 = arith.constant 0 : index
    %c133_105 = arith.constant 133 : index
    %111 = vector.load %arg12[%c0_104, %c133_105] : memref<32x384xbf16, #tpu.memory_space<vmem>>, vector<32x128xbf16>
    %c8_106 = arith.constant 8 : index
    %c0_107 = arith.constant 0 : index
    %c0_108 = arith.constant 0 : index
    %112 = vector.load %arg7[%c8_106, %c0_107, %c0_108] : memref<9x32x32xbf16, #tpu.memory_space<vmem>>, vector<1x32x32xbf16>
    %113 = vector.shape_cast %112 : vector<1x32x32xbf16> to vector<32x32xbf16>
    %cst_109 = arith.constant dense<0.000000e+00> : vector<32x128xf32>
    %114 = tpu.matmul %113, %111, %cst_109 {dimension_numbers = #tpu.dot_dimension_numbers<[1], [0], [0], [1], [0, 0, 1, 1], [], []>} : vector<32x32xbf16>, vector<32x128xbf16>, vector<32x128xf32> -> vector<32x128xf32>
    %115 = arith.addf %110, %114 : vector<32x128xf32>
    %c0_110 = arith.constant 0 : index
    %c0_111 = arith.constant 0 : index
    %116 = vector.load %arg8[%c0_110, %c0_111] : memref<32x1xf32, #tpu.memory_space<vmem>>, vector<32x1xf32>
    %117 = vector.broadcast %116 : vector<32x1xf32> to vector<32x128xf32>
    %118 = arith.addf %115, %117 : vector<32x128xf32>
    %cst_112 = arith.constant 0.000000e+00 : f32
    %119 = vector.broadcast %cst_112 : f32 to vector<32x128xf32>
    %120 = arith.maximumf %118, %119 : vector<32x128xf32>
    %121 = vector.broadcast %2 : vector<1x128xf32> to vector<32x128xf32>
    %122 = arith.mulf %120, %121 : vector<32x128xf32>
    %123 = arith.truncf %122 : vector<32x128xf32> to vector<32x128xbf16>
    %c0_113 = arith.constant 0 : index
    %c128_114 = arith.constant 128 : index
    %124 = vector.load %arg12[%c0_113, %c128_114] : memref<32x384xbf16, #tpu.memory_space<vmem>>, vector<32x128xbf16>
    tpu.vector_store %arg12[%c0_113, %c128_114], %123 {strides = array<i32>} : memref<32x384xbf16, #tpu.memory_space<vmem>>, vector<32x128xbf16>,
    %c0_115 = arith.constant 0 : index
    %c123_116 = arith.constant 123 : index
    %125 = vector.load %arg12[%c0_115, %c123_116] : memref<32x384xbf16, #tpu.memory_space<vmem>>, vector<32x128xbf16>
    %c0_117 = arith.constant 0 : index
    %c0_118 = arith.constant 0 : index
    %c0_119 = arith.constant 0 : index
    %126 = vector.load %arg9[%c0_117, %c0_118, %c0_119] : memref<9x32x32xbf16, #tpu.memory_space<vmem>>, vector<1x32x32xbf16>
    %127 = vector.shape_cast %126 : vector<1x32x32xbf16> to vector<32x32xbf16>
    %cst_120 = arith.constant dense<0.000000e+00> : vector<32x128xf32>
    %128 = tpu.matmul %127, %125, %cst_120 {dimension_numbers = #tpu.dot_dimension_numbers<[1], [0], [0], [1], [0, 0, 1, 1], [], []>} : vector<32x32xbf16>, vector<32x128xbf16>, vector<32x128xf32> -> vector<32x128xf32>
    %c0_121 = arith.constant 0 : index
    %c124_122 = arith.constant 124 : index
    %129 = vector.load %arg12[%c0_121, %c124_122] : memref<32x384xbf16, #tpu.memory_space<vmem>>, vector<32x128xbf16>
    %c1_123 = arith.constant 1 : index
    %c0_124 = arith.constant 0 : index
    %c0_125 = arith.constant 0 : index
    %130 = vector.load %arg9[%c1_123, %c0_124, %c0_125] : memref<9x32x32xbf16, #tpu.memory_space<vmem>>, vector<1x32x32xbf16>
    %131 = vector.shape_cast %130 : vector<1x32x32xbf16> to vector<32x32xbf16>
    %cst_126 = arith.constant dense<0.000000e+00> : vector<32x128xf32>
    %132 = tpu.matmul %131, %129, %cst_126 {dimension_numbers = #tpu.dot_dimension_numbers<[1], [0], [0], [1], [0, 0, 1, 1], [], []>} : vector<32x32xbf16>, vector<32x128xbf16>, vector<32x128xf32> -> vector<32x128xf32>
    %133 = arith.addf %128, %132 : vector<32x128xf32>
    %c0_127 = arith.constant 0 : index
    %c125_128 = arith.constant 125 : index
    %134 = vector.load %arg12[%c0_127, %c125_128] : memref<32x384xbf16, #tpu.memory_space<vmem>>, vector<32x128xbf16>
    %c2_129 = arith.constant 2 : index
    %c0_130 = arith.constant 0 : index
    %c0_131 = arith.constant 0 : index
    %135 = vector.load %arg9[%c2_129, %c0_130, %c0_131] : memref<9x32x32xbf16, #tpu.memory_space<vmem>>, vector<1x32x32xbf16>
    %136 = vector.shape_cast %135 : vector<1x32x32xbf16> to vector<32x32xbf16>
    %cst_132 = arith.constant dense<0.000000e+00> : vector<32x128xf32>
    %137 = tpu.matmul %136, %134, %cst_132 {dimension_numbers = #tpu.dot_dimension_numbers<[1], [0], [0], [1], [0, 0, 1, 1], [], []>} : vector<32x32xbf16>, vector<32x128xbf16>, vector<32x128xf32> -> vector<32x128xf32>
    %138 = arith.addf %133, %137 : vector<32x128xf32>
    %c0_133 = arith.constant 0 : index
    %c127_134 = arith.constant 127 : index
    %139 = vector.load %arg12[%c0_133, %c127_134] : memref<32x384xbf16, #tpu.memory_space<vmem>>, vector<32x128xbf16>
    %c3_135 = arith.constant 3 : index
    %c0_136 = arith.constant 0 : index
    %c0_137 = arith.constant 0 : index
    %140 = vector.load %arg9[%c3_135, %c0_136, %c0_137] : memref<9x32x32xbf16, #tpu.memory_space<vmem>>, vector<1x32x32xbf16>
    %141 = vector.shape_cast %140 : vector<1x32x32xbf16> to vector<32x32xbf16>
    %cst_138 = arith.constant dense<0.000000e+00> : vector<32x128xf32>
    %142 = tpu.matmul %141, %139, %cst_138 {dimension_numbers = #tpu.dot_dimension_numbers<[1], [0], [0], [1], [0, 0, 1, 1], [], []>} : vector<32x32xbf16>, vector<32x128xbf16>, vector<32x128xf32> -> vector<32x128xf32>
    %143 = arith.addf %138, %142 : vector<32x128xf32>
    %c0_139 = arith.constant 0 : index
    %c128_140 = arith.constant 128 : index
    %144 = vector.load %arg12[%c0_139, %c128_140] : memref<32x384xbf16, #tpu.memory_space<vmem>>, vector<32x128xbf16>
    %c4_141 = arith.constant 4 : index
    %c0_142 = arith.constant 0 : index
    %c0_143 = arith.constant 0 : index
    %145 = vector.load %arg9[%c4_141, %c0_142, %c0_143] : memref<9x32x32xbf16, #tpu.memory_space<vmem>>, vector<1x32x32xbf16>
    %146 = vector.shape_cast %145 : vector<1x32x32xbf16> to vector<32x32xbf16>
    %cst_144 = arith.constant dense<0.000000e+00> : vector<32x128xf32>
    %147 = tpu.matmul %146, %144, %cst_144 {dimension_numbers = #tpu.dot_dimension_numbers<[1], [0], [0], [1], [0, 0, 1, 1], [], []>} : vector<32x32xbf16>, vector<32x128xbf16>, vector<32x128xf32> -> vector<32x128xf32>
    %148 = arith.addf %143, %147 : vector<32x128xf32>
    %c0_145 = arith.constant 0 : index
    %c129_146 = arith.constant 129 : index
    %149 = vector.load %arg12[%c0_145, %c129_146] : memref<32x384xbf16, #tpu.memory_space<vmem>>, vector<32x128xbf16>
    %c5_147 = arith.constant 5 : index
    %c0_148 = arith.constant 0 : index
    %c0_149 = arith.constant 0 : index
    %150 = vector.load %arg9[%c5_147, %c0_148, %c0_149] : memref<9x32x32xbf16, #tpu.memory_space<vmem>>, vector<1x32x32xbf16>
    %151 = vector.shape_cast %150 : vector<1x32x32xbf16> to vector<32x32xbf16>
    %cst_150 = arith.constant dense<0.000000e+00> : vector<32x128xf32>
    %152 = tpu.matmul %151, %149, %cst_150 {dimension_numbers = #tpu.dot_dimension_numbers<[1], [0], [0], [1], [0, 0, 1, 1], [], []>} : vector<32x32xbf16>, vector<32x128xbf16>, vector<32x128xf32> -> vector<32x128xf32>
    %153 = arith.addf %148, %152 : vector<32x128xf32>
    %c0_151 = arith.constant 0 : index
    %c131_152 = arith.constant 131 : index
    %154 = vector.load %arg12[%c0_151, %c131_152] : memref<32x384xbf16, #tpu.memory_space<vmem>>, vector<32x128xbf16>
    %c6_153 = arith.constant 6 : index
    %c0_154 = arith.constant 0 : index
    %c0_155 = arith.constant 0 : index
    %155 = vector.load %arg9[%c6_153, %c0_154, %c0_155] : memref<9x32x32xbf16, #tpu.memory_space<vmem>>, vector<1x32x32xbf16>
    %156 = vector.shape_cast %155 : vector<1x32x32xbf16> to vector<32x32xbf16>
    %cst_156 = arith.constant dense<0.000000e+00> : vector<32x128xf32>
    %157 = tpu.matmul %156, %154, %cst_156 {dimension_numbers = #tpu.dot_dimension_numbers<[1], [0], [0], [1], [0, 0, 1, 1], [], []>} : vector<32x32xbf16>, vector<32x128xbf16>, vector<32x128xf32> -> vector<32x128xf32>
    %158 = arith.addf %153, %157 : vector<32x128xf32>
    %c0_157 = arith.constant 0 : index
    %c132_158 = arith.constant 132 : index
    %159 = vector.load %arg12[%c0_157, %c132_158] : memref<32x384xbf16, #tpu.memory_space<vmem>>, vector<32x128xbf16>
    %c7_159 = arith.constant 7 : index
    %c0_160 = arith.constant 0 : index
    %c0_161 = arith.constant 0 : index
    %160 = vector.load %arg9[%c7_159, %c0_160, %c0_161] : memref<9x32x32xbf16, #tpu.memory_space<vmem>>, vector<1x32x32xbf16>
    %161 = vector.shape_cast %160 : vector<1x32x32xbf16> to vector<32x32xbf16>
    %cst_162 = arith.constant dense<0.000000e+00> : vector<32x128xf32>
    %162 = tpu.matmul %161, %159, %cst_162 {dimension_numbers = #tpu.dot_dimension_numbers<[1], [0], [0], [1], [0, 0, 1, 1], [], []>} : vector<32x32xbf16>, vector<32x128xbf16>, vector<32x128xf32> -> vector<32x128xf32>
    %163 = arith.addf %158, %162 : vector<32x128xf32>
    %c0_163 = arith.constant 0 : index
    %c133_164 = arith.constant 133 : index
    %164 = vector.load %arg12[%c0_163, %c133_164] : memref<32x384xbf16, #tpu.memory_space<vmem>>, vector<32x128xbf16>
    %c8_165 = arith.constant 8 : index
    %c0_166 = arith.constant 0 : index
    %c0_167 = arith.constant 0 : index
    %165 = vector.load %arg9[%c8_165, %c0_166, %c0_167] : memref<9x32x32xbf16, #tpu.memory_space<vmem>>, vector<1x32x32xbf16>
    %166 = vector.shape_cast %165 : vector<1x32x32xbf16> to vector<32x32xbf16>
    %cst_168 = arith.constant dense<0.000000e+00> : vector<32x128xf32>
    %167 = tpu.matmul %166, %164, %cst_168 {dimension_numbers = #tpu.dot_dimension_numbers<[1], [0], [0], [1], [0, 0, 1, 1], [], []>} : vector<32x32xbf16>, vector<32x128xbf16>, vector<32x128xf32> -> vector<32x128xf32>
    %168 = arith.addf %163, %167 : vector<32x128xf32>
    %c0_169 = arith.constant 0 : index
    %c0_170 = arith.constant 0 : index
    %169 = vector.load %arg10[%c0_169, %c0_170] : memref<32x1xf32, #tpu.memory_space<vmem>>, vector<32x1xf32>
    %170 = vector.broadcast %169 : vector<32x1xf32> to vector<32x128xf32>
    %171 = arith.addf %168, %170 : vector<32x128xf32>
    %172 = arith.addf %171, %69 : vector<32x128xf32>
    %cst_171 = arith.constant 0.000000e+00 : f32
    %173 = vector.broadcast %cst_171 : f32 to vector<32x128xf32>
    %174 = arith.maximumf %172, %173 : vector<32x128xf32>
    %175 = vector.broadcast %2 : vector<1x128xf32> to vector<32x128xf32>
    %176 = arith.mulf %174, %175 : vector<32x128xf32>
    %c0_172 = arith.constant 0 : index
    %c0_173 = arith.constant 0 : index
    %177 = vector.load %arg11[%c0_172, %c0_173] : memref<32x128xf32, #tpu.memory_space<vmem>>, vector<32x128xf32>
    tpu.vector_store %arg11[%c0_172, %c0_173], %176 {strides = array<i32>} : memref<32x128xf32, #tpu.memory_space<vmem>>, vector<32x128xf32>,
    return
  }
}

</mosaic_0001>

<bundles_post_ra>
// kernel: feature_extractor.4
= control target key start
LH: loop header
LB: loop body
LE: loop exit
PB: predicated region body
PF: predicated region fallthrough
CT: control target
= control target key end

     0   :  { %v492_v1 = vmov 0   ;;  %vm268_vm0 = vcmask 261120   ;;  %s645_s2 = inlined_call_operand.vmem [shape: bf16[160,512], index: 2, kind: input, shape index: {}]   ;;  %s646_s0 = inlined_call_operand.vmem [shape: bf16[8,160], index: 0, kind: input, shape index: {}]   ;;  %s647_s1 = inlined_call_operand.vmem [shape: f32[8,1], index: 1, kind: input, shape index: {}]   ;;  %s648_s3 = inlined_call_operand.vmem [shape: bf16[8,512], index: 3, kind: output, shape index: {}]  }
   0x1   :  { %v430_v0 = vld [vmem:[%s645_s2 + $0x4] ss:$16 sps:$4 sm:$0xff]   ;;  %429 = vset.pattern.permute.xlu0 %v492_v1  ;;  %v432_v2 = vld [vmem:[%s645_s2 + $0xc] ss:$16 sps:$4 sm:$0xff]   ;;  %v434_v3 = vld [vmem:[%s645_s2] ss:$16 sps:$4 sm:$0xff]  }
   0x2   :  { %272 = vmatprep.subr.bf16.mxu0 %v430_v0  ;;  %v435_v4 = vld [vmem:[%s645_s2 + $0x8] ss:$16 sps:$4 sm:$0xff]   ;;  %313 = vmatprep.subr.bf16.mxu1 %v432_v2  ;;  %v436_v5 = vld [vmem:[%s645_s2 + $0x24] ss:$16 sps:$4 sm:$0xff]   ;;  %v438_v6 = vld [vmem:[%s645_s2 + $0x2c] ss:$16 sps:$4 sm:$0xff]  }
   0x3   :  { %273 = vmatpush1.bf16.msra.mxu0 %v434_v3  ;;  %314 = vmatpush1.bf16.msra.mxu1 %v435_v4  ;;  %v440_v7 = vld [vmem:[%s645_s2 + $0x20] ss:$16 sps:$4 sm:$0xff]   ;;  %v441_v8 = vld [vmem:[%s645_s2 + $0x28] ss:$16 sps:$4 sm:$0xff]   ;;  %v442_v9 = vld [vmem:[%s645_s2 + $0x44] ss:$16 sps:$4 sm:$0xff]  }
   0x4   :  { %274 = vmatprep.subr.bf16.mxu0 %v436_v5  ;;  %315 = vmatprep.subr.bf16.mxu1 %v438_v6  ;;  %v444_v10 = vld [vmem:[%s645_s2 + $0x4c] ss:$16 sps:$4 sm:$0xff]   ;;  %v446_v11 = vld [vmem:[%s645_s2 + $0x40] ss:$16 sps:$4 sm:$0xff]   ;;  %v447_v12 = vld [vmem:[%s645_s2 + $0x48] ss:$16 sps:$4 sm:$0xff]  }
   0x5   :  { %v448_v13 = vld [vmem:[%s645_s2 + $0x64] ss:$16 sps:$4 sm:$0xff]   ;;  %v450_v14 = vld [vmem:[%s645_s2 + $0x6c] ss:$16 sps:$4 sm:$0xff]   ;;  %v452_v15 = vld [vmem:[%s645_s2 + $0x60] ss:$16 sps:$4 sm:$0xff]  }
   0x6   :  { %v453_v16 = vld [vmem:[%s645_s2 + $0x68] ss:$16 sps:$4 sm:$0xff]   ;;  %v454_v17 = vld [vmem:[%s645_s2 + $0x84] ss:$16 sps:$4 sm:$0xff]   ;;  %v456_v18 = vld [vmem:[%s645_s2 + $0x8c] ss:$16 sps:$4 sm:$0xff]  }
   0x7   :  { %275 = vmatpush1.bf16.msra.mxu0 %v440_v7  ;;  %316 = vmatpush1.bf16.msra.mxu1 %v441_v8  ;;  %v458_v19 = vld [vmem:[%s645_s2 + $0x80] ss:$16 sps:$4 sm:$0xff]   ;;  %v459_v20 = vld [vmem:[%s645_s2 + $0x88] ss:$16 sps:$4 sm:$0xff]   ;;  %v460_v21 = vld [vmem:[%s645_s2 + $0xa4] ss:$16 sps:$4 sm:$0xff]  }
   0x8   :  { %276 = vmatprep.subr.bf16.mxu0 %v442_v9  ;;  %317 = vmatprep.subr.bf16.mxu1 %v444_v10  ;;  %v462_v22 = vld [vmem:[%s645_s2 + $0xac] ss:$16 sps:$4 sm:$0xff]   ;;  %v464_v23 = vld [vmem:[%s645_s2 + $0xa0] ss:$16 sps:$4 sm:$0xff]   ;;  %v465_v24 = vld [vmem:[%s645_s2 + $0xa8] ss:$16 sps:$4 sm:$0xff]  }
   0x9   :  { %v466_v25 = vld [vmem:[%s645_s2 + $0xc4] ss:$16 sps:$4 sm:$0xff]   ;;  %v468_v26 = vld [vmem:[%s645_s2 + $0xcc] ss:$16 sps:$4 sm:$0xff]   ;;  %v470_v27 = vld [vmem:[%s645_s2 + $0xc0] ss:$16 sps:$4 sm:$0xff]  }
   0xa   :  { %v471_v28 = vld [vmem:[%s645_s2 + $0xc8] ss:$16 sps:$4 sm:$0xff]   ;;  %v472_v29 = vld [vmem:[%s645_s2 + $0xe4] ss:$16 sps:$4 sm:$0xff]   ;;  %v474_v30 = vld [vmem:[%s645_s2 + $0xec] ss:$16 sps:$4 sm:$0xff]  }
   0xb   :  { %277 = vmatpush1.bf16.msra.mxu0 %v446_v11  ;;  %318 = vmatpush1.bf16.msra.mxu1 %v447_v12  ;;  %v15_v31 = vld [vmem:[%s646_s0] sm:$0xff]  ;;  %v477_v34 = vld [vmem:[%s645_s2 + $0xe8] ss:$16 sps:$4 sm:$0xff]   ;;  %v480_v37 = vld [vmem:[%s645_s2 + $0x10c] ss:$16 sps:$4 sm:$0xff]  }
   0xc   :  { %278 = vmatprep.subr.bf16.mxu0 %v448_v13  ;;  %319 = vmatprep.subr.bf16.mxu1 %v450_v14  ;;  %v381_v32 = vcombine.high %v15_v31, %v15_v31  ;;  %v476_v33 = vld [vmem:[%s645_s2 + $0xe0] ss:$16 sps:$4 sm:$0xff]   ;;  %v478_v36 = vld [vmem:[%s645_s2 + $0x104] ss:$16 sps:$4 sm:$0xff]   ;;  %v483_v39 = vld [vmem:[%s645_s2 + $0x108] ss:$16 sps:$4 sm:$0xff]   ;;  %v380_v44 = vcombine.low %v15_v31, %v15_v31 }
   0xd   :  { %v56_v35 = vld [vmem:[%s647_s1] sm:$0xff]  ;;  %v486_v41 = vld [vmem:[%s645_s2 + $0x12c] ss:$16 sps:$4 sm:$0xff]   ;;  %v489_v43 = vld [vmem:[%s645_s2 + $0x128] ss:$16 sps:$4 sm:$0xff]  }
   0xe   :  { %422 = vmatprep.mubr.msk.bf16.mxu0 %vm268_vm0, %v381_v32  ;;  %423 = vmatprep.mubr.msk.bf16.mxu1 %vm268_vm0, %v381_v32  ;;  %v482_v38 = vld [vmem:[%s645_s2 + $0x100] ss:$16 sps:$4 sm:$0xff]   ;;  %v484_v40 = vld [vmem:[%s645_s2 + $0x124] ss:$16 sps:$4 sm:$0xff]  }
   0xf   :  { %279 = vmatpush1.bf16.msra.mxu0 %v452_v15  ;;  %320 = vmatpush1.bf16.msra.mxu1 %v453_v16  ;;  %v488_v42 = vld [vmem:[%s645_s2 + $0x120] ss:$16 sps:$4 sm:$0xff]  }
  0x10   :  { %280 = vmatprep.subr.bf16.mxu0 %v454_v17  ;;  %321 = vmatprep.subr.bf16.mxu1 %v456_v18 }
  0x11   :  { %59 = vperm.xlu0 %429, %v56_v35  }
  0x13   :  { %281 = vmatpush1.bf16.msra.mxu0 %v458_v19  ;;  %322 = vmatpush1.bf16.msra.mxu1 %v459_v20 }
  0x14   :  { %282 = vmatprep.subr.bf16.mxu0 %v460_v21  ;;  %323 = vmatprep.subr.bf16.mxu1 %v462_v22 }
  0x17   :  { %283 = vmatpush1.bf16.msra.mxu0 %v464_v23  ;;  %324 = vmatpush1.bf16.msra.mxu1 %v465_v24 }
  0x18   :  { %284 = vmatprep.subr.bf16.mxu0 %v466_v25  ;;  %325 = vmatprep.subr.bf16.mxu1 %v468_v26 }
  0x1b   :  { %285 = vmatpush1.bf16.msra.mxu0 %v470_v27  ;;  %326 = vmatpush1.bf16.msra.mxu1 %v471_v28 }
  0x1c   :  { %286 = vmatprep.subr.bf16.mxu0 %v472_v29  ;;  %327 = vmatprep.subr.bf16.mxu1 %v474_v30 }
  0x1f   :  { %287 = vmatpush1.bf16.msra.mxu0 %v476_v33  ;;  %328 = vmatpush1.bf16.msra.mxu1 %v477_v34 }
  0x20   :  { %288 = vmatprep.subr.bf16.mxu0 %v478_v36  ;;  %329 = vmatprep.subr.bf16.mxu1 %v480_v37 }
  0x23   :  { %289 = vmatpush1.bf16.msra.mxu0 %v482_v38  ;;  %330 = vmatpush1.bf16.msra.mxu1 %v483_v39 }
  0x24   :  { %290 = vmatprep.subr.bf16.mxu0 %v484_v40  ;;  %331 = vmatprep.subr.bf16.mxu1 %v486_v41 }
  0x27   :  { %291 = vmatpush1.bf16.msra.mxu0 %v488_v42  ;;  %332 = vmatpush1.bf16.msra.mxu1 %v489_v43 }
  0x2a   :  { %305 = vmatmul.mubr.bf16.vlgmr.msra.gmra.mrb[0].mxu0 %v380_v44  ;;  %346 = vmatmul.mubr.bf16.vlgmr.msra.gmra.mrb[0].mxu1 %v380_v44 }
  0x90   :  { %v60_v45 = vpop.permute.xlu0 %59 }
  0xfd   :  { %v306_v46 = vpop.f32.mrb[0].mxu0  ;;  %v347_v47 = vpop.f32.mrb[0].mxu1 }
  0xfe   :  { %v307_v48 = vadd.f32 %v306_v46, %v60_v45  ;;  %v348_v49 = vadd.f32 %v347_v47, %v60_v45  ;;  %v308_v50 = vpop.f32.mrb[1].mxu0  ;;  %v349_v51 = vpop.f32.mrb[1].mxu1 }
  0xff   :  { %v309_v52 = vadd.f32 %v308_v50, %v60_v45  ;;  %v350_v53 = vadd.f32 %v349_v51, %v60_v45  ;;  %v310_v54 = vpop.f32.mrb[2].mxu0  ;;  %v351_v55 = vpop.f32.mrb[2].mxu1 }
 0x100   :  { %v354_v56 = vmax.f32 %v307_v48, 0.0  ;;  %v356_v57 = vmax.f32 %v348_v49, 0.0  ;;  %v311_v58 = vpop.f32.mrb[3].mxu0  ;;  %v352_v59 = vpop.f32.mrb[3].mxu1 }
 0x101   :  { %v355_v60 = vmax.f32 %v309_v52, 0.0  ;;  %v357_v61 = vmax.f32 %v350_v53, 0.0 }
 0x103   :  { %v426_v62 = vpack.c.bf16 %v355_v60, %v354_v56  ;;  %v427_v63 = vpack.c.bf16 %v357_v61, %v356_v57 }
 0x105   :  { %374 = vst [vmem:[%s648_s3] sm:$0xff] %v426_v62  ;;  %375 = vst [vmem:[%s648_s3 + $0x8] sm:$0xff] %v427_v63 }

// kernel: feature_extractor.5
= control target key start
LH: loop header
LB: loop body
LE: loop exit
PB: predicated region body
PF: predicated region fallthrough
CT: control target
= control target key end

     0   :  { %v2685_v0 = vmov 0   ;;  %s2686_s29 = smov 119   ;;  %s2687_s30 = smov 127   ;;  %vm118_vm0 = vcmask 80896   ;;  %vm125_vm1 = vcmask 1043456   ;;  %vm179_vm2 = vcmask 89088   ;;  %s3273_s0 = inlined_call_operand.vmem [shape: bf16[9,8,256], index: 0, kind: input, shape index: {}]   ;;  %s3274_s3 = inlined_call_operand.vmem [shape: f32[8,1], index: 3, kind: input, shape index: {}]   ;;  %s3275_s2 = inlined_call_operand.vmem [shape: bf16[9,8,8], index: 2, kind: input, shape index: {}]   ;;  %s3276_s1 = inlined_call_operand.vmem [shape: f32[1,256], index: 1, kind: input, shape index: {}]   ;;  %s3277_s5 = inlined_call_operand.vmem [shape: f32[8,1], index: 5, kind: input, shape index: {}]   ;;  %s3278_s4 = inlined_call_operand.vmem [shape: bf16[9,8,8], index: 4, kind: input, shape index: {}]   ;;  %s3279_s7 = inlined_call_operand.vmem [shape: f32[8,1], index: 7, kind: input, shape index: {}]   ;;  %s3280_s6 = inlined_call_operand.vmem [shape: bf16[9,8,8], index: 6, kind: input, shape index: {}]   ;;  %s3281_s9 = inlined_call_operand.vmem [shape: f32[8,1], index: 9, kind: input, shape index: {}]   ;;  %s3282_s8 = inlined_call_operand.vmem [shape: bf16[9,8,8], index: 8, kind: input, shape index: {}]   ;;  %s3283_s10 = inlined_call_operand.vmem [shape: bf16[8,256], index: 10, kind: output, shape index: {}]  }
   0x1   :  { %37 = vst [vmem:[#allocation2 + $0x8] sm:$0xff] %v2685_v0  ;;  %36 = vst [vmem:[#allocation2] sm:$0xff] %v2685_v0  ;;  %v38_v1 = vld [vmem:[%s3273_s0] sm:$0xff]  ;;  %v2496_v2 = vld [vmem:[%s3273_s0 + $0x8] sm:$0xff]  ;;  %164 = vmatprep.mubr.bf16.mxu0 %v2685_v0  ;;  %223 = vmatprep.mubr.bf16.mxu1 %v2685_v0  ;;  %s2689_s13 = smov 11   ;;  %s2690_s14 = smov 9  }
   0x2   :  { %v2497_v3 = vld [vmem:[%s3273_s0 + $0x10] sm:$0xff]  ;;  %v39_v4 = vunpack.c.l.bf16 %v38_v1  ;;  %v40_v5 = vunpack.c.h.bf16 %v38_v1  ;;  %v43_v6 = vunpack.c.l.bf16 %v2496_v2  ;;  %v44_v7 = vunpack.c.h.bf16 %v2496_v2  ;;  %v2498_v8 = vld [vmem:[%s3273_s0 + $0x18] sm:$0xff]  ;;  %2659 = vset.pattern.permute.xlu0 %v2685_v0  ;;  %2660 = vset.pattern.permute.xlu1 %v2685_v0  ;;  %v2499_v11 = vld [vmem:[%s3273_s0 + $0x20] sm:$0xff]  ;;  %s2691_s15 = smov 1   ;;  %s2692_s16 = smov 118  }
   0x3   :  { %v49_v9 = vunpack.c.l.bf16 %v2497_v3  ;;  %v50_v10 = vunpack.c.h.bf16 %v2497_v3  ;;  %v55_v14 = vunpack.c.l.bf16 %v2498_v8  ;;  %v56_v15 = vunpack.c.h.bf16 %v2498_v8  ;;  %v2500_v16 = vld [vmem:[%s3273_s0 + $0x28] sm:$0xff]  ;;  %v2501_v21 = vld [vmem:[%s3273_s0 + $0x30] sm:$0xff]  ;;  %v2502_v27 = vld [vmem:[%s3273_s0 + $0x38] sm:$0xff]  ;;  %s2693_s17 = smov 117  }
   0x4   :  { %v45_v12 = vmax.f32 %v39_v4, %v43_v6  ;;  %v46_v13 = vmax.f32 %v40_v5, %v44_v7  ;;  %v61_v19 = vunpack.c.l.bf16 %v2499_v11  ;;  %v62_v20 = vunpack.c.h.bf16 %v2499_v11  ;;  %v2503_v32 = vld [vmem:[%s3273_s0 + $0x40] sm:$0xff]  ;;  %s2688_s0 = smov 10  }
   0x5   :  { %v67_v25 = vunpack.c.l.bf16 %v2500_v16  ;;  %v68_v26 = vunpack.c.h.bf16 %v2500_v16  ;;  %v73_v30 = vunpack.c.l.bf16 %v2501_v21  ;;  %v74_v31 = vunpack.c.h.bf16 %v2501_v21  ;;  %v680_v52 = vld [vmem:[%s3274_s3] sm:$0xff]  ;;  %v2516_v21 = vld [vmem:[%s3275_s2 + $0xc] sm:$0xf] }
   0x6   :  { %v51_v17 = vmax.f32 %v45_v12, %v49_v9  ;;  %v52_v18 = vmax.f32 %v46_v13, %v50_v10  ;;  %v79_v35 = vunpack.c.l.bf16 %v2502_v27  ;;  %v80_v36 = vunpack.c.h.bf16 %v2502_v27  ;;  %v2505_v63 = vld [vmem:[%s3275_s2 + $0x4] sm:$0xf]  ;;  %v101_v6 = vld [vmem:[%s3275_s2] sm:$0xf]  ;;  %v2519_v27 = vld [vmem:[%s3275_s2 + $0x10] sm:$0xf] }
   0x7   :  { %v85_v39 = vunpack.c.l.bf16 %v2503_v32  ;;  %v86_v40 = vunpack.c.h.bf16 %v2503_v32  ;;  %vm121_vm3 = vcmask 64512   ;;  %vm240_vm4 = vcmask 72704  }
   0x8   :  { %v2661_v22 = vld [vmem:[#allocation2 + $0xc] ss:$0 sps:$4 sm:$0xff]   ;;  %v57_v23 = vmax.f32 %v51_v17, %v55_v14  ;;  %v58_v24 = vmax.f32 %v52_v18, %v56_v15  ;;  %vm303_vm5 = vcmask 7168   ;;  %v2513_v14 = vld [vmem:[%s3275_s2 + $0x8] sm:$0xf]  ;;  %vm436_vm6 = vcmask 1039360  }
   0x9   :  { %497 = vrot.lane.b32.xlu1 %v2661_v22, %s2686_s29  ;;  %434 = vrot.lane.b32.xlu0 %v2661_v22, %s2687_s30  ;;  %vm499_vm7 = vcmask 973824   ;;  %vm562_vm8 = vcmask 965632   ;;  %vm625_vm9 = vcmask 957440  }
   0xa   :  { %v63_v28 = vmax.f32 %v57_v23, %v61_v19  ;;  %v64_v29 = vmax.f32 %v58_v24, %v62_v20 }
   0xc   :  { %v69_v33 = vmax.f32 %v63_v28, %v67_v25  ;;  %v70_v34 = vmax.f32 %v64_v29, %v68_v26 }
   0xe   :  { %v75_v37 = vmax.f32 %v69_v33, %v73_v30  ;;  %v76_v38 = vmax.f32 %v70_v34, %v74_v31  ;;  %v2524_v33 = vld [vmem:[%s3275_s2 + $0x14] sm:$0xf] }
  0x10   :  { %v81_v41 = vmax.f32 %v75_v37, %v79_v35  ;;  %v82_v42 = vmax.f32 %v76_v38, %v80_v36  ;;  %v2530_v37 = vld [vmem:[%s3275_s2 + $0x18] sm:$0xf] }
  0x12   :  { %v2784_v43 = vmax.f32 %v81_v41, %v85_v39  ;;  %v2786_v44 = vmax.f32 %v82_v42, %v86_v40  ;;  %v2533_v42 = vld [vmem:[%s3275_s2 + $0x1c] sm:$0xf] }
  0x14   :  { %v2645_v45 = vpack.c.bf16 %v2786_v44, %v2784_v43  ;;  %v2677_v50 = vpack.c.bf16 %v2786_v44, %v2786_v44  ;;  %v2678_v51 = vpack.c.bf16 %v2784_v43, %v2784_v43 }
  0x16   :  { %98 = vst [vmem:[#allocation2 + $0x4] sm:$0xff] %v2645_v45  ;;  %v370_v16 = vsel %vm125_vm1, %v2678_v51, 0 }
  0x1d   :  { %v2662_v46 = vld [vmem:[#allocation2 + $0x8] ss:$0 sps:$4 sm:$0xff]   ;;  %v99_v47 = vld [vmem:[#allocation2] sm:$0xff] }
  0x1e   :  { %v2506_v48 = vcombine.low %v99_v47, %v99_v47  ;;  %116 = vrot.lane.b32.xlu1 %v2662_v46, %s2688_s0  ;;  %v2507_v49 = vcombine.high %v99_v47, %v99_v47 }
  0x20   :  { %112 = vrot.lane.b32.xlu0 %v2506_v48, %s2688_s0 }
  0x22   :  { %173 = vrot.lane.b32.xlu1 %v2506_v48, %s2689_s13 }
  0x24   :  { %114 = vrot.lane.b32.xlu0 %v2507_v49, %s2688_s0 }
  0x26   :  { %177 = vrot.lane.b32.xlu1 %v2662_v46, %s2689_s13 }
  0x28   :  { %175 = vrot.lane.b32.xlu0 %v2507_v49, %s2689_s13 }
  0x2a   :  { %236 = vrot.lane.b32.xlu1 %v2507_v49, %s2690_s14 }
  0x2c   :  { %234 = vrot.lane.b32.xlu0 %v2506_v48, %s2690_s14 }
  0x2e   :  { %297 = vrot.lane.b32.xlu1 %v2506_v48, %s2691_s15 }
  0x30   :  { %238 = vrot.lane.b32.xlu0 %v2662_v46, %s2690_s14 }
  0x32   :  { %301 = vrot.lane.b32.xlu1 %v2662_v46, %s2691_s15 }
  0x34   :  { %299 = vrot.lane.b32.xlu0 %v2507_v49, %s2691_s15  ;;  %v2536_v49 = vld [vmem:[%s3275_s2 + $0x20] sm:$0xf] }
  0x36   :  { %432 = vrot.lane.b32.xlu1 %v2677_v50, %s2687_s30 }
  0x38   :  { %430 = vrot.lane.b32.xlu0 %v2678_v51, %s2687_s30 }
  0x3a   :  { %493 = vrot.lane.b32.xlu1 %v2678_v51, %s2686_s29 }
  0x3c   :  { %495 = vrot.lane.b32.xlu0 %v2677_v50, %s2686_s29 }
  0x3e   :  { %558 = vrot.lane.b32.xlu1 %v2677_v50, %s2692_s16 }
  0x40   :  { %556 = vrot.lane.b32.xlu0 %v2678_v51, %s2692_s16 }
  0x42   :  { %619 = vrot.lane.b32.xlu1 %v2678_v51, %s2693_s17 }
  0x44   :  { %560 = vrot.lane.b32.xlu0 %v2661_v22, %s2692_s16 }
  0x46   :  { %623 = vrot.lane.b32.xlu1 %v2661_v22, %s2693_s17 }
  0x48   :  { %621 = vrot.lane.b32.xlu0 %v2677_v50, %s2693_s17 }
  0x4c   :  { %683 = vperm.xlu0 %2659, %v680_v52  }
  0x7b   :  { %v2819_v53 = vpop.permute.xlu1 %497  ;;  %v435_v54 = vpop.permute.xlu0 %434 }
  0x90   :  { %v117_v55 = vpop.permute.xlu1 %116 }
  0x92   :  { %v113_v56 = vpop.permute.xlu0 %112 }
  0x94   :  { %v174_v57 = vpop.permute.xlu1 %173 }
  0x96   :  { %v115_v58 = vpop.permute.xlu0 %114 }
  0x97   :  { %v120_v59 = vsel %vm118_vm0, %v115_v58, %v117_v55  ;;  %v119_v60 = vsel %vm118_vm0, %v113_v56, %v115_v58 }
  0x98   :  { %2509 = vmatprep.subr.msk.bf16.mxu0 %vm125_vm1, %v120_v59  ;;  %v127_v61 = vsel %vm125_vm1, %v119_v60, 0  ;;  %v178_v62 = vpop.permute.xlu1 %177 }
  0x99   :  { %133 = vmatpush1.bf16.msra.mxu0 %v127_v61 }
  0x9a   :  { %v176_v1 = vpop.permute.xlu0 %175 }
  0x9b   :  { %v181_v2 = vsel %vm179_vm2, %v176_v1, %v178_v62  ;;  %v180_v3 = vsel %vm179_vm2, %v174_v57, %v176_v1 }
  0x9c   :  { %2511 = vmatprep.subr.msk.bf16.mxu1 %vm125_vm1, %v181_v2  ;;  %2510 = vmatmul.mubr.msk.bf16.vlgmr.msra.gmra.mrb[0].mxu0 %vm121_vm3, %v2505_v63  ;;  %v186_v4 = vsel %vm125_vm1, %v180_v3, 0  ;;  %v237_v5 = vpop.permute.xlu1 %236 }
  0x9d   :  { %192 = vmatpush1.bf16.msra.mxu1 %v186_v4  ;;  %284 = vmatprep.mubr.bf16.mxu0 %v2685_v0 }
  0x9e   :  { %v235_v7 = vpop.permute.xlu0 %234 }
  0x9f   :  { %v241_v8 = vsel %vm240_vm4, %v235_v7, %v237_v5 }
  0xa0   :  { %2512 = vmatmul.mubr.msk.bf16.vlgmr.msra.gmra.mrb[0].mxu1 %vm121_vm3, %v101_v6  ;;  %v298_v9 = vpop.permute.xlu1 %297  ;;  %v247_v12 = vsel %vm125_vm1, %v241_v8, 0 }
  0xa1   :  { %347 = vmatprep.mubr.bf16.mxu1 %v2685_v0 }
  0xa2   :  { %v239_v10 = vpop.permute.xlu0 %238 }
  0xa3   :  { %v242_v11 = vsel %vm240_vm4, %v237_v5, %v239_v10 }
  0xa4   :  { %2514 = vmatprep.subr.msk.bf16.mxu0 %vm125_vm1, %v242_v11  ;;  %v302_v13 = vpop.permute.xlu1 %301 }
  0xa5   :  { %253 = vmatpush1.bf16.msra.mxu0 %v247_v12 }
  0xa6   :  { %v300_v15 = vpop.permute.xlu0 %299  ;;  %2522 = vmatprep.subr.msk.bf16.mxu0 %vm125_vm1, %v2677_v50  ;;  %v2901_v50 = vld [vmem:[#allocation2 + $0xc] ss:$0 sps:$4 sm:$0xff]  }
  0xa7   :  { %v304_v17 = vsel %vm303_vm5, %v298_v9, %v300_v15  ;;  %v305_v18 = vsel %vm303_vm5, %v300_v15, %v302_v13  ;;  %1103 = vrot.lane.b32.xlu1 %v2901_v50, %s2686_s29  ;;  %1041 = vrot.lane.b32.xlu0 %v2901_v50, %s2687_s30 }
  0xa8   :  { %v310_v19 = vsel %vm125_vm1, %v304_v17, 0  ;;  %2515 = vmatmul.mubr.msk.bf16.vlgmr.msra.gmra.mrb[4].mxu0 %vm121_vm3, %v2513_v14  ;;  %2517 = vmatprep.subr.msk.bf16.mxu1 %vm125_vm1, %v305_v18  ;;  %v433_v20 = vpop.permute.xlu1 %432 }
  0xa9   :  { %316 = vmatpush1.bf16.msra.mxu1 %v310_v19  ;;  %376 = vmatpush1.bf16.msra.mxu0 %v370_v16  ;;  %v438_v22 = vsel %vm436_vm6, %v433_v20, %v435_v54 }
  0xaa   :  { %v431_v23 = vpop.permute.xlu0 %430  ;;  %407 = vmatprep.mubr.bf16.mxu0 %v2685_v0  ;;  %2528 = vmatprep.subr.msk.bf16.mxu1 %vm125_vm1, %v438_v22  ;;  %v691_v22 = vlaneseq }
  0xab   :  { %v437_v24 = vsel %vm436_vm6, %v431_v23, %v433_v20 }
  0xac   :  { %v443_v25 = vsel %vm125_vm1, %v437_v24, 0  ;;  %2518 = vmatmul.mubr.msk.bf16.vlgmr.msra.gmra.mrb[4].mxu1 %vm121_vm3, %v2516_v21  ;;  %v494_v26 = vpop.permute.xlu1 %493 }
  0xad   :  { %449 = vmatpush1.bf16.msra.mxu1 %v443_v25  ;;  %480 = vmatprep.mubr.bf16.mxu1 %v2685_v0 }
  0xae   :  { %v496_v28 = vpop.permute.xlu0 %495 }
  0xaf   :  { %v500_v29 = vsel %vm499_vm7, %v494_v26, %v496_v28  ;;  %v501_v30 = vsel %vm499_vm7, %v496_v28, %v2819_v53 }
  0xb0   :  { %v506_v31 = vsel %vm125_vm1, %v500_v29, 0  ;;  %2523 = vmatmul.mubr.msk.bf16.vlgmr.msra.gmra.mrb[8].mxu0 %vm121_vm3, %v2519_v27  ;;  %2531 = vmatprep.subr.msk.bf16.mxu0 %vm125_vm1, %v501_v30  ;;  %v559_v32 = vpop.permute.xlu1 %558  ;;  %v692_v29 = vshrl.u32 %v691_v22, 7 }
  0xb1   :  { %512 = vmatpush1.bf16.msra.mxu0 %v506_v31  ;;  %543 = vmatprep.mubr.bf16.mxu0 %v2685_v0 }
  0xb2   :  { %v557_v34 = vpop.permute.xlu0 %556 }
  0xb3   :  { %v563_v35 = vsel %vm562_vm8, %v557_v34, %v559_v32 }
  0xb4   :  { %2529 = vmatmul.mubr.msk.bf16.vlgmr.msra.gmra.mrb[8].mxu1 %vm121_vm3, %v2524_v33  ;;  %v620_v36 = vpop.permute.xlu1 %619  ;;  %v569_v40 = vsel %vm125_vm1, %v563_v35, 0 }
  0xb5   :  { %606 = vmatprep.mubr.bf16.mxu1 %v2685_v0 }
  0xb6   :  { %v561_v38 = vpop.permute.xlu0 %560 }
  0xb7   :  { %v564_v39 = vsel %vm562_vm8, %v559_v32, %v561_v38  ;;  %v89_v38 = vld [vmem:[%s3276_s1] sm:$0x3] }
  0xb8   :  { %2532 = vmatmul.mubr.msk.bf16.vlgmr.msra.gmra.mrb[12].mxu0 %vm121_vm3, %v2530_v37  ;;  %2534 = vmatprep.subr.msk.bf16.mxu1 %vm125_vm1, %v564_v39  ;;  %v624_v41 = vpop.permute.xlu1 %623  ;;  %v697_v39 = vsub.s32 1, %v692_v29 }
  0xb9   :  { %575 = vmatpush1.bf16.msra.mxu1 %v569_v40  ;;  %669 = vmatprep.mubr.bf16.mxu0 %v2685_v0 }
  0xba   :  { %v622_v45 = vpop.permute.xlu0 %621 }
  0xbb   :  { %v626_v46 = vsel %vm625_vm9, %v620_v36, %v622_v45  ;;  %v627_v47 = vsel %vm625_vm9, %v622_v45, %v624_v41  ;;  %v693_v36 = vsub.s32 0, %v692_v29 }
  0xbc   :  { %v632_v48 = vsel %vm125_vm1, %v626_v46, 0  ;;  %2535 = vmatmul.mubr.msk.bf16.vlgmr.msra.gmra.mrb[12].mxu1 %vm121_vm3, %v2533_v42  ;;  %2537 = vmatprep.subr.msk.bf16.mxu0 %vm125_vm1, %v627_v47 }
  0xbd   :  { %638 = vmatpush1.bf16.msra.mxu0 %v632_v48  ;;  %774 = vmatprep.mubr.bf16.mxu1 %v2685_v0  ;;  %v2910_v47 = vrot.slane %v89_v38, %v693_v36 }
  0xc0   :  { %2538 = vmatmul.mubr.msk.bf16.vlgmr.msra.gmra.mrb[16].mxu0 %vm121_vm3, %v2536_v49 }
  0xc1   :  { %832 = vmatprep.mubr.bf16.mxu0 %v2685_v0 }
  0xcb   :  { %v684_v40 = vpop.permute.xlu0 %683 }
 0x16f   :  { %v166_v51 = vpop.f32.mrb[0].mxu0 }
 0x170   :  { %v168_v52 = vpop.f32.mrb[1].mxu0 }
 0x171   :  { %v170_v53 = vpop.f32.mrb[2].mxu0 }
 0x172   :  { %v171_v54 = vpop.f32.mrb[3].mxu0 }
 0x173   :  { %v225_v55 = vpop.f32.mrb[0].mxu1 }
 0x174   :  { %v226_v56 = vadd.f32 %v225_v55, %v166_v51  ;;  %v227_v57 = vpop.f32.mrb[1].mxu1  ;;  %v2912_v51 = vrot.slane %v89_v38, %v697_v39 }
 0x175   :  { %v228_v58 = vadd.f32 %v227_v57, %v168_v52  ;;  %v229_v59 = vpop.f32.mrb[2].mxu1 }
 0x176   :  { %v230_v60 = vpop.f32.mrb[3].mxu1 }
 0x17b   :  { %v286_v61 = vpop.f32.mrb[4].mxu0 }
 0x17c   :  { %v293_v62 = vadd.f32 %v286_v61, %v226_v56  ;;  %v288_v63 = vpop.f32.mrb[5].mxu0 }
 0x17d   :  { %v294_v1 = vadd.f32 %v288_v63, %v228_v58  ;;  %v290_v2 = vpop.f32.mrb[6].mxu0 }
 0x17e   :  { %v291_v3 = vpop.f32.mrb[7].mxu0  ;;  %v1042_v2 = vpop.permute.xlu0 %1041 }
 0x17f   :  { %v349_v4 = vpop.f32.mrb[4].mxu1  ;;  %v1104_v3 = vpop.permute.xlu1 %1103 }
 0x180   :  { %v356_v5 = vadd.f32 %v349_v4, %v293_v62  ;;  %v351_v6 = vpop.f32.mrb[5].mxu1 }
 0x181   :  { %v357_v7 = vadd.f32 %v351_v6, %v294_v1  ;;  %v353_v8 = vpop.f32.mrb[6].mxu1  ;;  %v1283_v1 = vld [vmem:[%s3277_s5] sm:$0xff] }
 0x182   :  { %v354_v9 = vpop.f32.mrb[7].mxu1 }
 0x183   :  { %v409_v10 = vpop.f32.mrb[8].mxu0 }
 0x184   :  { %v416_v11 = vadd.f32 %v409_v10, %v356_v5  ;;  %v411_v12 = vpop.f32.mrb[9].mxu0 }
 0x185   :  { %v417_v13 = vadd.f32 %v411_v12, %v357_v7  ;;  %v413_v14 = vpop.f32.mrb[10].mxu0 }
 0x186   :  { %v414_v15 = vpop.f32.mrb[11].mxu0 }
 0x187   :  { %v482_v16 = vpop.f32.mrb[8].mxu1 }
 0x188   :  { %v489_v17 = vadd.f32 %v482_v16, %v416_v11  ;;  %v484_v18 = vpop.f32.mrb[9].mxu1 }
 0x189   :  { %v490_v19 = vadd.f32 %v484_v18, %v417_v13  ;;  %v486_v20 = vpop.f32.mrb[10].mxu1 }
 0x18a   :  { %v487_v21 = vpop.f32.mrb[11].mxu1 }
 0x18b   :  { %v545_v23 = vpop.f32.mrb[12].mxu0 }
 0x18c   :  { %v552_v24 = vadd.f32 %v545_v23, %v489_v17  ;;  %v547_v25 = vpop.f32.mrb[13].mxu0 }
 0x18d   :  { %v553_v26 = vadd.f32 %v547_v25, %v490_v19  ;;  %v549_v27 = vpop.f32.mrb[14].mxu0  ;;  %v714_v19 = vld [vmem:[%s3278_s4] sm:$0xf]  ;;  %v2548_v25 = vld [vmem:[%s3278_s4 + $0x8] sm:$0xf] }
 0x18e   :  { %v550_v28 = vpop.f32.mrb[15].mxu0 }
 0x18f   :  { %v608_v30 = vpop.f32.mrb[12].mxu1 }
 0x190   :  { %v615_v31 = vadd.f32 %v608_v30, %v552_v24  ;;  %v610_v32 = vpop.f32.mrb[13].mxu1 }
 0x191   :  { %v616_v33 = vadd.f32 %v610_v32, %v553_v26  ;;  %v612_v34 = vpop.f32.mrb[14].mxu1 }
 0x192   :  { %v613_v35 = vpop.f32.mrb[15].mxu1  ;;  %v2551_v34 = vld [vmem:[%s3278_s4 + $0xc] sm:$0xf] }
 0x193   :  { %v671_v37 = vpop.f32.mrb[16].mxu0 }
 0x194   :  { %v678_v41 = vadd.f32 %v671_v37, %v615_v31  ;;  %v673_v42 = vpop.f32.mrb[17].mxu0  ;;  %v2554_v37 = vld [vmem:[%s3278_s4 + $0x10] sm:$0xf] }
 0x195   :  { %v679_v45 = vadd.f32 %v673_v42, %v616_v33  ;;  %v675_v46 = vpop.f32.mrb[18].mxu0 }
 0x196   :  { %v686_v48 = vadd.f32 %v684_v40, %v678_v41  ;;  %v676_v49 = vpop.f32.mrb[19].mxu0  ;;  %v2559_v46 = vld [vmem:[%s3278_s4 + $0x14] sm:$0xf] }
 0x197   :  { %v687_v52 = vadd.f32 %v684_v40, %v679_v45 }
 0x198   :  { %v688_v53 = vmax.f32 %v686_v48, 0.0 }
 0x199   :  { %v689_v54 = vmax.f32 %v687_v52, 0.0  ;;  %v2565_v52 = vld [vmem:[%s3278_s4 + $0x18] sm:$0xf] }
 0x19a   :  { %v701_v55 = vmul.f32 %v2910_v47, %v688_v53 }
 0x19b   :  { %v702_v56 = vmul.f32 %v2912_v51, %v689_v54 }
 0x19c   :  { %v2679_v62 = vpack.c.bf16 %v701_v55, %v701_v55 }
 0x19d   :  { %v2646_v57 = vpack.c.bf16 %v702_v56, %v701_v55  ;;  %v2680_v63 = vpack.c.bf16 %v702_v56, %v702_v56 }
 0x19e   :  { %v977_v27 = vsel %vm125_vm1, %v2679_v62, 0 }
 0x19f   :  { %711 = vst [vmem:[#allocation2 + $0x4] sm:$0xff] %v2646_v57 }
 0x1a6   :  { %v2666_v58 = vld [vmem:[#allocation2 + $0x8] ss:$0 sps:$4 sm:$0xff]   ;;  %v712_v59 = vld [vmem:[#allocation2] sm:$0xff] }
 0x1a7   :  { %v2541_v60 = vcombine.low %v712_v59, %v712_v59  ;;  %729 = vrot.lane.b32.xlu0 %v2666_v58, %s2688_s0  ;;  %v2542_v61 = vcombine.high %v712_v59, %v712_v59  ;;  %v2568_v59 = vld [vmem:[%s3278_s4 + $0x1c] sm:$0xf] }
 0x1a9   :  { %725 = vrot.lane.b32.xlu1 %v2541_v60, %s2688_s0 }
 0x1ab   :  { %785 = vrot.lane.b32.xlu0 %v2542_v61, %s2689_s13 }
 0x1ad   :  { %727 = vrot.lane.b32.xlu1 %v2542_v61, %s2688_s0 }
 0x1af   :  { %843 = vrot.lane.b32.xlu0 %v2541_v60, %s2690_s14 }
 0x1b1   :  { %783 = vrot.lane.b32.xlu1 %v2541_v60, %s2689_s13 }
 0x1b3   :  { %847 = vrot.lane.b32.xlu0 %v2666_v58, %s2690_s14 }
 0x1b5   :  { %787 = vrot.lane.b32.xlu1 %v2666_v58, %s2689_s13 }
 0x1b7   :  { %907 = vrot.lane.b32.xlu0 %v2542_v61, %s2691_s15 }
 0x1b9   :  { %845 = vrot.lane.b32.xlu1 %v2542_v61, %s2690_s14 }
 0x1bb   :  { %1165 = vrot.lane.b32.xlu0 %v2901_v50, %s2692_s16 }
 0x1bd   :  { %905 = vrot.lane.b32.xlu1 %v2541_v60, %s2691_s15 }
 0x1bf   :  { %1037 = vrot.lane.b32.xlu0 %v2679_v62, %s2687_s30 }
 0x1c1   :  { %909 = vrot.lane.b32.xlu1 %v2666_v58, %s2691_s15 }
 0x1c3   :  { %1101 = vrot.lane.b32.xlu0 %v2680_v63, %s2686_s29 }
 0x1c5   :  { %1039 = vrot.lane.b32.xlu1 %v2680_v63, %s2687_s30 }
 0x1c7   :  { %1161 = vrot.lane.b32.xlu0 %v2679_v62, %s2692_s16 }
 0x1c9   :  { %1099 = vrot.lane.b32.xlu1 %v2679_v62, %s2686_s29 }
 0x1cb   :  { %1225 = vrot.lane.b32.xlu0 %v2680_v63, %s2693_s17 }
 0x1cd   :  { %1163 = vrot.lane.b32.xlu1 %v2680_v63, %s2692_s16 }
 0x1cf   :  { %1286 = vperm.xlu0 %2659, %v1283_v1   ;;  %v3022_v1 = vld [vmem:[#allocation2 + $0xc] ss:$0 sps:$4 sm:$0xff]  }
 0x1d1   :  { %1223 = vrot.lane.b32.xlu1 %v2679_v62, %s2693_s17 }
 0x1d3   :  { %1697 = vrot.lane.b32.xlu0 %v3022_v1, %s2686_s29 }
 0x1d5   :  { %1227 = vrot.lane.b32.xlu1 %v2901_v50, %s2693_s17  ;;  %v2540_v50 = vld [vmem:[%s3278_s4 + $0x4] sm:$0xf] }
 0x1d9   :  { %1635 = vrot.lane.b32.xlu1 %v3022_v1, %s2687_s30 }
 0x219   :  { %v730_v4 = vpop.permute.xlu0 %729 }
 0x21b   :  { %v726_v5 = vpop.permute.xlu1 %725 }
 0x21d   :  { %v786_v6 = vpop.permute.xlu0 %785 }
 0x21f   :  { %v728_v7 = vpop.permute.xlu1 %727 }
 0x220   :  { %v731_v8 = vsel %vm118_vm0, %v726_v5, %v728_v7  ;;  %v732_v9 = vsel %vm118_vm0, %v728_v7, %v730_v4 }
 0x221   :  { %v737_v10 = vsel %vm125_vm1, %v731_v8, 0  ;;  %2544 = vmatprep.subr.msk.bf16.mxu1 %vm125_vm1, %v732_v9  ;;  %v844_v11 = vpop.permute.xlu0 %843 }
 0x222   :  { %743 = vmatpush1.bf16.msra.mxu1 %v737_v10 }
 0x223   :  { %v784_v12 = vpop.permute.xlu1 %783 }
 0x224   :  { %v789_v13 = vsel %vm179_vm2, %v784_v12, %v786_v6 }
 0x225   :  { %2545 = vmatmul.mubr.msk.bf16.vlgmr.msra.gmra.mrb[16].mxu1 %vm121_vm3, %v2540_v50  ;;  %v848_v14 = vpop.permute.xlu0 %847  ;;  %v795_v17 = vsel %vm125_vm1, %v789_v13, 0 }
 0x226   :  { %892 = vmatprep.mubr.bf16.mxu1 %v2685_v0 }
 0x227   :  { %v788_v15 = vpop.permute.xlu1 %787 }
 0x228   :  { %v790_v16 = vsel %vm179_vm2, %v786_v6, %v788_v15 }
 0x229   :  { %2546 = vmatprep.subr.msk.bf16.mxu0 %vm125_vm1, %v790_v16  ;;  %v908_v18 = vpop.permute.xlu0 %907 }
 0x22a   :  { %801 = vmatpush1.bf16.msra.mxu0 %v795_v17 }
 0x22b   :  { %v846_v20 = vpop.permute.xlu1 %845 }
 0x22c   :  { %v849_v21 = vsel %vm240_vm4, %v844_v11, %v846_v20  ;;  %v850_v22 = vsel %vm240_vm4, %v846_v20, %v848_v14 }
 0x22d   :  { %v855_v23 = vsel %vm125_vm1, %v849_v21, 0  ;;  %2547 = vmatmul.mubr.msk.bf16.vlgmr.msra.gmra.mrb[20].mxu0 %vm121_vm3, %v714_v19  ;;  %2549 = vmatprep.subr.msk.bf16.mxu1 %vm125_vm1, %v850_v22  ;;  %v1166_v24 = vpop.permute.xlu0 %1165 }
 0x22e   :  { %861 = vmatpush1.bf16.msra.mxu1 %v855_v23  ;;  %954 = vmatprep.mubr.bf16.mxu0 %v2685_v0 }
 0x22f   :  { %v906_v26 = vpop.permute.xlu1 %905  ;;  %2557 = vmatprep.subr.msk.bf16.mxu1 %vm125_vm1, %v2680_v63  ;;  %v2571_v63 = vld [vmem:[%s3278_s4 + $0x20] sm:$0xf] }
 0x230   :  { %v911_v28 = vsel %vm303_vm5, %v906_v26, %v908_v18 }
 0x231   :  { %2550 = vmatmul.mubr.msk.bf16.vlgmr.msra.gmra.mrb[20].mxu1 %vm121_vm3, %v2548_v25  ;;  %v1038_v29 = vpop.permute.xlu0 %1037  ;;  %v917_v32 = vsel %vm125_vm1, %v911_v28, 0 }
 0x232   :  { %983 = vmatpush1.bf16.msra.mxu1 %v977_v27  ;;  %1014 = vmatprep.mubr.bf16.mxu1 %v2685_v0 }
 0x233   :  { %v910_v30 = vpop.permute.xlu1 %909 }
 0x234   :  { %v912_v31 = vsel %vm303_vm5, %v908_v18, %v910_v30 }
 0x235   :  { %2552 = vmatprep.subr.msk.bf16.mxu0 %vm125_vm1, %v912_v31  ;;  %v1102_v33 = vpop.permute.xlu0 %1101 }
 0x236   :  { %923 = vmatpush1.bf16.msra.mxu0 %v917_v32  ;;  %v1106_v36 = vsel %vm499_vm7, %v1102_v33, %v1104_v3 }
 0x237   :  { %v1040_v35 = vpop.permute.xlu1 %1039  ;;  %2566 = vmatprep.subr.msk.bf16.mxu1 %vm125_vm1, %v1106_v36 }
 0x238   :  { %v1043_v38 = vsel %vm436_vm6, %v1038_v29, %v1040_v35  ;;  %v1044_v39 = vsel %vm436_vm6, %v1040_v35, %v1042_v2 }
 0x239   :  { %v1049_v40 = vsel %vm125_vm1, %v1043_v38, 0  ;;  %2553 = vmatmul.mubr.msk.bf16.vlgmr.msra.gmra.mrb[24].mxu0 %vm121_vm3, %v2551_v34  ;;  %2563 = vmatprep.subr.msk.bf16.mxu0 %vm125_vm1, %v1044_v39  ;;  %v1162_v48 = vpop.permute.xlu0 %1161 }
 0x23a   :  { %2558 = vmatmul.mubr.msk.bf16.vlgmr.msra.gmra.mrb[24].mxu1 %vm121_vm3, %v2554_v37  ;;  %1055 = vmatpush1.bf16.msra.mxu0 %v1049_v40 }
 0x23b   :  { %v1100_v41 = vpop.permute.xlu1 %1099  ;;  %1086 = vmatprep.mubr.bf16.mxu0 %v2685_v0  ;;  %1148 = vmatprep.mubr.bf16.mxu1 %v2685_v0 }
 0x23c   :  { %v1105_v42 = vsel %vm499_vm7, %v1100_v41, %v1102_v33 }
 0x23d   :  { %v1111_v45 = vsel %vm125_vm1, %v1105_v42, 0  ;;  %v1226_v57 = vpop.permute.xlu0 %1225 }
 0x23e   :  { %1117 = vmatpush1.bf16.msra.mxu1 %v1111_v45 }
 0x23f   :  { %v1164_v49 = vpop.permute.xlu1 %1163 }
 0x240   :  { %v1167_v53 = vsel %vm562_vm8, %v1162_v48, %v1164_v49  ;;  %v1168_v54 = vsel %vm562_vm8, %v1164_v49, %v1166_v24 }
 0x241   :  { %v1173_v55 = vsel %vm125_vm1, %v1167_v53, 0  ;;  %2564 = vmatmul.mubr.msk.bf16.vlgmr.msra.gmra.mrb[28].mxu0 %vm121_vm3, %v2559_v46  ;;  %2569 = vmatprep.subr.msk.bf16.mxu0 %vm125_vm1, %v1168_v54 }
 0x242   :  { %2567 = vmatmul.mubr.msk.bf16.vlgmr.msra.gmra.mrb[28].mxu1 %vm121_vm3, %v2565_v52  ;;  %1179 = vmatpush1.bf16.msra.mxu0 %v1173_v55 }
 0x243   :  { %v1224_v56 = vpop.permute.xlu1 %1223  ;;  %1210 = vmatprep.mubr.bf16.mxu0 %v2685_v0  ;;  %1272 = vmatprep.mubr.bf16.mxu1 %v2685_v0 }
 0x244   :  { %v1229_v58 = vsel %vm625_vm9, %v1224_v56, %v1226_v57 }
 0x245   :  { %v1235_v62 = vsel %vm125_vm1, %v1229_v58, 0 }
 0x247   :  { %v1228_v60 = vpop.permute.xlu1 %1227 }
 0x248   :  { %v1230_v61 = vsel %vm625_vm9, %v1226_v57, %v1228_v60 }
 0x249   :  { %2570 = vmatmul.mubr.msk.bf16.vlgmr.msra.gmra.mrb[32].mxu0 %vm121_vm3, %v2568_v59  ;;  %2572 = vmatprep.subr.msk.bf16.mxu1 %vm125_vm1, %v1230_v61 }
 0x24a   :  { %1241 = vmatpush1.bf16.msra.mxu1 %v1235_v62  ;;  %1368 = vmatprep.mubr.bf16.mxu0 %v2685_v0 }
 0x24d   :  { %2573 = vmatmul.mubr.msk.bf16.vlgmr.msra.gmra.mrb[32].mxu1 %vm121_vm3, %v2571_v63 }
 0x24e   :  { %1426 = vmatprep.mubr.bf16.mxu1 %v2685_v0  ;;  %v1287_v55 = vpop.permute.xlu0 %1286 }
 0x2f8   :  { %v776_v2 = vpop.f32.mrb[16].mxu1 }
 0x2f9   :  { %v778_v3 = vpop.f32.mrb[17].mxu1 }
 0x2fa   :  { %v780_v4 = vpop.f32.mrb[18].mxu1 }
 0x2fb   :  { %v781_v5 = vpop.f32.mrb[19].mxu1 }
 0x300   :  { %v834_v6 = vpop.f32.mrb[20].mxu0 }
 0x301   :  { %v835_v7 = vadd.f32 %v834_v6, %v776_v2  ;;  %v836_v8 = vpop.f32.mrb[21].mxu0 }
 0x302   :  { %v837_v9 = vadd.f32 %v836_v8, %v778_v3  ;;  %v838_v10 = vpop.f32.mrb[22].mxu0 }
 0x303   :  { %v839_v11 = vpop.f32.mrb[23].mxu0  ;;  %v1877_v10 = vld [vmem:[%s3279_s7] sm:$0xff] }
 0x304   :  { %v894_v50 = vpop.f32.mrb[20].mxu1  ;;  %v1636_v11 = vpop.permute.xlu1 %1635 }
 0x305   :  { %v901_v12 = vadd.f32 %v894_v50, %v835_v7  ;;  %v896_v13 = vpop.f32.mrb[21].mxu1  ;;  %v3069_v50 = vpop.permute.xlu0 %1697 }
 0x306   :  { %v902_v14 = vadd.f32 %v896_v13, %v837_v9  ;;  %v898_v15 = vpop.f32.mrb[22].mxu1 }
 0x307   :  { %v899_v16 = vpop.f32.mrb[23].mxu1 }
 0x30c   :  { %v956_v17 = vpop.f32.mrb[24].mxu0 }
 0x30d   :  { %v963_v18 = vadd.f32 %v956_v17, %v901_v12  ;;  %v958_v19 = vpop.f32.mrb[25].mxu0  ;;  %v1016_v20 = vpop.f32.mrb[24].mxu1 }
 0x30e   :  { %v964_v21 = vadd.f32 %v958_v19, %v902_v14  ;;  %v960_v22 = vpop.f32.mrb[26].mxu0  ;;  %v1018_v23 = vpop.f32.mrb[25].mxu1 }
 0x30f   :  { %v1023_v24 = vadd.f32 %v1016_v20, %v963_v18  ;;  %v961_v25 = vpop.f32.mrb[27].mxu0  ;;  %v1020_v26 = vpop.f32.mrb[26].mxu1  ;;  %v2575_v18 = vld [vmem:[%s3280_s6 + $0x4] sm:$0xf] }
 0x310   :  { %v1024_v27 = vadd.f32 %v1018_v23, %v964_v21  ;;  %v1021_v28 = vpop.f32.mrb[27].mxu1 }
 0x314   :  { %v1088_v29 = vpop.f32.mrb[28].mxu0 }
 0x315   :  { %v1095_v30 = vadd.f32 %v1088_v29, %v1023_v24  ;;  %v1090_v31 = vpop.f32.mrb[29].mxu0  ;;  %v1150_v32 = vpop.f32.mrb[28].mxu1  ;;  %v1308_v24 = vld [vmem:[%s3280_s6] sm:$0xf] }
 0x316   :  { %v1096_v33 = vadd.f32 %v1090_v31, %v1024_v27  ;;  %v1092_v34 = vpop.f32.mrb[30].mxu0  ;;  %v1152_v35 = vpop.f32.mrb[29].mxu1 }
 0x317   :  { %v1157_v36 = vadd.f32 %v1150_v32, %v1095_v30  ;;  %v1093_v37 = vpop.f32.mrb[31].mxu0  ;;  %v1154_v38 = vpop.f32.mrb[30].mxu1  ;;  %v2583_v32 = vld [vmem:[%s3280_s6 + $0x8] sm:$0xf] }
 0x318   :  { %v1158_v39 = vadd.f32 %v1152_v35, %v1096_v33  ;;  %v1155_v40 = vpop.f32.mrb[31].mxu1 }
 0x31c   :  { %v1212_v41 = vpop.f32.mrb[32].mxu0 }
 0x31d   :  { %v1219_v42 = vadd.f32 %v1212_v41, %v1157_v36  ;;  %v1214_v45 = vpop.f32.mrb[33].mxu0 }
 0x31e   :  { %v1220_v46 = vadd.f32 %v1214_v45, %v1158_v39  ;;  %v1216_v48 = vpop.f32.mrb[34].mxu0  ;;  %v2586_v39 = vld [vmem:[%s3280_s6 + $0xc] sm:$0xf]  ;;  %v2589_v45 = vld [vmem:[%s3280_s6 + $0x10] sm:$0xf] }
 0x31f   :  { %v1217_v49 = vpop.f32.mrb[35].mxu0 }
 0x320   :  { %v1274_v52 = vpop.f32.mrb[32].mxu1 }
 0x321   :  { %v1281_v53 = vadd.f32 %v1274_v52, %v1219_v42  ;;  %v1276_v54 = vpop.f32.mrb[33].mxu1 }
 0x322   :  { %v1282_v56 = vadd.f32 %v1276_v54, %v1220_v46  ;;  %v1278_v57 = vpop.f32.mrb[34].mxu1 }
 0x323   :  { %v1289_v58 = vadd.f32 %v1287_v55, %v1281_v53  ;;  %v1279_v59 = vpop.f32.mrb[35].mxu1  ;;  %v2594_v53 = vld [vmem:[%s3280_s6 + $0x14] sm:$0xf] }
 0x324   :  { %v1290_v60 = vadd.f32 %v1287_v55, %v1282_v56 }
 0x325   :  { %v1291_v61 = vadd.f32 %v1289_v58, %v2784_v43 }
 0x326   :  { %v1292_v62 = vadd.f32 %v1290_v60, %v2786_v44  ;;  %v2600_v60 = vld [vmem:[%s3280_s6 + $0x18] sm:$0xf] }
 0x327   :  { %v1293_v63 = vmax.f32 %v1291_v61, 0.0 }
 0x328   :  { %v1294_v2 = vmax.f32 %v1292_v62, 0.0 }
 0x329   :  { %v3031_v3 = vmul.f32 %v1293_v63, %v2910_v47 }
 0x32a   :  { %v3034_v4 = vmul.f32 %v1294_v2, %v2912_v51 }
 0x32b   :  { %v2682_v9 = vpack.c.bf16 %v3031_v3, %v3031_v3 }
 0x32c   :  { %v2647_v5 = vpack.c.bf16 %v3034_v4, %v3031_v3  ;;  %v2681_v44 = vpack.c.bf16 %v3034_v4, %v3034_v4 }
 0x32d   :  { %v1571_v38 = vsel %vm125_vm1, %v2682_v9, 0 }
 0x32e   :  { %1305 = vst [vmem:[#allocation2 + $0x4] sm:$0xff] %v2647_v5  ;;  %v2603_v5 = vld [vmem:[%s3280_s6 + $0x1c] sm:$0xf] }
 0x335   :  { %v1306_v6 = vld [vmem:[#allocation2] sm:$0xff]  ;;  %v2672_v43 = vld [vmem:[#allocation2 + $0x8] ss:$0 sps:$4 sm:$0xff]  }
 0x336   :  { %v2577_v7 = vcombine.high %v1306_v6, %v1306_v6  ;;  %v2576_v8 = vcombine.low %v1306_v6, %v1306_v6 }
 0x338   :  { %1321 = vrot.lane.b32.xlu0 %v2577_v7, %s2688_s0  ;;  %1319 = vrot.lane.b32.xlu1 %v2576_v8, %s2688_s0 }
 0x33c   :  { %1377 = vrot.lane.b32.xlu0 %v2576_v8, %s2689_s13  ;;  %1323 = vrot.lane.b32.xlu1 %v2672_v43, %s2688_s0 }
 0x340   :  { %1381 = vrot.lane.b32.xlu0 %v2672_v43, %s2689_s13  ;;  %1379 = vrot.lane.b32.xlu1 %v2577_v7, %s2689_s13 }
 0x344   :  { %1439 = vrot.lane.b32.xlu0 %v2577_v7, %s2690_s14  ;;  %1437 = vrot.lane.b32.xlu1 %v2576_v8, %s2690_s14 }
 0x348   :  { %1499 = vrot.lane.b32.xlu0 %v2576_v8, %s2691_s15  ;;  %1441 = vrot.lane.b32.xlu1 %v2672_v43, %s2690_s14 }
 0x34c   :  { %1503 = vrot.lane.b32.xlu0 %v2672_v43, %s2691_s15  ;;  %1501 = vrot.lane.b32.xlu1 %v2577_v7, %s2691_s15 }
 0x350   :  { %1633 = vrot.lane.b32.xlu0 %v2681_v44, %s2687_s30  ;;  %1759 = vrot.lane.b32.xlu1 %v3022_v1, %s2692_s16 }
 0x354   :  { %1693 = vrot.lane.b32.xlu0 %v2682_v9, %s2686_s29  ;;  %1631 = vrot.lane.b32.xlu1 %v2682_v9, %s2687_s30 }
 0x358   :  { %1757 = vrot.lane.b32.xlu0 %v2681_v44, %s2692_s16  ;;  %1695 = vrot.lane.b32.xlu1 %v2681_v44, %s2686_s29 }
 0x35c   :  { %1817 = vrot.lane.b32.xlu0 %v2682_v9, %s2693_s17  ;;  %1755 = vrot.lane.b32.xlu1 %v2682_v9, %s2692_s16  ;;  %v2606_v9 = vld [vmem:[%s3280_s6 + $0x20] sm:$0xf] }
 0x360   :  { %1821 = vrot.lane.b32.xlu0 %v3022_v1, %s2693_s17  ;;  %1819 = vrot.lane.b32.xlu1 %v2681_v44, %s2693_s17 }
 0x364   :  { %1880 = vperm.xlu1 %2660, %v1877_v10   ;;  %v3151_v10 = vld [vmem:[#allocation2 + $0xc] ss:$0 sps:$4 sm:$0xff]  }
 0x365   :  { %2227 = vrot.lane.b32.xlu0 %v3151_v10, %s2687_s30 }
 0x368   :  { %2289 = vrot.lane.b32.xlu1 %v3151_v10, %s2686_s29 }
 0x3aa   :  { %v1320_v12 = vpop.permute.xlu1 %1319  ;;  %v1322_v13 = vpop.permute.xlu0 %1321 }
 0x3ab   :  { %v1325_v14 = vsel %vm118_vm0, %v1320_v12, %v1322_v13 }
 0x3ac   :  { %v1331_v1 = vsel %vm125_vm1, %v1325_v14, 0 }
 0x3ae   :  { %v1324_v15 = vpop.permute.xlu1 %1323  ;;  %v1378_v16 = vpop.permute.xlu0 %1377 }
 0x3af   :  { %v1326_v17 = vsel %vm118_vm0, %v1322_v13, %v1324_v15 }
 0x3b0   :  { %2579 = vmatprep.subr.msk.bf16.mxu0 %vm125_vm1, %v1326_v17 }
 0x3b1   :  { %1337 = vmatpush1.bf16.msra.mxu0 %v1331_v1 }
 0x3b2   :  { %v1380_v19 = vpop.permute.xlu1 %1379  ;;  %v1382_v20 = vpop.permute.xlu0 %1381 }
 0x3b3   :  { %v1383_v21 = vsel %vm179_vm2, %v1378_v16, %v1380_v19  ;;  %v1384_v22 = vsel %vm179_vm2, %v1380_v19, %v1382_v20 }
 0x3b4   :  { %v1389_v23 = vsel %vm125_vm1, %v1383_v21, 0  ;;  %2581 = vmatprep.subr.msk.bf16.mxu1 %vm125_vm1, %v1384_v22  ;;  %2580 = vmatmul.mubr.msk.bf16.vlgmr.msra.gmra.mrb[36].mxu0 %vm121_vm3, %v2575_v18 }
 0x3b5   :  { %1395 = vmatpush1.bf16.msra.mxu1 %v1389_v23  ;;  %1486 = vmatprep.mubr.bf16.mxu0 %v2685_v0 }
 0x3b6   :  { %v1438_v25 = vpop.permute.xlu1 %1437  ;;  %v1440_v26 = vpop.permute.xlu0 %1439 }
 0x3b7   :  { %v1443_v27 = vsel %vm240_vm4, %v1438_v25, %v1440_v26 }
 0x3b8   :  { %2582 = vmatmul.mubr.msk.bf16.vlgmr.msra.gmra.mrb[36].mxu1 %vm121_vm3, %v1308_v24  ;;  %v1449_v31 = vsel %vm125_vm1, %v1443_v27, 0 }
 0x3b9   :  { %1548 = vmatprep.mubr.bf16.mxu1 %v2685_v0 }
 0x3ba   :  { %v1442_v28 = vpop.permute.xlu1 %1441  ;;  %v1500_v29 = vpop.permute.xlu0 %1499 }
 0x3bb   :  { %v1444_v30 = vsel %vm240_vm4, %v1440_v26, %v1442_v28 }
 0x3bc   :  { %2584 = vmatprep.subr.msk.bf16.mxu0 %vm125_vm1, %v1444_v30 }
 0x3bd   :  { %1455 = vmatpush1.bf16.msra.mxu0 %v1449_v31 }
 0x3be   :  { %v1502_v33 = vpop.permute.xlu1 %1501  ;;  %2592 = vmatprep.subr.msk.bf16.mxu0 %vm125_vm1, %v2681_v44  ;;  %v1504_v34 = vpop.permute.xlu0 %1503 }
 0x3bf   :  { %v1505_v35 = vsel %vm303_vm5, %v1500_v29, %v1502_v33  ;;  %v1506_v36 = vsel %vm303_vm5, %v1502_v33, %v1504_v34 }
 0x3c0   :  { %v1511_v37 = vsel %vm125_vm1, %v1505_v35, 0  ;;  %2585 = vmatmul.mubr.msk.bf16.vlgmr.msra.gmra.mrb[40].mxu0 %vm121_vm3, %v2583_v32  ;;  %2587 = vmatprep.subr.msk.bf16.mxu1 %vm125_vm1, %v1506_v36 }
 0x3c1   :  { %1517 = vmatpush1.bf16.msra.mxu1 %v1511_v37  ;;  %1577 = vmatpush1.bf16.msra.mxu0 %v1571_v38 }
 0x3c2   :  { %v1760_v40 = vpop.permute.xlu1 %1759  ;;  %v1634_v41 = vpop.permute.xlu0 %1633  ;;  %1608 = vmatprep.mubr.bf16.mxu0 %v2685_v0 }
 0x3c3   :  { %v1638_v42 = vsel %vm436_vm6, %v1634_v41, %v1636_v11 }
 0x3c4   :  { %2588 = vmatmul.mubr.msk.bf16.vlgmr.msra.gmra.mrb[40].mxu1 %vm121_vm3, %v2586_v39  ;;  %2598 = vmatprep.subr.msk.bf16.mxu1 %vm125_vm1, %v1638_v42 }
 0x3c5   :  { %1680 = vmatprep.mubr.bf16.mxu1 %v2685_v0 }
 0x3c6   :  { %v1632_v46 = vpop.permute.xlu1 %1631  ;;  %v1694_v48 = vpop.permute.xlu0 %1693 }
 0x3c7   :  { %v1637_v49 = vsel %vm436_vm6, %v1632_v46, %v1634_v41 }
 0x3c8   :  { %v1643_v52 = vsel %vm125_vm1, %v1637_v49, 0  ;;  %2593 = vmatmul.mubr.msk.bf16.vlgmr.msra.gmra.mrb[44].mxu0 %vm121_vm3, %v2589_v45 }
 0x3c9   :  { %1649 = vmatpush1.bf16.msra.mxu1 %v1643_v52  ;;  %1742 = vmatprep.mubr.bf16.mxu0 %v2685_v0 }
 0x3ca   :  { %v1696_v54 = vpop.permute.xlu1 %1695  ;;  %v1758_v55 = vpop.permute.xlu0 %1757 }
 0x3cb   :  { %v1699_v56 = vsel %vm499_vm7, %v1694_v48, %v1696_v54  ;;  %v1700_v57 = vsel %vm499_vm7, %v1696_v54, %v3069_v50  ;;  %v1762_v58 = vsel %vm562_vm8, %v1758_v55, %v1760_v40 }
 0x3cc   :  { %v1705_v59 = vsel %vm125_vm1, %v1699_v56, 0  ;;  %2599 = vmatmul.mubr.msk.bf16.vlgmr.msra.gmra.mrb[44].mxu1 %vm121_vm3, %v2594_v53  ;;  %2601 = vmatprep.subr.msk.bf16.mxu0 %vm125_vm1, %v1700_v57 }
 0x3cd   :  { %2604 = vmatprep.subr.msk.bf16.mxu1 %vm125_vm1, %v1762_v58  ;;  %1711 = vmatpush1.bf16.msra.mxu0 %v1705_v59 }
 0x3ce   :  { %v1756_v61 = vpop.permute.xlu1 %1755  ;;  %v1818_v62 = vpop.permute.xlu0 %1817  ;;  %1804 = vmatprep.mubr.bf16.mxu1 %v2685_v0 }
 0x3cf   :  { %v1761_v63 = vsel %vm562_vm8, %v1756_v61, %v1758_v55 }
 0x3d0   :  { %v1767_v2 = vsel %vm125_vm1, %v1761_v63, 0  ;;  %2602 = vmatmul.mubr.msk.bf16.vlgmr.msra.gmra.mrb[48].mxu0 %vm121_vm3, %v2600_v60 }
 0x3d1   :  { %1773 = vmatpush1.bf16.msra.mxu1 %v1767_v2  ;;  %1866 = vmatprep.mubr.bf16.mxu0 %v2685_v0 }
 0x3d2   :  { %v1820_v6 = vpop.permute.xlu1 %1819  ;;  %v1822_v7 = vpop.permute.xlu0 %1821 }
 0x3d3   :  { %v1823_v8 = vsel %vm625_vm9, %v1818_v62, %v1820_v6  ;;  %v1824_v43 = vsel %vm625_vm9, %v1820_v6, %v1822_v7 }
 0x3d4   :  { %v1829_v44 = vsel %vm125_vm1, %v1823_v8, 0  ;;  %2605 = vmatmul.mubr.msk.bf16.vlgmr.msra.gmra.mrb[48].mxu1 %vm121_vm3, %v2603_v5  ;;  %2607 = vmatprep.subr.msk.bf16.mxu0 %vm125_vm1, %v1824_v43 }
 0x3d5   :  { %1835 = vmatpush1.bf16.msra.mxu0 %v1829_v44  ;;  %1960 = vmatprep.mubr.bf16.mxu1 %v2685_v0 }
 0x3d8   :  { %2608 = vmatmul.mubr.msk.bf16.vlgmr.msra.gmra.mrb[52].mxu0 %vm121_vm3, %v2606_v9 }
 0x3d9   :  { %2018 = vmatprep.mubr.bf16.mxu0 %v2685_v0 }
 0x3e3   :  { %v1881_v61 = vpop.permute.xlu1 %1880 }
 0x487   :  { %v1370_v11 = vpop.f32.mrb[36].mxu0 }
 0x488   :  { %v1372_v50 = vpop.f32.mrb[37].mxu0 }
 0x489   :  { %v1374_v12 = vpop.f32.mrb[38].mxu0 }
 0x48a   :  { %v1375_v13 = vpop.f32.mrb[39].mxu0 }
 0x48b   :  { %v1428_v14 = vpop.f32.mrb[36].mxu1 }
 0x48c   :  { %v1429_v15 = vadd.f32 %v1428_v14, %v1370_v11  ;;  %v1430_v16 = vpop.f32.mrb[37].mxu1 }
 0x48d   :  { %v1431_v17 = vadd.f32 %v1430_v16, %v1372_v50  ;;  %v1432_v1 = vpop.f32.mrb[38].mxu1 }
 0x48e   :  { %v1433_v18 = vpop.f32.mrb[39].mxu1  ;;  %v2469_v1 = vld [vmem:[%s3281_s9] sm:$0xff] }
 0x48f   :  { %v3186_v18 = vpop.permute.xlu1 %2289 }
 0x493   :  { %v1488_v19 = vpop.f32.mrb[40].mxu0 }
 0x494   :  { %v1495_v20 = vadd.f32 %v1488_v19, %v1429_v15  ;;  %v1490_v21 = vpop.f32.mrb[41].mxu0  ;;  %v2228_v19 = vpop.permute.xlu0 %2227 }
 0x495   :  { %v1496_v22 = vadd.f32 %v1490_v21, %v1431_v17  ;;  %v1492_v23 = vpop.f32.mrb[42].mxu0 }
 0x496   :  { %v1493_v24 = vpop.f32.mrb[43].mxu0 }
 0x497   :  { %v1550_v25 = vpop.f32.mrb[40].mxu1 }
 0x498   :  { %v1557_v26 = vadd.f32 %v1550_v25, %v1495_v20  ;;  %v1552_v27 = vpop.f32.mrb[41].mxu1 }
 0x499   :  { %v1558_v28 = vadd.f32 %v1552_v27, %v1496_v22  ;;  %v1554_v29 = vpop.f32.mrb[42].mxu1 }
 0x49a   :  { %v1555_v30 = vpop.f32.mrb[43].mxu1 }
 0x49b   :  { %v1610_v31 = vpop.f32.mrb[44].mxu0 }
 0x49c   :  { %v1617_v32 = vadd.f32 %v1610_v31, %v1557_v26  ;;  %v1612_v33 = vpop.f32.mrb[45].mxu0  ;;  %v2610_v26 = vld [vmem:[%s3282_s8 + $0x4] sm:$0xf] }
 0x49d   :  { %v1618_v34 = vadd.f32 %v1612_v33, %v1558_v28  ;;  %v1614_v35 = vpop.f32.mrb[46].mxu0 }
 0x49e   :  { %v1615_v36 = vpop.f32.mrb[47].mxu0 }
 0x49f   :  { %v1682_v37 = vpop.f32.mrb[44].mxu1 }
 0x4a0   :  { %v1689_v38 = vadd.f32 %v1682_v37, %v1617_v32  ;;  %v1684_v39 = vpop.f32.mrb[45].mxu1  ;;  %v1900_v32 = vld [vmem:[%s3282_s8] sm:$0xf] }
 0x4a1   :  { %v1690_v40 = vadd.f32 %v1684_v39, %v1618_v34  ;;  %v1686_v41 = vpop.f32.mrb[46].mxu1 }
 0x4a2   :  { %v1687_v42 = vpop.f32.mrb[47].mxu1 }
 0x4a3   :  { %v1744_v45 = vpop.f32.mrb[48].mxu0 }
 0x4a4   :  { %v1751_v46 = vadd.f32 %v1744_v45, %v1689_v38  ;;  %v1746_v48 = vpop.f32.mrb[49].mxu0 }
 0x4a5   :  { %v1752_v49 = vadd.f32 %v1746_v48, %v1690_v40  ;;  %v1748_v52 = vpop.f32.mrb[50].mxu0  ;;  %v2618_v40 = vld [vmem:[%s3282_s8 + $0x8] sm:$0xf] }
 0x4a6   :  { %v1749_v53 = vpop.f32.mrb[51].mxu0  ;;  %v2621_v52 = vld [vmem:[%s3282_s8 + $0xc] sm:$0xf] }
 0x4a7   :  { %v1806_v54 = vpop.f32.mrb[48].mxu1 }
 0x4a8   :  { %v1813_v55 = vadd.f32 %v1806_v54, %v1751_v46  ;;  %v1808_v56 = vpop.f32.mrb[49].mxu1 }
 0x4a9   :  { %v1814_v57 = vadd.f32 %v1808_v56, %v1752_v49  ;;  %v1810_v58 = vpop.f32.mrb[50].mxu1  ;;  %v2624_v56 = vld [vmem:[%s3282_s8 + $0x10] sm:$0xf] }
 0x4aa   :  { %v1811_v59 = vpop.f32.mrb[51].mxu1 }
 0x4ab   :  { %v1868_v60 = vpop.f32.mrb[52].mxu0 }
 0x4ac   :  { %v1875_v62 = vadd.f32 %v1868_v60, %v1813_v55  ;;  %v1870_v63 = vpop.f32.mrb[53].mxu0 }
 0x4ad   :  { %v1876_v2 = vadd.f32 %v1870_v63, %v1814_v57  ;;  %v1872_v5 = vpop.f32.mrb[54].mxu0 }
 0x4ae   :  { %v1883_v6 = vadd.f32 %v1881_v61, %v1875_v62  ;;  %v1873_v7 = vpop.f32.mrb[55].mxu0 }
 0x4af   :  { %v1884_v8 = vadd.f32 %v1881_v61, %v1876_v2  ;;  %v2629_v61 = vld [vmem:[%s3282_s8 + $0x14] sm:$0xf] }
 0x4b0   :  { %v1885_v43 = vmax.f32 %v1883_v6, 0.0 }
 0x4b1   :  { %v1886_v44 = vmax.f32 %v1884_v8, 0.0  ;;  %v2635_v8 = vld [vmem:[%s3282_s8 + $0x18] sm:$0xf] }
 0x4b2   :  { %v1887_v9 = vmul.f32 %v1885_v43, %v2910_v47 }
 0x4b3   :  { %v1888_v11 = vmul.f32 %v1886_v44, %v2912_v51 }
 0x4b4   :  { %v2684_v17 = vpack.c.bf16 %v1887_v9, %v1887_v9 }
 0x4b5   :  { %v2648_v50 = vpack.c.bf16 %v1888_v11, %v1887_v9  ;;  %v2683_v16 = vpack.c.bf16 %v1888_v11, %v1888_v11 }
 0x4b6   :  { %v2163_v49 = vsel %vm125_vm1, %v2684_v17, 0 }
 0x4b7   :  { %1897 = vst [vmem:[#allocation2 + $0x4] sm:$0xff] %v2648_v50  ;;  %v2638_v50 = vld [vmem:[%s3282_s8 + $0x1c] sm:$0xf] }
 0x4be   :  { %v1898_v12 = vld [vmem:[#allocation2] sm:$0xff]  ;;  %v2676_v15 = vld [vmem:[#allocation2 + $0x8] ss:$0 sps:$4 sm:$0xff]  }
 0x4bf   :  { %v2612_v13 = vcombine.high %v1898_v12, %v1898_v12  ;;  %v2611_v14 = vcombine.low %v1898_v12, %v1898_v12 }
 0x4c1   :  { %1913 = vrot.lane.b32.xlu1 %v2612_v13, %s2688_s0  ;;  %1911 = vrot.lane.b32.xlu0 %v2611_v14, %s2688_s0 }
 0x4c5   :  { %1969 = vrot.lane.b32.xlu1 %v2611_v14, %s2689_s13  ;;  %1915 = vrot.lane.b32.xlu0 %v2676_v15, %s2688_s0 }
 0x4c9   :  { %1973 = vrot.lane.b32.xlu1 %v2676_v15, %s2689_s13  ;;  %1971 = vrot.lane.b32.xlu0 %v2612_v13, %s2689_s13 }
 0x4cd   :  { %2031 = vrot.lane.b32.xlu1 %v2612_v13, %s2690_s14  ;;  %2029 = vrot.lane.b32.xlu0 %v2611_v14, %s2690_s14 }
 0x4d1   :  { %2091 = vrot.lane.b32.xlu1 %v2611_v14, %s2691_s15  ;;  %2033 = vrot.lane.b32.xlu0 %v2676_v15, %s2690_s14 }
 0x4d5   :  { %2095 = vrot.lane.b32.xlu1 %v2676_v15, %s2691_s15  ;;  %2093 = vrot.lane.b32.xlu0 %v2612_v13, %s2691_s15 }
 0x4d9   :  { %2225 = vrot.lane.b32.xlu1 %v2683_v16, %s2687_s30  ;;  %2351 = vrot.lane.b32.xlu0 %v3151_v10, %s2692_s16 }
 0x4dd   :  { %2285 = vrot.lane.b32.xlu1 %v2684_v17, %s2686_s29  ;;  %2223 = vrot.lane.b32.xlu0 %v2684_v17, %s2687_s30 }
 0x4e1   :  { %2349 = vrot.lane.b32.xlu1 %v2683_v16, %s2692_s16  ;;  %2287 = vrot.lane.b32.xlu0 %v2683_v16, %s2686_s29 }
 0x4e5   :  { %2409 = vrot.lane.b32.xlu1 %v2684_v17, %s2693_s17  ;;  %2347 = vrot.lane.b32.xlu0 %v2684_v17, %s2692_s16  ;;  %v2641_v17 = vld [vmem:[%s3282_s8 + $0x20] sm:$0xf] }
 0x4e9   :  { %2413 = vrot.lane.b32.xlu1 %v3151_v10, %s2693_s17  ;;  %2411 = vrot.lane.b32.xlu0 %v2683_v16, %s2693_s17 }
 0x4ed   :  { %2472 = vperm.xlu0 %2659, %v2469_v1  }
 0x533   :  { %v1914_v20 = vpop.permute.xlu1 %1913  ;;  %v1912_v21 = vpop.permute.xlu0 %1911 }
 0x534   :  { %v1917_v22 = vsel %vm118_vm0, %v1912_v21, %v1914_v20 }
 0x535   :  { %v1923_v10 = vsel %vm125_vm1, %v1917_v22, 0 }
 0x537   :  { %v1970_v23 = vpop.permute.xlu1 %1969  ;;  %v1916_v24 = vpop.permute.xlu0 %1915 }
 0x538   :  { %v1918_v25 = vsel %vm118_vm0, %v1914_v20, %v1916_v24 }
 0x539   :  { %2614 = vmatprep.subr.msk.bf16.mxu1 %vm125_vm1, %v1918_v25 }
 0x53a   :  { %1929 = vmatpush1.bf16.msra.mxu1 %v1923_v10 }
 0x53b   :  { %v1974_v27 = vpop.permute.xlu1 %1973  ;;  %v1972_v28 = vpop.permute.xlu0 %1971 }
 0x53c   :  { %v1975_v29 = vsel %vm179_vm2, %v1970_v23, %v1972_v28  ;;  %v1976_v30 = vsel %vm179_vm2, %v1972_v28, %v1974_v27 }
 0x53d   :  { %v1981_v31 = vsel %vm125_vm1, %v1975_v29, 0  ;;  %2616 = vmatprep.subr.msk.bf16.mxu0 %vm125_vm1, %v1976_v30  ;;  %2615 = vmatmul.mubr.msk.bf16.vlgmr.msra.gmra.mrb[52].mxu1 %vm121_vm3, %v2610_v26 }
 0x53e   :  { %1987 = vmatpush1.bf16.msra.mxu0 %v1981_v31  ;;  %2078 = vmatprep.mubr.bf16.mxu1 %v2685_v0 }
 0x53f   :  { %v2032_v33 = vpop.permute.xlu1 %2031  ;;  %v2030_v34 = vpop.permute.xlu0 %2029 }
 0x540   :  { %v2035_v35 = vsel %vm240_vm4, %v2030_v34, %v2032_v33 }
 0x541   :  { %2617 = vmatmul.mubr.msk.bf16.vlgmr.msra.gmra.mrb[56].mxu0 %vm121_vm3, %v1900_v32  ;;  %v2041_v39 = vsel %vm125_vm1, %v2035_v35, 0 }
 0x542   :  { %2140 = vmatprep.mubr.bf16.mxu0 %v2685_v0 }
 0x543   :  { %v2092_v36 = vpop.permute.xlu1 %2091  ;;  %v2034_v37 = vpop.permute.xlu0 %2033 }
 0x544   :  { %v2036_v38 = vsel %vm240_vm4, %v2032_v33, %v2034_v37 }
 0x545   :  { %2619 = vmatprep.subr.msk.bf16.mxu1 %vm125_vm1, %v2036_v38 }
 0x546   :  { %2047 = vmatpush1.bf16.msra.mxu1 %v2041_v39 }
 0x547   :  { %v2096_v41 = vpop.permute.xlu1 %2095  ;;  %2627 = vmatprep.subr.msk.bf16.mxu1 %vm125_vm1, %v2683_v16  ;;  %v2094_v42 = vpop.permute.xlu0 %2093 }
 0x548   :  { %v2097_v45 = vsel %vm303_vm5, %v2092_v36, %v2094_v42  ;;  %v2098_v46 = vsel %vm303_vm5, %v2094_v42, %v2096_v41 }
 0x549   :  { %v2103_v48 = vsel %vm125_vm1, %v2097_v45, 0  ;;  %2620 = vmatmul.mubr.msk.bf16.vlgmr.msra.gmra.mrb[56].mxu1 %vm121_vm3, %v2618_v40  ;;  %2622 = vmatprep.subr.msk.bf16.mxu0 %vm125_vm1, %v2098_v46 }
 0x54a   :  { %2109 = vmatpush1.bf16.msra.mxu0 %v2103_v48  ;;  %2169 = vmatpush1.bf16.msra.mxu1 %v2163_v49 }
 0x54b   :  { %v2226_v53 = vpop.permute.xlu1 %2225  ;;  %v2352_v54 = vpop.permute.xlu0 %2351  ;;  %2200 = vmatprep.mubr.bf16.mxu1 %v2685_v0 }
 0x54c   :  { %v2230_v55 = vsel %vm436_vm6, %v2226_v53, %v2228_v19 }
 0x54d   :  { %2623 = vmatmul.mubr.msk.bf16.vlgmr.msra.gmra.mrb[60].mxu0 %vm121_vm3, %v2621_v52  ;;  %2633 = vmatprep.subr.msk.bf16.mxu0 %vm125_vm1, %v2230_v55 }
 0x54e   :  { %2272 = vmatprep.mubr.bf16.mxu0 %v2685_v0 }
 0x54f   :  { %v2286_v57 = vpop.permute.xlu1 %2285  ;;  %v2224_v58 = vpop.permute.xlu0 %2223 }
 0x550   :  { %v2229_v59 = vsel %vm436_vm6, %v2224_v58, %v2226_v53 }
 0x551   :  { %v2235_v60 = vsel %vm125_vm1, %v2229_v59, 0  ;;  %2628 = vmatmul.mubr.msk.bf16.vlgmr.msra.gmra.mrb[60].mxu1 %vm121_vm3, %v2624_v56 }
 0x552   :  { %2241 = vmatpush1.bf16.msra.mxu0 %v2235_v60  ;;  %2334 = vmatprep.mubr.bf16.mxu1 %v2685_v0 }
 0x553   :  { %v2350_v62 = vpop.permute.xlu1 %2349  ;;  %v2288_v63 = vpop.permute.xlu0 %2287 }
 0x554   :  { %v2354_v2 = vsel %vm562_vm8, %v2350_v62, %v2352_v54  ;;  %v2291_v5 = vsel %vm499_vm7, %v2286_v57, %v2288_v63  ;;  %v2292_v6 = vsel %vm499_vm7, %v2288_v63, %v3186_v18 }
 0x555   :  { %v2297_v7 = vsel %vm125_vm1, %v2291_v5, 0  ;;  %2634 = vmatmul.mubr.msk.bf16.vlgmr.msra.gmra.mrb[64].mxu0 %vm121_vm3, %v2629_v61  ;;  %2636 = vmatprep.subr.msk.bf16.mxu1 %vm125_vm1, %v2292_v6 }
 0x556   :  { %2639 = vmatprep.subr.msk.bf16.mxu0 %vm125_vm1, %v2354_v2  ;;  %2303 = vmatpush1.bf16.msra.mxu1 %v2297_v7 }
 0x557   :  { %v2410_v43 = vpop.permute.xlu1 %2409  ;;  %v2348_v44 = vpop.permute.xlu0 %2347  ;;  %2396 = vmatprep.mubr.bf16.mxu0 %v2685_v0 }
 0x558   :  { %v2353_v9 = vsel %vm562_vm8, %v2348_v44, %v2350_v62 }
 0x559   :  { %v2359_v11 = vsel %vm125_vm1, %v2353_v9, 0  ;;  %2637 = vmatmul.mubr.msk.bf16.vlgmr.msra.gmra.mrb[64].mxu1 %vm121_vm3, %v2635_v8 }
 0x55a   :  { %2365 = vmatpush1.bf16.msra.mxu0 %v2359_v11  ;;  %2458 = vmatprep.mubr.bf16.mxu1 %v2685_v0 }
 0x55b   :  { %v2414_v12 = vpop.permute.xlu1 %2413  ;;  %v2412_v13 = vpop.permute.xlu0 %2411 }
 0x55c   :  { %v2415_v14 = vsel %vm625_vm9, %v2410_v43, %v2412_v13  ;;  %v2416_v15 = vsel %vm625_vm9, %v2412_v13, %v2414_v12 }
 0x55d   :  { %v2421_v16 = vsel %vm125_vm1, %v2415_v14, 0  ;;  %2640 = vmatmul.mubr.msk.bf16.vlgmr.msra.gmra.mrb[68].mxu0 %vm121_vm3, %v2638_v50  ;;  %2642 = vmatprep.subr.msk.bf16.mxu1 %vm125_vm1, %v2416_v15 }
 0x55e   :  { %2427 = vmatpush1.bf16.msra.mxu1 %v2421_v16 }
 0x561   :  { %2643 = vmatmul.mubr.msk.bf16.vlgmr.msra.gmra.mrb[68].mxu1 %vm121_vm3, %v2641_v17 }
 0x56c   :  { %v2473_v43 = vpop.permute.xlu0 %2472 }
 0x610   :  { %v1962_v0 = vpop.f32.mrb[52].mxu1 }
 0x611   :  { %v1964_v1 = vpop.f32.mrb[53].mxu1 }
 0x612   :  { %v1966_v18 = vpop.f32.mrb[54].mxu1 }
 0x613   :  { %v1967_v19 = vpop.f32.mrb[55].mxu1 }
 0x614   :  { %v2020_v20 = vpop.f32.mrb[56].mxu0 }
 0x615   :  { %v2021_v21 = vadd.f32 %v2020_v20, %v1962_v0  ;;  %v2022_v22 = vpop.f32.mrb[57].mxu0 }
 0x616   :  { %v2023_v23 = vadd.f32 %v2022_v22, %v1964_v1  ;;  %v2024_v24 = vpop.f32.mrb[58].mxu0 }
 0x617   :  { %v2025_v25 = vpop.f32.mrb[59].mxu0 }
 0x61c   :  { %v2080_v10 = vpop.f32.mrb[56].mxu1 }
 0x61d   :  { %v2087_v26 = vadd.f32 %v2080_v10, %v2021_v21  ;;  %v2082_v27 = vpop.f32.mrb[57].mxu1 }
 0x61e   :  { %v2088_v28 = vadd.f32 %v2082_v27, %v2023_v23  ;;  %v2084_v29 = vpop.f32.mrb[58].mxu1 }
 0x61f   :  { %v2085_v30 = vpop.f32.mrb[59].mxu1 }
 0x620   :  { %v2142_v31 = vpop.f32.mrb[60].mxu0 }
 0x621   :  { %v2149_v32 = vadd.f32 %v2142_v31, %v2087_v26  ;;  %v2144_v33 = vpop.f32.mrb[61].mxu0 }
 0x622   :  { %v2150_v34 = vadd.f32 %v2144_v33, %v2088_v28  ;;  %v2146_v35 = vpop.f32.mrb[62].mxu0 }
 0x623   :  { %v2147_v36 = vpop.f32.mrb[63].mxu0 }
 0x624   :  { %v2202_v37 = vpop.f32.mrb[60].mxu1 }
 0x625   :  { %v2209_v38 = vadd.f32 %v2202_v37, %v2149_v32  ;;  %v2204_v39 = vpop.f32.mrb[61].mxu1 }
 0x626   :  { %v2210_v40 = vadd.f32 %v2204_v39, %v2150_v34  ;;  %v2206_v41 = vpop.f32.mrb[62].mxu1 }
 0x627   :  { %v2207_v42 = vpop.f32.mrb[63].mxu1 }
 0x628   :  { %v2274_v45 = vpop.f32.mrb[64].mxu0 }
 0x629   :  { %v2281_v46 = vadd.f32 %v2274_v45, %v2209_v38  ;;  %v2276_v48 = vpop.f32.mrb[65].mxu0 }
 0x62a   :  { %v2282_v49 = vadd.f32 %v2276_v48, %v2210_v40  ;;  %v2278_v52 = vpop.f32.mrb[66].mxu0 }
 0x62b   :  { %v2279_v53 = vpop.f32.mrb[67].mxu0 }
 0x62c   :  { %v2336_v54 = vpop.f32.mrb[64].mxu1 }
 0x62d   :  { %v2343_v55 = vadd.f32 %v2336_v54, %v2281_v46  ;;  %v2338_v56 = vpop.f32.mrb[65].mxu1 }
 0x62e   :  { %v2344_v57 = vadd.f32 %v2338_v56, %v2282_v49  ;;  %v2340_v58 = vpop.f32.mrb[66].mxu1 }
 0x62f   :  { %v2341_v59 = vpop.f32.mrb[67].mxu1 }
 0x630   :  { %v2398_v60 = vpop.f32.mrb[68].mxu0 }
 0x631   :  { %v2405_v61 = vadd.f32 %v2398_v60, %v2343_v55  ;;  %v2400_v62 = vpop.f32.mrb[69].mxu0 }
 0x632   :  { %v2406_v63 = vadd.f32 %v2400_v62, %v2344_v57  ;;  %v2402_v2 = vpop.f32.mrb[70].mxu0 }
 0x633   :  { %v2403_v5 = vpop.f32.mrb[71].mxu0 }
 0x634   :  { %v2460_v6 = vpop.f32.mrb[68].mxu1 }
 0x635   :  { %v2467_v7 = vadd.f32 %v2460_v6, %v2405_v61  ;;  %v2462_v8 = vpop.f32.mrb[69].mxu1 }
 0x636   :  { %v2468_v44 = vadd.f32 %v2462_v8, %v2406_v63  ;;  %v2464_v9 = vpop.f32.mrb[70].mxu1 }
 0x637   :  { %v2475_v11 = vadd.f32 %v2473_v43, %v2467_v7  ;;  %v2465_v50 = vpop.f32.mrb[71].mxu1 }
 0x638   :  { %v2476_v12 = vadd.f32 %v2473_v43, %v2468_v44 }
 0x639   :  { %v2477_v13 = vadd.f32 %v2475_v11, %v3031_v3 }
 0x63a   :  { %v2478_v14 = vadd.f32 %v2476_v12, %v3034_v4 }
 0x63b   :  { %v2479_v15 = vmax.f32 %v2477_v13, 0.0 }
 0x63c   :  { %v2480_v16 = vmax.f32 %v2478_v14, 0.0 }
 0x63d   :  { %v2481_v17 = vmul.f32 %v2479_v15, %v2910_v47 }
 0x63e   :  { %v2482_v0 = vmul.f32 %v2480_v16, %v2912_v51 }
 0x640   :  { %v2649_v1 = vpack.c.bf16 %v2482_v0, %v2481_v17 }
 0x642   :  { %2491 = vst [vmem:[%s3283_s10] sm:$0xff] %v2649_v1 }

// kernel: feature_extractor.6
= control target key start
LH: loop header
LB: loop body
LE: loop exit
PB: predicated region body
PF: predicated region fallthrough
CT: control target
= control target key end

     0   :  { %v2320_v1 = vmov 0   ;;  %vm117_vm0 = vcmask 588800   ;;  %vm124_vm1 = vcmask 1043456   ;;  %s2321_s18 = smov 6   ;;  %s2322_s21 = smov 7   ;;  %v2325_v15 = vmov 0.0   ;;  %s2787_s0 = inlined_call_operand.vmem [shape: bf16[72,128], index: 0, kind: input, shape index: {}]   ;;  %s2788_s2 = inlined_call_operand.vmem [shape: bf16[32,72], index: 2, kind: input, shape index: {}]   ;;  %s2789_s3 = inlined_call_operand.vmem [shape: f32[32,1], index: 3, kind: input, shape index: {}]   ;;  %s2790_s4 = inlined_call_operand.vmem [shape: f32[32,1], index: 4, kind: input, shape index: {}]   ;;  %s2791_s1 = inlined_call_operand.vmem [shape: f32[1,128], index: 1, kind: input, shape index: {}]   ;;  %s2792_s5 = inlined_call_operand.vmem [shape: bf16[9,16,16], index: 5, kind: input, shape index: {}]   ;;  %s2793_s6 = inlined_call_operand.vmem [shape: f32[16,1], index: 6, kind: input, shape index: {}]   ;;  %s2794_s7 = inlined_call_operand.vmem [shape: bf16[9,16,16], index: 7, kind: input, shape index: {}]   ;;  %s2795_s8 = inlined_call_operand.vmem [shape: f32[16,1], index: 8, kind: input, shape index: {}]   ;;  %s2796_s9 = inlined_call_operand.vmem [shape: bf16[9,16,16], index: 9, kind: input, shape index: {}]   ;;  %s2797_s10 = inlined_call_operand.vmem [shape: f32[16,1], index: 10, kind: input, shape index: {}]   ;;  %s2798_s11 = inlined_call_operand.vmem [shape: bf16[16,128], index: 11, kind: output, shape index: {}]  }
   0x1   :  { %v2285_v0 = vld [vmem:[%s2787_s0] sm:$0xff]   ;;  %2283 = vset.pattern.permute.xlu0 %v2320_v1  ;;  %2284 = vset.pattern.permute.xlu1 %v2320_v1  ;;  %v2286_v2 = vld [vmem:[%s2787_s0 + $0x8] sm:$0xff]   ;;  %v2287_v3 = vld [vmem:[%s2787_s0 + $0x10] sm:$0xff]   ;;  %s2324_s22 = smov 1   ;;  %vm2326_vm2 = vmmov 0   ;;  %s2327_s24 = smov 127  }
   0x2   :  { %2095 = vmatprep.subr.bf16.mxu0 %v2285_v0  ;;  %v2290_v4 = vld [vmem:[%s2788_s2] sm:$0xff]   ;;  %v2288_v7 = vld [vmem:[%s2787_s0 + $0x18] sm:$0xff]   ;;  %v57_v8 = vld [vmem:[%s2789_s3 + $0x8] sm:$0xff]  ;;  %2109 = vmatprep.subr.bf16.mxu1 %v2325_v15  ;;  %s2328_s25 = smov 123   ;;  %s2329_s26 = smov 122   ;;  %vm235_vm3 = vcmask 48128  }
   0x3   :  { %2096 = vmatpush3.bf16.msra.mxu0 %v2285_v0  ;;  %v56_v5 = vld [vmem:[%s2789_s3] sm:$0xff]  ;;  %2105 = vmatprep.mubr.msk.bf16.mxu0 %vm117_vm0, %v2290_v4  ;;  %v178_v9 = vld [vmem:[%s2790_s4 + $0x8] sm:$0xff]  ;;  %s2330_s27 = smov 121   ;;  %v58_v30 = vld [vmem:[%s2789_s3 + $0x10] sm:$0xff]  ;;  %vm292_vm4 = vcmask 56320   ;;  %vm238_vm5 = vcmask 130048  }
   0x4   :  { %2097 = vmatprep.subr.bf16.mxu0 %v2286_v2  ;;  %v177_v6 = vld [vmem:[%s2790_s4] sm:$0xff]  ;;  %62 = vperm.xlu0 %2283, %v56_v5   ;;  %v2291_v12 = vld [vmem:[%s2788_s2 + $0x8] sm:$0xff]   ;;  %v179_v31 = vld [vmem:[%s2790_s4 + $0x10] sm:$0xff]  ;;  %vm351_vm6 = vcmask 39936   ;;  %vm412_vm7 = vcmask 7168   ;;  %vm531_vm8 = vcmask 1039360  }
   0x5   :  { %183 = vperm.xlu1 %2284, %v177_v6   ;;  %v2289_v10 = vld [vmem:[%s2787_s0 + $0x20] ss:$0 sps:$4 sm:$0xff]   ;;  %s2323_s0 = smov 5   ;;  %2111 = vmatprep.mubr.msk.bf16.mxu1 %vm2326_vm2, %v2325_v15  ;;  %v59_v33 = vld [vmem:[%s2789_s3 + $0x18] sm:$0xff]  ;;  %v764_v35 = vld [vmem:[%s2793_s6 + $0x8] sm:$0xff]  ;;  %vm653_vm9 = vcmask 998400  }
   0x6   :  { %v126_v11 = vsel %vm124_vm1, %v2289_v10, 0  ;;  %v2449_v21 = vld [vmem:[%s2791_s1] ss:$0 sm:$0xff]  ;;  %v180_v34 = vld [vmem:[%s2790_s4 + $0x18] sm:$0xff]  ;;  %v2292_v41 = vld [vmem:[%s2792_s5 + $0x8] sm:$0xff]   ;;  %vm592_vm10 = vcmask 1006592  }
   0x7   :  { %2098 = vmatpush3.bf16.msra.mxu0 %v2286_v2  ;;  %v763_v32 = vld [vmem:[%s2793_s6] sm:$0xff]  ;;  %v2294_v51 = vld [vmem:[%s2792_s5 + $0x18] sm:$0xff]   ;;  %v2295_v54 = vld [vmem:[%s2792_s5 + $0x10] sm:$0xff]   ;;  %vm714_vm11 = vcmask 990208  }
   0x8   :  { %2099 = vmatprep.subr.bf16.mxu0 %v2287_v3  ;;  %67 = vperm.xlu0 %2283, %v57_v8   ;;  %v2293_v46 = vld [vmem:[%s2792_s5] sm:$0xff]   ;;  %v2296_v57 = vld [vmem:[%s2792_s5 + $0x28] sm:$0xff]   ;;  %v2299_v63 = vld [vmem:[%s2792_s5 + $0x38] sm:$0xff]  }
   0x9   :  { %188 = vperm.xlu1 %2284, %v178_v9   ;;  %v2297_v61 = vld [vmem:[%s2792_s5 + $0x20] sm:$0xff]   ;;  %v2298_v0 = vld [vmem:[%s2792_s5 + $0x30] sm:$0xff]  }
   0xa   :  { %v2300_v5 = vld [vmem:[%s2792_s5 + $0x40] sm:$0xff]  }
   0xb   :  { %2100 = vmatpush3.bf16.msra.mxu0 %v2287_v3 }
   0xc   :  { %2101 = vmatprep.subr.bf16.mxu0 %v2288_v7  ;;  %231 = vrot.lane.b32.xlu0 %v2320_v1, %s2321_s18 }
   0xf   :  { %2102 = vmatpush3.bf16.msra.mxu0 %v2288_v7 }
  0x10   :  { %2271 = vmatprep.subr.msk.bf16.mxu0 %vm124_vm1, %v2289_v10  ;;  %288 = vrot.lane.b32.xlu0 %v2320_v1, %s2322_s21 }
  0x13   :  { %2104 = vmatpush3.bf16.msra.mxu0 %v126_v11 }
  0x14   :  { %347 = vrot.lane.b32.xlu0 %v2320_v1, %s2323_s0  ;;  %2127 = vmatprep.subr.bf16.mxu0 %v2325_v15 }
  0x16   :  { %2106 = vmatmul.mubr.msk.bf16.vlgmr.msra.gmra.mrb[0].mxu0 %vm117_vm0, %v2291_v12 }
  0x17   :  { %2129 = vmatprep.mubr.msk.bf16.mxu0 %vm2326_vm2, %v2325_v15 }
  0x18   :  { %408 = vrot.lane.b32.xlu0 %v2320_v1, %s2324_s22 }
  0x83   :  { %v63_v13 = vpop.permute.xlu0 %62 }
  0x84   :  { %v184_v14 = vpop.permute.xlu1 %183 }
  0x87   :  { %v68_v20 = vpop.permute.xlu0 %67 }
  0x88   :  { %v189_v25 = vpop.permute.xlu1 %188 }
  0x8b   :  { %v232_v36 = vpop.permute.xlu0 %231 }
  0x8f   :  { %v289_v37 = vpop.permute.xlu0 %288 }
  0x93   :  { %v348_v38 = vpop.permute.xlu0 %347 }
  0x97   :  { %v409_v44 = vpop.permute.xlu0 %408 }
  0xe9   :  { %v2438_v16 = vpop.f32.mrb[0].mxu0 }
  0xea   :  { %v162_v17 = vpop.f32.mrb[1].mxu0 }
  0xeb   :  { %v163_v18 = vadd.f32 %v162_v17, %v63_v13  ;;  %v2444_v19 = vpop.f32.mrb[2].mxu0 }
  0xec   :  { %v165_v22 = vpop.f32.mrb[3].mxu0 }
  0xed   :  { %v201_v23 = vmax.f32 %v163_v18, %v184_v14  ;;  %v166_v24 = vadd.f32 %v165_v22, %v68_v20 }
  0xef   :  { %v202_v26 = vmax.f32 %v166_v24, %v189_v25  ;;  %v211_v27 = vmul.f32 %v2449_v21, %v201_v23 }
  0xf1   :  { %v212_v28 = vmul.f32 %v2449_v21, %v202_v26 }
  0xf3   :  { %v2453_v29 = vpack.c.bf16 %v212_v28, %v211_v27 }
  0xf5   :  { %527 = vrot.lane.b32.xlu0 %v2453_v29, %s2327_s24  ;;  %233 = vrot.lane.b32.xlu1 %v2453_v29, %s2321_s18 }
  0xf9   :  { %588 = vrot.lane.b32.xlu0 %v2453_v29, %s2328_s25  ;;  %290 = vrot.lane.b32.xlu1 %v2453_v29, %s2322_s21 }
  0xfd   :  { %649 = vrot.lane.b32.xlu0 %v2453_v29, %s2329_s26  ;;  %349 = vrot.lane.b32.xlu1 %v2453_v29, %s2323_s0 }
 0x101   :  { %710 = vrot.lane.b32.xlu0 %v2453_v29, %s2330_s27  ;;  %410 = vrot.lane.b32.xlu1 %v2453_v29, %s2324_s22 }
 0x105   :  { %72 = vperm.xlu0 %2283, %v58_v30   ;;  %529 = vrot.lane.b32.xlu1 %v2320_v1, %s2327_s24 }
 0x109   :  { %193 = vperm.xlu0 %2283, %v179_v31   ;;  %590 = vrot.lane.b32.xlu1 %v2320_v1, %s2328_s25 }
 0x10d   :  { %767 = vperm.xlu0 %2283, %v763_v32   ;;  %651 = vrot.lane.b32.xlu1 %v2320_v1, %s2329_s26 }
 0x111   :  { %712 = vrot.lane.b32.xlu1 %v2320_v1, %s2330_s27  ;;  %799 = vrot.lane.b32.xlu0 %v2320_v1, %s2321_s18 }
 0x115   :  { %77 = vperm.xlu1 %2284, %v59_v33   ;;  %854 = vrot.lane.b32.xlu0 %v2320_v1, %s2322_s21 }
 0x119   :  { %198 = vperm.xlu1 %2284, %v180_v34   ;;  %912 = vrot.lane.b32.xlu0 %v2320_v1, %s2323_s0 }
 0x11d   :  { %772 = vperm.xlu1 %2284, %v764_v35   ;;  %972 = vrot.lane.b32.xlu0 %v2320_v1, %s2324_s22 }
 0x167   :  { %v234_v39 = vpop.permute.xlu1 %233  ;;  %v528_v47 = vpop.permute.xlu0 %527 }
 0x168   :  { %v236_v40 = vsel %vm235_vm3, %v232_v36, %v234_v39 }
 0x169   :  { %2110 = vmatpush3.bf16.msra.mxu1 %v236_v40 }
 0x16a   :  { %2115 = vmatprep.subr.bf16.mxu1 %v2325_v15 }
 0x16b   :  { %v291_v42 = vpop.permute.xlu1 %290  ;;  %v589_v55 = vpop.permute.xlu0 %588 }
 0x16c   :  { %v293_v43 = vsel %vm292_vm4, %v289_v37, %v291_v42  ;;  %2112 = vmatmul.mubr.msk.bf16.vlgmr.msra.gmra.mrb[0].mxu1 %vm238_vm5, %v2292_v41 }
 0x16d   :  { %2116 = vmatpush3.bf16.msra.mxu1 %v293_v43  ;;  %2117 = vmatprep.mubr.msk.bf16.mxu1 %vm2326_vm2, %v2325_v15 }
 0x16e   :  { %2121 = vmatprep.subr.bf16.mxu1 %v2325_v15 }
 0x16f   :  { %v350_v45 = vpop.permute.xlu1 %349  ;;  %v650_v58 = vpop.permute.xlu0 %649 }
 0x170   :  { %v352_v49 = vsel %vm351_vm6, %v348_v38, %v350_v45 }
 0x173   :  { %v411_v48 = vpop.permute.xlu1 %410  ;;  %v711_v3 = vpop.permute.xlu0 %710 }
 0x174   :  { %v413_v50 = vsel %vm412_vm7, %v409_v44, %v411_v48  ;;  %2118 = vmatmul.mubr.msk.bf16.vlgmr.msra.gmra.mrb[4].mxu1 %vm238_vm5, %v2293_v46 }
 0x175   :  { %2122 = vmatpush3.bf16.msra.mxu1 %v352_v49  ;;  %2128 = vmatpush3.bf16.msra.mxu0 %v413_v50 }
 0x176   :  { %2139 = vmatprep.subr.bf16.mxu0 %v2325_v15  ;;  %2123 = vmatprep.mubr.msk.bf16.mxu1 %vm2326_vm2, %v2325_v15 }
 0x177   :  { %v530_v52 = vpop.permute.xlu1 %529  ;;  %2133 = vmatprep.subr.bf16.mxu1 %v2325_v15 }
 0x178   :  { %v532_v53 = vsel %vm531_vm8, %v528_v47, %v530_v52  ;;  %2130 = vmatmul.mubr.msk.bf16.vlgmr.msra.gmra.mrb[4].mxu0 %vm238_vm5, %v2294_v51 }
 0x179   :  { %2140 = vmatpush3.bf16.msra.mxu0 %v532_v53  ;;  %2141 = vmatprep.mubr.msk.bf16.mxu0 %vm2326_vm2, %v2325_v15 }
 0x17a   :  { %2151 = vmatprep.subr.bf16.mxu0 %v2325_v15 }
 0x17b   :  { %v591_v56 = vpop.permute.xlu1 %590 }
 0x17c   :  { %2124 = vmatmul.mubr.msk.bf16.vlgmr.msra.gmra.mrb[8].mxu1 %vm238_vm5, %v2295_v54  ;;  %v593_v62 = vsel %vm592_vm10, %v589_v55, %v591_v56 }
 0x17d   :  { %2134 = vmatpush3.bf16.msra.mxu1 %v2453_v29  ;;  %2135 = vmatprep.mubr.msk.bf16.mxu1 %vm2326_vm2, %v2325_v15 }
 0x17e   :  { %2145 = vmatprep.subr.bf16.mxu1 %v2325_v15 }
 0x17f   :  { %v652_v59 = vpop.permute.xlu1 %651 }
 0x180   :  { %v654_v60 = vsel %vm653_vm9, %v650_v58, %v652_v59  ;;  %2142 = vmatmul.mubr.msk.bf16.vlgmr.msra.gmra.mrb[8].mxu0 %vm238_vm5, %v2296_v57 }
 0x181   :  { %2152 = vmatpush3.bf16.msra.mxu0 %v654_v60  ;;  %2153 = vmatprep.mubr.msk.bf16.mxu0 %vm2326_vm2, %v2325_v15 }
 0x182   :  { %2163 = vmatprep.subr.bf16.mxu0 %v2325_v15 }
 0x183   :  { %v713_v2 = vpop.permute.xlu1 %712 }
 0x184   :  { %2136 = vmatmul.mubr.msk.bf16.vlgmr.msra.gmra.mrb[12].mxu1 %vm238_vm5, %v2297_v61  ;;  %v715_v4 = vsel %vm714_vm11, %v711_v3, %v713_v2  ;;  %v73_v46 = vpop.permute.xlu0 %72 }
 0x185   :  { %2146 = vmatpush3.bf16.msra.mxu1 %v593_v62  ;;  %2147 = vmatprep.mubr.msk.bf16.mxu1 %vm2326_vm2, %v2325_v15  ;;  %v171_v58 = vadd.f32 %v2438_v16, %v73_v46 }
 0x186   :  { %2157 = vmatprep.subr.bf16.mxu1 %v2325_v15 }
 0x188   :  { %2154 = vmatmul.mubr.msk.bf16.vlgmr.msra.gmra.mrb[12].mxu0 %vm238_vm5, %v2299_v63  ;;  %v194_v57 = vpop.permute.xlu0 %193 }
 0x189   :  { %2165 = vmatprep.mubr.msk.bf16.mxu0 %vm2326_vm2, %v2325_v15  ;;  %v203_v61 = vmax.f32 %v171_v58, %v194_v57 }
 0x18c   :  { %2148 = vmatmul.mubr.msk.bf16.vlgmr.msra.gmra.mrb[16].mxu1 %vm238_vm5, %v2298_v0 }
 0x18d   :  { %2158 = vmatpush3.bf16.msra.mxu1 %v715_v4  ;;  %2159 = vmatprep.mubr.msk.bf16.mxu1 %vm2326_vm2, %v2325_v15  ;;  %v768_v4 = vpop.permute.xlu0 %767 }
 0x18e   :  { %2169 = vmatprep.subr.bf16.mxu1 %v2325_v15 }
 0x194   :  { %2160 = vmatmul.mubr.msk.bf16.vlgmr.msra.gmra.mrb[20].mxu1 %vm238_vm5, %v2300_v5  ;;  %v78_v49 = vpop.permute.xlu1 %77 }
 0x195   :  { %2171 = vmatprep.mubr.msk.bf16.mxu1 %vm2326_vm2, %v2325_v15  ;;  %v174_v62 = vadd.f32 %v2444_v19, %v78_v49 }
 0x198   :  { %v199_v60 = vpop.permute.xlu1 %198 }
 0x199   :  { %v204_v0 = vmax.f32 %v174_v62, %v199_v60 }
 0x23f   :  { %v276_v6 = vpop.f32.mrb[0].mxu1 }
 0x240   :  { %v2113_v7 = vpop.f32.mrb[1].mxu1 }
 0x241   :  { %v279_v8 = vpop.f32.mrb[2].mxu1 }
 0x242   :  { %v2114_v9 = vpop.f32.mrb[3].mxu1 }
 0x247   :  { %v332_v10 = vpop.f32.mrb[4].mxu1 }
 0x248   :  { %v333_v11 = vadd.f32 %v332_v10, %v276_v6  ;;  %v2119_v12 = vpop.f32.mrb[5].mxu1  ;;  %v213_v6 = vmul.f32 %v2449_v21, %v203_v61  ;;  %v773_v10 = vpop.permute.xlu1 %772 }
 0x249   :  { %v335_v13 = vpop.f32.mrb[6].mxu1 }
 0x24a   :  { %v336_v14 = vadd.f32 %v335_v13, %v279_v8  ;;  %v2120_v17 = vpop.f32.mrb[7].mxu1 }
 0x24b   :  { %v452_v18 = vpop.f32.mrb[4].mxu0 }
 0x24c   :  { %v2131_v20 = vpop.f32.mrb[5].mxu0 }
 0x24d   :  { %v455_v22 = vpop.f32.mrb[6].mxu0 }
 0x24e   :  { %v2132_v23 = vpop.f32.mrb[7].mxu0 }
 0x24f   :  { %v391_v24 = vpop.f32.mrb[8].mxu1  ;;  %v1323_v23 = vld [vmem:[%s2795_s8 + $0x8] sm:$0xff] }
 0x250   :  { %v398_v25 = vadd.f32 %v391_v24, %v333_v11  ;;  %v2125_v26 = vpop.f32.mrb[9].mxu1  ;;  %v214_v11 = vmul.f32 %v2449_v21, %v204_v0  ;;  %v800_v24 = vpop.permute.xlu0 %799 }
 0x251   :  { %v394_v27 = vpop.f32.mrb[10].mxu1 }
 0x252   :  { %v399_v28 = vadd.f32 %v394_v27, %v336_v14  ;;  %v459_v29 = vadd.f32 %v452_v18, %v398_v25  ;;  %v2126_v30 = vpop.f32.mrb[11].mxu1 }
 0x253   :  { %v571_v31 = vpop.f32.mrb[8].mxu0 }
 0x254   :  { %v460_v32 = vadd.f32 %v455_v22, %v399_v28  ;;  %v2143_v33 = vpop.f32.mrb[9].mxu0  ;;  %v1322_v22 = vld [vmem:[%s2795_s8] sm:$0xff]  ;;  %v855_v25 = vpop.permute.xlu0 %854 }
 0x255   :  { %v574_v34 = vpop.f32.mrb[10].mxu0  ;;  %v2302_v33 = vld [vmem:[%s2794_s7] sm:$0xff]  }
 0x256   :  { %v2144_v35 = vpop.f32.mrb[11].mxu0 }
 0x257   :  { %v506_v36 = vpop.f32.mrb[12].mxu1 }
 0x258   :  { %v513_v37 = vadd.f32 %v506_v36, %v459_v29  ;;  %v2137_v38 = vpop.f32.mrb[13].mxu1  ;;  %v913_v26 = vpop.permute.xlu0 %912  ;;  %v2301_v29 = vld [vmem:[%s2794_s7 + $0x8] sm:$0xff]   ;;  %v2303_v36 = vld [vmem:[%s2794_s7 + $0x10] sm:$0xff]  }
 0x259   :  { %v509_v39 = vpop.f32.mrb[14].mxu1 }
 0x25a   :  { %v514_v40 = vadd.f32 %v509_v39, %v460_v32  ;;  %v578_v41 = vadd.f32 %v571_v31, %v513_v37  ;;  %v2138_v42 = vpop.f32.mrb[15].mxu1 }
 0x25b   :  { %v693_v43 = vpop.f32.mrb[12].mxu0 }
 0x25c   :  { %v579_v44 = vadd.f32 %v574_v34, %v514_v40  ;;  %v2155_v45 = vpop.f32.mrb[13].mxu0  ;;  %v973_v30 = vpop.permute.xlu0 %972  ;;  %v2304_v40 = vld [vmem:[%s2794_s7 + $0x18] sm:$0xff]  }
 0x25d   :  { %v696_v47 = vpop.f32.mrb[14].mxu0 }
 0x25e   :  { %v2156_v48 = vpop.f32.mrb[15].mxu0 }
 0x25f   :  { %v632_v50 = vpop.f32.mrb[16].mxu1 }
 0x260   :  { %v639_v51 = vadd.f32 %v632_v50, %v578_v41  ;;  %v2149_v52 = vpop.f32.mrb[17].mxu1 }
 0x261   :  { %v635_v53 = vpop.f32.mrb[18].mxu1 }
 0x262   :  { %v640_v54 = vadd.f32 %v635_v53, %v579_v44  ;;  %v700_v55 = vadd.f32 %v693_v43, %v639_v51  ;;  %v2150_v56 = vpop.f32.mrb[19].mxu1  ;;  %v2305_v44 = vld [vmem:[%s2794_s7 + $0x20] sm:$0xff]   ;;  %v2307_v51 = vld [vmem:[%s2794_s7 + $0x30] sm:$0xff]  }
 0x263   :  { %v2309_v56 = vld [vmem:[%s2794_s7 + $0x40] sm:$0xff]  }
 0x264   :  { %v701_v59 = vadd.f32 %v696_v47, %v640_v54  ;;  %v2306_v47 = vld [vmem:[%s2794_s7 + $0x28] sm:$0xff]  }
 0x267   :  { %v754_v63 = vpop.f32.mrb[20].mxu1 }
 0x268   :  { %v761_v2 = vadd.f32 %v754_v63, %v700_v55  ;;  %v2161_v3 = vpop.f32.mrb[21].mxu1  ;;  %v2308_v55 = vld [vmem:[%s2794_s7 + $0x38] sm:$0xff]  }
 0x269   :  { %v757_v5 = vpop.f32.mrb[22].mxu1 }
 0x26a   :  { %v775_v7 = vadd.f32 %v768_v4, %v761_v2  ;;  %v762_v8 = vadd.f32 %v757_v5, %v701_v59  ;;  %v2162_v9 = vpop.f32.mrb[23].mxu1 }
 0x26c   :  { %v777_v16 = vadd.f32 %v775_v7, %v213_v6  ;;  %v776_v12 = vadd.f32 %v773_v10, %v762_v8 }
 0x26e   :  { %v779_v13 = vmax.f32 %v777_v16, 0.0  ;;  %v778_v14 = vadd.f32 %v776_v12, %v214_v11 }
 0x270   :  { %v780_v17 = vmax.f32 %v778_v14, 0.0  ;;  %v2582_v19 = vmul.f32 %v2449_v21, %v779_v13 }
 0x272   :  { %v2585_v18 = vmul.f32 %v2449_v21, %v780_v17 }
 0x274   :  { %v783_v20 = vpack.c.bf16 %v2585_v18, %v2582_v19 }
 0x276   :  { %1090 = vrot.lane.b32.xlu0 %v783_v20, %s2327_s24  ;;  %801 = vrot.lane.b32.xlu1 %v783_v20, %s2321_s18 }
 0x27a   :  { %1150 = vrot.lane.b32.xlu0 %v783_v20, %s2328_s25  ;;  %856 = vrot.lane.b32.xlu1 %v783_v20, %s2322_s21 }
 0x27e   :  { %1210 = vrot.lane.b32.xlu0 %v783_v20, %s2329_s26  ;;  %914 = vrot.lane.b32.xlu1 %v783_v20, %s2323_s0 }
 0x282   :  { %1270 = vrot.lane.b32.xlu0 %v783_v20, %s2330_s27  ;;  %974 = vrot.lane.b32.xlu1 %v783_v20, %s2324_s22 }
 0x286   :  { %1326 = vperm.xlu0 %2283, %v1322_v22   ;;  %1092 = vrot.lane.b32.xlu1 %v2320_v1, %s2327_s24 }
 0x28a   :  { %1152 = vrot.lane.b32.xlu1 %v2320_v1, %s2328_s25  ;;  %1356 = vrot.lane.b32.xlu0 %v2320_v1, %s2321_s18 }
 0x28e   :  { %1212 = vrot.lane.b32.xlu1 %v2320_v1, %s2329_s26  ;;  %1411 = vrot.lane.b32.xlu0 %v2320_v1, %s2322_s21 }
 0x292   :  { %1272 = vrot.lane.b32.xlu1 %v2320_v1, %s2330_s27  ;;  %1469 = vrot.lane.b32.xlu0 %v2320_v1, %s2323_s0 }
 0x296   :  { %1331 = vperm.xlu1 %2284, %v1323_v23   ;;  %1529 = vrot.lane.b32.xlu0 %v2320_v1, %s2324_s22 }
 0x2e8   :  { %v802_v27 = vpop.permute.xlu1 %801  ;;  %v1091_v37 = vpop.permute.xlu0 %1090 }
 0x2e9   :  { %v803_v28 = vsel %vm235_vm3, %v800_v24, %v802_v27 }
 0x2ea   :  { %2164 = vmatpush3.bf16.msra.mxu0 %v803_v28 }
 0x2eb   :  { %2175 = vmatprep.subr.bf16.mxu0 %v2325_v15 }
 0x2ec   :  { %v857_v31 = vpop.permute.xlu1 %856  ;;  %v1151_v41 = vpop.permute.xlu0 %1150 }
 0x2ed   :  { %v858_v32 = vsel %vm292_vm4, %v855_v25, %v857_v31  ;;  %2166 = vmatmul.mubr.msk.bf16.vlgmr.msra.gmra.mrb[16].mxu0 %vm238_vm5, %v2301_v29 }
 0x2ee   :  { %2170 = vmatpush3.bf16.msra.mxu1 %v858_v32  ;;  %2177 = vmatprep.mubr.msk.bf16.mxu0 %vm2326_vm2, %v2325_v15 }
 0x2ef   :  { %2181 = vmatprep.subr.bf16.mxu1 %v2325_v15 }
 0x2f0   :  { %v915_v34 = vpop.permute.xlu1 %914  ;;  %v1211_v48 = vpop.permute.xlu0 %1210 }
 0x2f1   :  { %v916_v35 = vsel %vm351_vm6, %v913_v26, %v915_v34  ;;  %2172 = vmatmul.mubr.msk.bf16.vlgmr.msra.gmra.mrb[24].mxu1 %vm238_vm5, %v2302_v33 }
 0x2f2   :  { %2176 = vmatpush3.bf16.msra.mxu0 %v916_v35  ;;  %2183 = vmatprep.mubr.msk.bf16.mxu1 %vm2326_vm2, %v2325_v15 }
 0x2f3   :  { %2187 = vmatprep.subr.bf16.mxu0 %v2325_v15 }
 0x2f4   :  { %v975_v38 = vpop.permute.xlu1 %974  ;;  %v1271_v52 = vpop.permute.xlu0 %1270 }
 0x2f5   :  { %v976_v39 = vsel %vm412_vm7, %v973_v30, %v975_v38  ;;  %2178 = vmatmul.mubr.msk.bf16.vlgmr.msra.gmra.mrb[20].mxu0 %vm238_vm5, %v2303_v36 }
 0x2f6   :  { %2182 = vmatpush3.bf16.msra.mxu1 %v976_v39  ;;  %2188 = vmatpush3.bf16.msra.mxu0 %v783_v20 }
 0x2f7   :  { %2193 = vmatprep.subr.bf16.mxu1 %v2325_v15  ;;  %2189 = vmatprep.mubr.msk.bf16.mxu0 %vm2326_vm2, %v2325_v15 }
 0x2f8   :  { %v1093_v42 = vpop.permute.xlu1 %1092  ;;  %2199 = vmatprep.subr.bf16.mxu0 %v2325_v15 }
 0x2f9   :  { %v1094_v43 = vsel %vm531_vm8, %v1091_v37, %v1093_v42  ;;  %2184 = vmatmul.mubr.msk.bf16.vlgmr.msra.gmra.mrb[28].mxu1 %vm238_vm5, %v2304_v40 }
 0x2fa   :  { %2194 = vmatpush3.bf16.msra.mxu1 %v1094_v43  ;;  %2195 = vmatprep.mubr.msk.bf16.mxu1 %vm2326_vm2, %v2325_v15 }
 0x2fb   :  { %2205 = vmatprep.subr.bf16.mxu1 %v2325_v15 }
 0x2fc   :  { %v1153_v45 = vpop.permute.xlu1 %1152 }
 0x2fd   :  { %v1154_v46 = vsel %vm592_vm10, %v1151_v41, %v1153_v45  ;;  %2190 = vmatmul.mubr.msk.bf16.vlgmr.msra.gmra.mrb[24].mxu0 %vm238_vm5, %v2305_v44 }
 0x2fe   :  { %2200 = vmatpush3.bf16.msra.mxu0 %v1154_v46  ;;  %2201 = vmatprep.mubr.msk.bf16.mxu0 %vm2326_vm2, %v2325_v15 }
 0x2ff   :  { %2211 = vmatprep.subr.bf16.mxu0 %v2325_v15 }
 0x300   :  { %v1213_v49 = vpop.permute.xlu1 %1212 }
 0x301   :  { %v1214_v50 = vsel %vm653_vm9, %v1211_v48, %v1213_v49  ;;  %2196 = vmatmul.mubr.msk.bf16.vlgmr.msra.gmra.mrb[32].mxu1 %vm238_vm5, %v2306_v47 }
 0x302   :  { %2206 = vmatpush3.bf16.msra.mxu1 %v1214_v50  ;;  %2207 = vmatprep.mubr.msk.bf16.mxu1 %vm2326_vm2, %v2325_v15 }
 0x303   :  { %2217 = vmatprep.subr.bf16.mxu1 %v2325_v15 }
 0x304   :  { %v1273_v53 = vpop.permute.xlu1 %1272 }
 0x305   :  { %v1274_v54 = vsel %vm714_vm11, %v1271_v52, %v1273_v53  ;;  %2202 = vmatmul.mubr.msk.bf16.vlgmr.msra.gmra.mrb[28].mxu0 %vm238_vm5, %v2307_v51  ;;  %v1327_v47 = vpop.permute.xlu0 %1326 }
 0x306   :  { %2212 = vmatpush3.bf16.msra.mxu0 %v1274_v54  ;;  %2213 = vmatprep.mubr.msk.bf16.mxu0 %vm2326_vm2, %v2325_v15 }
 0x307   :  { %2223 = vmatprep.subr.bf16.mxu0 %v2325_v15 }
 0x309   :  { %2208 = vmatmul.mubr.msk.bf16.vlgmr.msra.gmra.mrb[36].mxu1 %vm238_vm5, %v2308_v55 }
 0x30a   :  { %2219 = vmatprep.mubr.msk.bf16.mxu1 %vm2326_vm2, %v2325_v15 }
 0x30d   :  { %2214 = vmatmul.mubr.msk.bf16.vlgmr.msra.gmra.mrb[32].mxu0 %vm238_vm5, %v2309_v56 }
 0x30e   :  { %2225 = vmatprep.mubr.msk.bf16.mxu0 %vm2326_vm2, %v2325_v15 }
 0x315   :  { %v1332_v52 = vpop.permute.xlu1 %1331 }
 0x3c0   :  { %v842_v57 = vpop.f32.mrb[16].mxu0 }
 0x3c1   :  { %v2167_v58 = vpop.f32.mrb[17].mxu0 }
 0x3c2   :  { %v845_v59 = vpop.f32.mrb[18].mxu0 }
 0x3c3   :  { %v2168_v60 = vpop.f32.mrb[19].mxu0 }
 0x3c4   :  { %v897_v61 = vpop.f32.mrb[24].mxu1  ;;  %v1357_v60 = vpop.permute.xlu0 %1356 }
 0x3c5   :  { %v898_v62 = vadd.f32 %v897_v61, %v842_v57  ;;  %v2173_v63 = vpop.f32.mrb[25].mxu1 }
 0x3c6   :  { %v900_v0 = vpop.f32.mrb[26].mxu1 }
 0x3c7   :  { %v901_v2 = vadd.f32 %v900_v0, %v845_v59  ;;  %v2174_v3 = vpop.f32.mrb[27].mxu1  ;;  %v1880_v59 = vld [vmem:[%s2797_s10 + $0x8] sm:$0xff] }
 0x3c8   :  { %v955_v4 = vpop.f32.mrb[20].mxu0  ;;  %v1412_v61 = vpop.permute.xlu0 %1411 }
 0x3c9   :  { %v962_v5 = vadd.f32 %v955_v4, %v898_v62  ;;  %v2179_v6 = vpop.f32.mrb[21].mxu0 }
 0x3ca   :  { %v958_v7 = vpop.f32.mrb[22].mxu0 }
 0x3cb   :  { %v963_v8 = vadd.f32 %v958_v7, %v901_v2  ;;  %v2180_v9 = vpop.f32.mrb[23].mxu0  ;;  %v2310_v2 = vld [vmem:[%s2796_s9 + $0x8] sm:$0xff]  }
 0x3cc   :  { %v1015_v10 = vpop.f32.mrb[28].mxu1  ;;  %v1470_v62 = vpop.permute.xlu0 %1469 }
 0x3cd   :  { %v1022_v11 = vadd.f32 %v1015_v10, %v962_v5  ;;  %v2185_v16 = vpop.f32.mrb[29].mxu1  ;;  %v2311_v5 = vld [vmem:[%s2796_s9] sm:$0xff]  }
 0x3ce   :  { %v1018_v12 = vpop.f32.mrb[30].mxu1  ;;  %v2313_v16 = vld [vmem:[%s2796_s9 + $0x18] sm:$0xff]  }
 0x3cf   :  { %v1023_v13 = vadd.f32 %v1018_v12, %v963_v8  ;;  %v2186_v14 = vpop.f32.mrb[31].mxu1  ;;  %v2312_v8 = vld [vmem:[%s2796_s9 + $0x10] sm:$0xff]  }
 0x3d0   :  { %v1069_v17 = vpop.f32.mrb[24].mxu0  ;;  %v1530_v3 = vpop.permute.xlu0 %1529 }
 0x3d1   :  { %v1076_v20 = vadd.f32 %v1069_v17, %v1022_v11  ;;  %v2191_v22 = vpop.f32.mrb[25].mxu0  ;;  %v2314_v17 = vld [vmem:[%s2796_s9 + $0x20] sm:$0xff]  }
 0x3d2   :  { %v1072_v23 = vpop.f32.mrb[26].mxu0 }
 0x3d3   :  { %v1077_v24 = vadd.f32 %v1072_v23, %v1023_v13  ;;  %v2192_v25 = vpop.f32.mrb[27].mxu0  ;;  %v2315_v23 = vld [vmem:[%s2796_s9 + $0x28] sm:$0xff]  }
 0x3d4   :  { %v1133_v26 = vpop.f32.mrb[32].mxu1 }
 0x3d5   :  { %v1140_v27 = vadd.f32 %v1133_v26, %v1076_v20  ;;  %v2197_v28 = vpop.f32.mrb[33].mxu1 }
 0x3d6   :  { %v1136_v29 = vpop.f32.mrb[34].mxu1 }
 0x3d7   :  { %v1141_v30 = vadd.f32 %v1136_v29, %v1077_v24  ;;  %v2198_v31 = vpop.f32.mrb[35].mxu1 }
 0x3d8   :  { %v1193_v32 = vpop.f32.mrb[28].mxu0  ;;  %v2317_v31 = vld [vmem:[%s2796_s9 + $0x38] sm:$0xff]  }
 0x3d9   :  { %v1200_v33 = vadd.f32 %v1193_v32, %v1140_v27  ;;  %v2203_v34 = vpop.f32.mrb[29].mxu0  ;;  %v2316_v27 = vld [vmem:[%s2796_s9 + $0x30] sm:$0xff]   ;;  %v2318_v32 = vld [vmem:[%s2796_s9 + $0x40] sm:$0xff]  }
 0x3da   :  { %v1196_v35 = vpop.f32.mrb[30].mxu0 }
 0x3db   :  { %v1201_v36 = vadd.f32 %v1196_v35, %v1141_v30  ;;  %v2204_v37 = vpop.f32.mrb[31].mxu0 }
 0x3dc   :  { %v1253_v38 = vpop.f32.mrb[36].mxu1 }
 0x3dd   :  { %v1260_v39 = vadd.f32 %v1253_v38, %v1200_v33  ;;  %v2209_v40 = vpop.f32.mrb[37].mxu1 }
 0x3de   :  { %v1256_v41 = vpop.f32.mrb[38].mxu1 }
 0x3df   :  { %v1261_v42 = vadd.f32 %v1256_v41, %v1201_v36  ;;  %v2210_v43 = vpop.f32.mrb[39].mxu1 }
 0x3e0   :  { %v1313_v44 = vpop.f32.mrb[32].mxu0 }
 0x3e1   :  { %v1320_v45 = vadd.f32 %v1313_v44, %v1260_v39  ;;  %v2215_v46 = vpop.f32.mrb[33].mxu0 }
 0x3e2   :  { %v1316_v48 = vpop.f32.mrb[34].mxu0 }
 0x3e3   :  { %v1334_v49 = vadd.f32 %v1327_v47, %v1320_v45  ;;  %v1321_v50 = vadd.f32 %v1316_v48, %v1261_v42  ;;  %v2216_v51 = vpop.f32.mrb[35].mxu0 }
 0x3e5   :  { %v1336_v53 = vmax.f32 %v1334_v49, 0.0  ;;  %v1335_v54 = vadd.f32 %v1332_v52, %v1321_v50 }
 0x3e7   :  { %v1337_v55 = vmax.f32 %v1335_v54, 0.0  ;;  %v1338_v56 = vmul.f32 %v2449_v21, %v1336_v53 }
 0x3e9   :  { %v1339_v57 = vmul.f32 %v2449_v21, %v1337_v55  ;;  %v1879_v21 = vld [vmem:[%s2797_s10] sm:$0xff] }
 0x3eb   :  { %v1340_v58 = vpack.c.bf16 %v1339_v57, %v1338_v56 }
 0x3ed   :  { %1647 = vrot.lane.b32.xlu0 %v1340_v58, %s2327_s24  ;;  %1358 = vrot.lane.b32.xlu1 %v1340_v58, %s2321_s18 }
 0x3f1   :  { %1707 = vrot.lane.b32.xlu0 %v1340_v58, %s2328_s25  ;;  %1413 = vrot.lane.b32.xlu1 %v1340_v58, %s2322_s21 }
 0x3f5   :  { %1767 = vrot.lane.b32.xlu0 %v1340_v58, %s2329_s26  ;;  %1471 = vrot.lane.b32.xlu1 %v1340_v58, %s2323_s0 }
 0x3f9   :  { %1827 = vrot.lane.b32.xlu0 %v1340_v58, %s2330_s27  ;;  %1531 = vrot.lane.b32.xlu1 %v1340_v58, %s2324_s22 }
 0x3fd   :  { %1883 = vperm.xlu0 %2283, %v1879_v21   ;;  %1649 = vrot.lane.b32.xlu1 %v2320_v1, %s2327_s24 }
 0x401   :  { %1709 = vrot.lane.b32.xlu1 %v2320_v1, %s2328_s25 }
 0x405   :  { %1769 = vrot.lane.b32.xlu1 %v2320_v1, %s2329_s26 }
 0x409   :  { %1829 = vrot.lane.b32.xlu1 %v2320_v1, %s2330_s27 }
 0x40d   :  { %1888 = vperm.xlu1 %2284, %v1880_v59  }
 0x45f   :  { %v1359_v63 = vpop.permute.xlu1 %1358  ;;  %v1648_v9 = vpop.permute.xlu0 %1647 }
 0x460   :  { %v1360_v0 = vsel %vm235_vm3, %v1357_v60, %v1359_v63 }
 0x461   :  { %2218 = vmatpush3.bf16.msra.mxu1 %v1360_v0 }
 0x462   :  { %2229 = vmatprep.subr.bf16.mxu1 %v2325_v15 }
 0x463   :  { %v1414_v1 = vpop.permute.xlu1 %1413  ;;  %v1708_v12 = vpop.permute.xlu0 %1707 }
 0x464   :  { %v1415_v4 = vsel %vm292_vm4, %v1412_v61, %v1414_v1  ;;  %2220 = vmatmul.mubr.msk.bf16.vlgmr.msra.gmra.mrb[40].mxu1 %vm238_vm5, %v2310_v2 }
 0x465   :  { %2224 = vmatpush3.bf16.msra.mxu0 %v1415_v4  ;;  %2231 = vmatprep.mubr.msk.bf16.mxu1 %vm2326_vm2, %v2325_v15 }
 0x466   :  { %2235 = vmatprep.subr.bf16.mxu0 %v2325_v15 }
 0x467   :  { %v1472_v6 = vpop.permute.xlu1 %1471  ;;  %v1768_v24 = vpop.permute.xlu0 %1767 }
 0x468   :  { %v1473_v7 = vsel %vm351_vm6, %v1470_v62, %v1472_v6  ;;  %2226 = vmatmul.mubr.msk.bf16.vlgmr.msra.gmra.mrb[36].mxu0 %vm238_vm5, %v2311_v5 }
 0x469   :  { %2230 = vmatpush3.bf16.msra.mxu1 %v1473_v7  ;;  %2237 = vmatprep.mubr.msk.bf16.mxu0 %vm2326_vm2, %v2325_v15 }
 0x46a   :  { %2241 = vmatprep.subr.bf16.mxu1 %v2325_v15 }
 0x46b   :  { %v1532_v10 = vpop.permute.xlu1 %1531  ;;  %v1828_v28 = vpop.permute.xlu0 %1827 }
 0x46c   :  { %v1533_v11 = vsel %vm412_vm7, %v1530_v3, %v1532_v10  ;;  %2232 = vmatmul.mubr.msk.bf16.vlgmr.msra.gmra.mrb[44].mxu1 %vm238_vm5, %v2312_v8 }
 0x46d   :  { %2236 = vmatpush3.bf16.msra.mxu0 %v1533_v11  ;;  %2242 = vmatpush3.bf16.msra.mxu1 %v1340_v58 }
 0x46e   :  { %2247 = vmatprep.subr.bf16.mxu0 %v2325_v15  ;;  %2243 = vmatprep.mubr.msk.bf16.mxu1 %vm2326_vm2, %v2325_v15 }
 0x46f   :  { %v1650_v13 = vpop.permute.xlu1 %1649  ;;  %2253 = vmatprep.subr.bf16.mxu1 %v2325_v15 }
 0x470   :  { %v1651_v14 = vsel %vm531_vm8, %v1648_v9, %v1650_v13  ;;  %2238 = vmatmul.mubr.msk.bf16.vlgmr.msra.gmra.mrb[40].mxu0 %vm238_vm5, %v2313_v16 }
 0x471   :  { %2248 = vmatpush3.bf16.msra.mxu0 %v1651_v14  ;;  %2249 = vmatprep.mubr.msk.bf16.mxu0 %vm2326_vm2, %v2325_v15 }
 0x472   :  { %2259 = vmatprep.subr.bf16.mxu0 %v2325_v15 }
 0x473   :  { %v1710_v20 = vpop.permute.xlu1 %1709 }
 0x474   :  { %v1711_v22 = vsel %vm592_vm10, %v1708_v12, %v1710_v20  ;;  %2244 = vmatmul.mubr.msk.bf16.vlgmr.msra.gmra.mrb[48].mxu1 %vm238_vm5, %v2314_v17 }
 0x475   :  { %2254 = vmatpush3.bf16.msra.mxu1 %v1711_v22  ;;  %2255 = vmatprep.mubr.msk.bf16.mxu1 %vm2326_vm2, %v2325_v15 }
 0x476   :  { %2265 = vmatprep.subr.bf16.mxu1 %v2325_v15 }
 0x477   :  { %v1770_v25 = vpop.permute.xlu1 %1769 }
 0x478   :  { %v1771_v26 = vsel %vm653_vm9, %v1768_v24, %v1770_v25  ;;  %2250 = vmatmul.mubr.msk.bf16.vlgmr.msra.gmra.mrb[44].mxu0 %vm238_vm5, %v2315_v23 }
 0x479   :  { %2260 = vmatpush3.bf16.msra.mxu0 %v1771_v26  ;;  %2261 = vmatprep.mubr.msk.bf16.mxu0 %vm2326_vm2, %v2325_v15 }
 0x47b   :  { %v1830_v29 = vpop.permute.xlu1 %1829 }
 0x47c   :  { %v1831_v30 = vsel %vm714_vm11, %v1828_v28, %v1830_v29  ;;  %2256 = vmatmul.mubr.msk.bf16.vlgmr.msra.gmra.mrb[52].mxu1 %vm238_vm5, %v2316_v27  ;;  %v1884_v17 = vpop.permute.xlu0 %1883 }
 0x47d   :  { %2266 = vmatpush3.bf16.msra.mxu1 %v1831_v30  ;;  %2267 = vmatprep.mubr.msk.bf16.mxu1 %vm2326_vm2, %v2325_v15 }
 0x480   :  { %2262 = vmatmul.mubr.msk.bf16.vlgmr.msra.gmra.mrb[48].mxu0 %vm238_vm5, %v2317_v31  ;;  %v2319_v31 = vld [vmem:[%s2791_s1] ss:$0 sm:$0xff] }
 0x484   :  { %2268 = vmatmul.mubr.msk.bf16.vlgmr.msra.gmra.mrb[56].mxu1 %vm238_vm5, %v2318_v32 }
 0x48c   :  { %v1889_v25 = vpop.permute.xlu1 %1888 }
 0x537   :  { %v1399_v33 = vpop.f32.mrb[40].mxu1 }
 0x538   :  { %v2221_v34 = vpop.f32.mrb[41].mxu1 }
 0x539   :  { %v1402_v35 = vpop.f32.mrb[42].mxu1 }
 0x53a   :  { %v2222_v36 = vpop.f32.mrb[43].mxu1 }
 0x53b   :  { %v1454_v37 = vpop.f32.mrb[36].mxu0 }
 0x53c   :  { %v1455_v38 = vadd.f32 %v1454_v37, %v1399_v33  ;;  %v2227_v39 = vpop.f32.mrb[37].mxu0 }
 0x53d   :  { %v1457_v40 = vpop.f32.mrb[38].mxu0 }
 0x53e   :  { %v1458_v41 = vadd.f32 %v1457_v40, %v1402_v35  ;;  %v2228_v42 = vpop.f32.mrb[39].mxu0 }
 0x53f   :  { %v1512_v43 = vpop.f32.mrb[44].mxu1 }
 0x540   :  { %v1519_v15 = vadd.f32 %v1512_v43, %v1455_v38  ;;  %v2233_v44 = vpop.f32.mrb[45].mxu1 }
 0x541   :  { %v1515_v45 = vpop.f32.mrb[46].mxu1 }
 0x542   :  { %v1520_v46 = vadd.f32 %v1515_v45, %v1458_v41  ;;  %v2234_v47 = vpop.f32.mrb[47].mxu1 }
 0x543   :  { %v1572_v48 = vpop.f32.mrb[40].mxu0 }
 0x544   :  { %v1579_v49 = vadd.f32 %v1572_v48, %v1519_v15  ;;  %v2239_v50 = vpop.f32.mrb[41].mxu0 }
 0x545   :  { %v1575_v51 = vpop.f32.mrb[42].mxu0 }
 0x546   :  { %v1580_v52 = vadd.f32 %v1575_v51, %v1520_v46  ;;  %v2240_v53 = vpop.f32.mrb[43].mxu0 }
 0x547   :  { %v1626_v54 = vpop.f32.mrb[48].mxu1 }
 0x548   :  { %v1633_v55 = vadd.f32 %v1626_v54, %v1579_v49  ;;  %v2245_v56 = vpop.f32.mrb[49].mxu1 }
 0x549   :  { %v1629_v57 = vpop.f32.mrb[50].mxu1 }
 0x54a   :  { %v1634_v58 = vadd.f32 %v1629_v57, %v1580_v52  ;;  %v2246_v21 = vpop.f32.mrb[51].mxu1 }
 0x54b   :  { %v1690_v59 = vpop.f32.mrb[44].mxu0 }
 0x54c   :  { %v1697_v60 = vadd.f32 %v1690_v59, %v1633_v55  ;;  %v2251_v61 = vpop.f32.mrb[45].mxu0 }
 0x54d   :  { %v1693_v62 = vpop.f32.mrb[46].mxu0 }
 0x54e   :  { %v1698_v63 = vadd.f32 %v1693_v62, %v1634_v58  ;;  %v2252_v0 = vpop.f32.mrb[47].mxu0 }
 0x54f   :  { %v1750_v2 = vpop.f32.mrb[52].mxu1 }
 0x550   :  { %v1757_v3 = vadd.f32 %v1750_v2, %v1697_v60  ;;  %v2257_v1 = vpop.f32.mrb[53].mxu1 }
 0x551   :  { %v1753_v4 = vpop.f32.mrb[54].mxu1 }
 0x552   :  { %v1758_v5 = vadd.f32 %v1753_v4, %v1698_v63  ;;  %v2258_v6 = vpop.f32.mrb[55].mxu1 }
 0x553   :  { %v1810_v7 = vpop.f32.mrb[48].mxu0 }
 0x554   :  { %v1817_v8 = vadd.f32 %v1810_v7, %v1757_v3  ;;  %v2263_v9 = vpop.f32.mrb[49].mxu0 }
 0x555   :  { %v1813_v10 = vpop.f32.mrb[50].mxu0 }
 0x556   :  { %v1818_v11 = vadd.f32 %v1813_v10, %v1758_v5  ;;  %v2264_v16 = vpop.f32.mrb[51].mxu0 }
 0x557   :  { %v1870_v12 = vpop.f32.mrb[56].mxu1 }
 0x558   :  { %v1877_v13 = vadd.f32 %v1870_v12, %v1817_v8  ;;  %v2269_v14 = vpop.f32.mrb[57].mxu1 }
 0x559   :  { %v1873_v20 = vpop.f32.mrb[58].mxu1 }
 0x55a   :  { %v1891_v22 = vadd.f32 %v1884_v17, %v1877_v13  ;;  %v1878_v23 = vadd.f32 %v1873_v20, %v1818_v11  ;;  %v2270_v24 = vpop.f32.mrb[59].mxu1 }
 0x55c   :  { %v1893_v26 = vadd.f32 %v1891_v22, %v2582_v19  ;;  %v1892_v27 = vadd.f32 %v1889_v25, %v1878_v23 }
 0x55e   :  { %v1895_v28 = vmax.f32 %v1893_v26, 0.0  ;;  %v1894_v29 = vadd.f32 %v1892_v27, %v2585_v18 }
 0x560   :  { %v1896_v30 = vmax.f32 %v1894_v29, 0.0  ;;  %v1897_v32 = vmul.f32 %v2319_v31, %v1895_v28 }
 0x562   :  { %v1898_v33 = vmul.f32 %v2319_v31, %v1896_v30 }
 0x564   :  { %v2032_v34 = vpack.c.bf16 %v1898_v33, %v1897_v32 }
 0x566   :  { %2033 = vst [vmem:[%s2798_s11] sm:$0xff] %v2032_v34  }

// kernel: feature_extractor.7
= control target key start
LH: loop header
LB: loop body
LE: loop exit
PB: predicated region body
PF: predicated region fallthrough
CT: control target
= control target key end

     0   :  { %v3553_v0 = vmov 0   ;;  %vm210_vm0 = vcmask 130048   ;;  %s3554_s13 = smov 5   ;;  %s3555_s20 = smov 3   ;;  %vm402_vm1 = vcmask 261120   ;;  %vm476_vm2 = vcmask 39936   ;;  %s4318_s0 = inlined_call_operand.vmem [shape: bf16[144,128], index: 0, kind: input, shape index: {}]   ;;  %s4319_s2 = inlined_call_operand.vmem [shape: bf16[64,144], index: 2, kind: input, shape index: {}]   ;;  %s4320_s4 = inlined_call_operand.vmem [shape: f32[64,1], index: 4, kind: input, shape index: {}]   ;;  %s4321_s3 = inlined_call_operand.vmem [shape: f32[64,1], index: 3, kind: input, shape index: {}]   ;;  %s4322_s1 = inlined_call_operand.vmem [shape: f32[1,128], index: 1, kind: input, shape index: {}]   ;;  %s4323_s5 = inlined_call_operand.vmem [shape: bf16[9,32,32], index: 5, kind: input, shape index: {}]   ;;  %s4324_s6 = inlined_call_operand.vmem [shape: f32[32,1], index: 6, kind: input, shape index: {}]   ;;  %s4325_s7 = inlined_call_operand.vmem [shape: bf16[9,32,32], index: 7, kind: input, shape index: {}]   ;;  %s4326_s8 = inlined_call_operand.vmem [shape: f32[32,1], index: 8, kind: input, shape index: {}]   ;;  %s4327_s9 = inlined_call_operand.vmem [shape: bf16[9,32,32], index: 9, kind: input, shape index: {}]   ;;  %s4328_s10 = inlined_call_operand.vmem [shape: f32[32,1], index: 10, kind: input, shape index: {}]   ;;  %s4329_s11 = inlined_call_operand.vmem [shape: f32[32,128], index: 11, kind: output, shape index: {}]  }
   0x1   :  { %223 = vmatprep.subr.bf16.mxu0 %v3553_v0  ;;  %v3477_v1 = vld [vmem:[%s4318_s0] sm:$0xff]   ;;  %3466 = vset.pattern.permute.xlu1 %v3553_v0  ;;  %v3478_v2 = vld [vmem:[%s4318_s0 + $0x8] sm:$0xff]   ;;  %v3479_v3 = vld [vmem:[%s4318_s0 + $0x10] sm:$0xff]   ;;  %s3556_s30 = smov 1   ;;  %s3557_s16 = smov 127   ;;  %vm559_vm3 = vcmask 23552  }
   0x2   :  { %3465 = vset.pattern.permute.xlu0 %v3553_v0  ;;  %224 = vmatpush1.bf16.msra.mxu0 %v3477_v1  ;;  %v3480_v4 = vld [vmem:[%s4318_s0 + $0x18] sm:$0xff]   ;;  %v3488_v5 = vld [vmem:[%s4319_s2 + $0x4] ss:$8 sps:$4 sm:$0xff]   ;;  %v74_v13 = vld [vmem:[%s4321_s3 + $0x10] sm:$0xff]  ;;  %s3558_s17 = smov 125   ;;  %s3559_s18 = smov 124  }
   0x3   :  { %225 = vmatprep.subr.bf16.mxu0 %v3553_v0  ;;  %v288_v6 = vld [vmem:[%s4320_s4] sm:$0xff]  ;;  %2827 = vmatprep.mubr.msk.bf16.mxu0 %vm210_vm0, %v3488_v5  ;;  %v289_v9 = vld [vmem:[%s4320_s4 + $0x8] sm:$0xff]  ;;  %v75_v11 = vld [vmem:[%s4321_s3 + $0x18] sm:$0xff]  ;;  %s3560_s19 = smov 4   ;;  %vm646_vm4 = vcmask 7168   ;;  %vm815_vm5 = vcmask 1039360  }
   0x4   :  { %298 = vperm.xlu1 %3466, %v288_v6   ;;  %v72_v7 = vld [vmem:[%s4321_s3] sm:$0xff]  ;;  %v73_v10 = vld [vmem:[%s4321_s3 + $0x8] sm:$0xff]  ;;  %v291_v14 = vld [vmem:[%s4320_s4 + $0x18] sm:$0xff]  ;;  %vm397_vm6 = vcmask 31744   ;;  %vm902_vm7 = vcmask 1022976   ;;  %vm989_vm8 = vcmask 1014784  }
   0x5   :  { %v3481_v8 = vld [vmem:[%s4318_s0 + $0x20] sm:$0xff]   ;;  %82 = vperm.xlu0 %3465, %v72_v7   ;;  %v3482_v12 = vld [vmem:[%s4318_s0 + $0x28] sm:$0xff]   ;;  %v3483_v15 = vld [vmem:[%s4318_s0 + $0x30] sm:$0xff]   ;;  %vm1076_vm9 = vcmask 1006592  }
   0x6   :  { %226 = vmatpush1.bf16.msra.mxu0 %v3478_v2  ;;  %v290_v16 = vld [vmem:[%s4320_s4 + $0x10] sm:$0xff]  ;;  %v3484_v17 = vld [vmem:[%s4318_s0 + $0x38] sm:$0xff]   ;;  %v3485_v18 = vld [vmem:[%s4318_s0 + $0x40] sm:$0xff]   ;;  %s3561_s0 = smov 123  }
   0x7   :  { %227 = vmatprep.subr.bf16.mxu0 %v3553_v0  ;;  %v3486_v19 = vld [vmem:[%s4319_s2] ss:$8 sps:$4 sm:$0xff]   ;;  %v3489_v20 = vld [vmem:[%s4319_s2 + $0x14] ss:$8 sps:$4 sm:$0xff]   ;;  %v3491_v21 = vld [vmem:[%s4319_s2 + $0x10] ss:$8 sps:$4 sm:$0xff]  }
   0x8   :  { %303 = vperm.xlu1 %3466, %v289_v9   ;;  %v3492_v22 = vld [vmem:[%s4319_s2 + $0x24] ss:$8 sps:$4 sm:$0xff]   ;;  %v3494_v23 = vld [vmem:[%s4319_s2 + $0x20] ss:$8 sps:$4 sm:$0xff]   ;;  %v3495_v24 = vld [vmem:[%s4319_s2 + $0x34] ss:$8 sps:$4 sm:$0xff]  }
   0x9   :  { %87 = vperm.xlu0 %3465, %v73_v10   ;;  %v3497_v25 = vld [vmem:[%s4319_s2 + $0x30] ss:$8 sps:$4 sm:$0xff]   ;;  %v3727_v38 = vld [vmem:[%s4322_s1] ss:$0 sm:$0xff]  ;;  %v77_v7 = vld [vmem:[%s4321_s3 + $0x28] sm:$0xff] }
   0xa   :  { %228 = vmatpush1.bf16.msra.mxu0 %v3479_v3  ;;  %v3498_v44 = vld [vmem:[%s4323_s5] sm:$0xff]   ;;  %v78_v62 = vld [vmem:[%s4321_s3 + $0x30] sm:$0xff]  ;;  %v79_v9 = vld [vmem:[%s4321_s3 + $0x38] sm:$0xff] }
   0xb   :  { %229 = vmatprep.subr.bf16.mxu0 %v3553_v0  ;;  %3156 = vmatprep.mubr.msk.bf16.mxu1 %vm402_vm1, %v3498_v44  ;;  %v76_v58 = vld [vmem:[%s4321_s3 + $0x20] sm:$0xff]  ;;  %v294_v5 = vld [vmem:[%s4320_s4 + $0x30] sm:$0xff] }
   0xc   :  { %97 = vperm.xlu1 %3466, %v75_v11   ;;  %v292_v61 = vld [vmem:[%s4320_s4 + $0x20] sm:$0xff]  ;;  %v1142_v6 = vld [vmem:[%s4324_s6 + $0x10] sm:$0xff] }
   0xd   :  { %92 = vperm.xlu0 %3465, %v74_v13   ;;  %v1140_v3 = vld [vmem:[%s4324_s6] sm:$0xff]  ;;  %v295_v13 = vld [vmem:[%s4320_s4 + $0x38] sm:$0xff] }
   0xe   :  { %230 = vmatpush1.bf16.msra.mxu0 %v3480_v4 }
   0xf   :  { %231 = vmatprep.subr.bf16.mxu0 %v3553_v0 }
  0x10   :  { %313 = vperm.xlu1 %3466, %v291_v14   ;;  %v3512_v14 = vld [vmem:[%s4323_s5 + $0x10] sm:$0xff]  }
  0x11   :  { %308 = vperm.xlu0 %3465, %v290_v16  }
  0x12   :  { %232 = vmatpush1.bf16.msra.mxu0 %v3481_v8  ;;  %v293_v8 = vld [vmem:[%s4320_s4 + $0x28] sm:$0xff] }
  0x13   :  { %233 = vmatprep.subr.bf16.mxu0 %v3553_v0 }
  0x15   :  { %468 = vrot.lane.b32.xlu0 %v3553_v0, %s3554_s13 }
  0x16   :  { %234 = vmatpush1.bf16.msra.mxu0 %v3482_v12  ;;  %v1141_v12 = vld [vmem:[%s4324_s6 + $0x8] sm:$0xff] }
  0x17   :  { %235 = vmatprep.subr.bf16.mxu0 %v3553_v0 }
  0x19   :  { %472 = vrot.lane.b32.xlu0 %v3553_v0, %s3554_s13 }
  0x1a   :  { %236 = vmatpush1.bf16.msra.mxu0 %v3483_v15  ;;  %v1143_v15 = vld [vmem:[%s4324_s6 + $0x18] sm:$0xff] }
  0x1b   :  { %237 = vmatprep.subr.bf16.mxu0 %v3553_v0 }
  0x1d   :  { %551 = vrot.lane.b32.xlu0 %v3553_v0, %s3555_s20 }
  0x1e   :  { %238 = vmatpush1.bf16.msra.mxu0 %v3484_v17 }
  0x1f   :  { %239 = vmatprep.subr.bf16.mxu0 %v3553_v0 }
  0x21   :  { %555 = vrot.lane.b32.xlu0 %v3553_v0, %s3555_s20 }
  0x22   :  { %240 = vmatpush1.bf16.msra.mxu0 %v3485_v18 }
  0x25   :  { %256 = vmatmul.mubr.bf16.vlgmr.msra.gmra.mrb[0].mxu0 %v3486_v19  ;;  %638 = vrot.lane.b32.xlu0 %v3553_v0, %s3556_s30 }
  0x26   :  { %2828 = vmatprep.mubr.msk.bf16.mxu0 %vm210_vm0, %v3489_v20 }
  0x29   :  { %642 = vrot.lane.b32.xlu0 %v3553_v0, %s3556_s30 }
  0x2d   :  { %264 = vmatmul.mubr.bf16.gmra.mrb[4].mxu0 %v3491_v21 }
  0x2e   :  { %2829 = vmatprep.mubr.msk.bf16.mxu0 %vm210_vm0, %v3492_v22 }
  0x35   :  { %272 = vmatmul.mubr.bf16.gmra.mrb[8].mxu0 %v3494_v23 }
  0x36   :  { %2830 = vmatprep.mubr.msk.bf16.mxu0 %vm210_vm0, %v3495_v24 }
  0x3d   :  { %280 = vmatmul.mubr.bf16.gmra.mrb[12].mxu0 %v3497_v25 }
  0x3e   :  { %3148 = vmatprep.mubr.msk.bf16.mxu0 %vm402_vm1, %v3512_v14  ;;  %v3510_v14 = vld [vmem:[%s4323_s5 + $0x70] sm:$0xff]  }
  0x83   :  { %v299_v27 = vpop.permute.xlu1 %298 }
  0x84   :  { %v83_v26 = vpop.permute.xlu0 %82 }
  0x87   :  { %v304_v29 = vpop.permute.xlu1 %303 }
  0x88   :  { %v88_v28 = vpop.permute.xlu0 %87 }
  0x8b   :  { %v98_v40 = vpop.permute.xlu1 %97 }
  0x8c   :  { %v93_v37 = vpop.permute.xlu0 %92 }
  0x8f   :  { %v314_v53 = vpop.permute.xlu1 %313 }
  0x90   :  { %v309_v48 = vpop.permute.xlu0 %308 }
  0x94   :  { %v469_v16 = vpop.permute.xlu0 %468 }
  0x98   :  { %v473_v17 = vpop.permute.xlu0 %472 }
  0x9c   :  { %v552_v18 = vpop.permute.xlu0 %551 }
  0xa0   :  { %v556_v19 = vpop.permute.xlu0 %555 }
  0xa4   :  { %v639_v22 = vpop.permute.xlu0 %638 }
  0xa8   :  { %v643_v25 = vpop.permute.xlu0 %642 }
  0xf8   :  { %v257_v30 = vpop.f32.mrb[0].mxu0 }
  0xf9   :  { %v258_v31 = vadd.f32 %v257_v30, %v83_v26  ;;  %v259_v32 = vpop.f32.mrb[1].mxu0  ;;  %v3499_v26 = vld [vmem:[%s4323_s5 + $0x8] sm:$0xff]  }
  0xfa   :  { %v260_v33 = vpop.f32.mrb[2].mxu0 }
  0xfb   :  { %v336_v34 = vmax.f32 %v258_v31, %v299_v27  ;;  %v261_v35 = vadd.f32 %v260_v33, %v88_v28  ;;  %v262_v36 = vpop.f32.mrb[3].mxu0  ;;  %v3500_v27 = vld [vmem:[%s4323_s5 + $0x20] sm:$0xff]  }
  0xfc   :  { %v3501_v36 = vld [vmem:[%s4323_s5 + $0x28] sm:$0xff]  }
  0xfd   :  { %v337_v39 = vmax.f32 %v261_v35, %v304_v29  ;;  %v350_v41 = vmul.f32 %v3727_v38, %v336_v34 }
  0xff   :  { %v351_v42 = vmul.f32 %v3727_v38, %v337_v39 }
 0x100   :  { %v265_v43 = vpop.f32.mrb[4].mxu0 }
 0x101   :  { %v3734_v45 = vpack.c.bf16 %v351_v42, %v350_v41  ;;  %v266_v46 = vadd.f32 %v265_v43, %v93_v37  ;;  %v267_v47 = vpop.f32.mrb[5].mxu0  ;;  %v3502_v37 = vld [vmem:[%s4323_s5 + $0x30] sm:$0xff]  }
 0x102   :  { %v268_v49 = vpop.f32.mrb[6].mxu0  ;;  %v3504_v47 = vld [vmem:[%s4323_s5 + $0x40] sm:$0xff]  }
 0x103   :  { %v338_v50 = vmax.f32 %v266_v46, %v309_v48  ;;  %v269_v51 = vadd.f32 %v268_v49, %v98_v40  ;;  %v270_v52 = vpop.f32.mrb[7].mxu0  ;;  %807 = vrot.lane.b32.xlu0 %v3734_v45, %s3557_s16  ;;  %470 = vrot.lane.b32.xlu1 %v3734_v45, %s3554_s13  ;;  %v3503_v46 = vld [vmem:[%s4323_s5 + $0x38] sm:$0xff]  }
 0x105   :  { %v339_v54 = vmax.f32 %v269_v51, %v314_v53  ;;  %v352_v55 = vmul.f32 %v3727_v38, %v338_v50 }
 0x107   :  { %v353_v56 = vmul.f32 %v3727_v38, %v339_v54  ;;  %v3505_v54 = vld [vmem:[%s4323_s5 + $0x48] sm:$0xff]  }
 0x108   :  { %v3780_v59 = vpop.f32.mrb[8].mxu0 }
 0x109   :  { %v3743_v57 = vpack.c.bf16 %v353_v56, %v352_v55  ;;  %v275_v60 = vpop.f32.mrb[9].mxu0 }
 0x10a   :  { %v3792_v63 = vpop.f32.mrb[10].mxu0 }
 0x10b   :  { %811 = vrot.lane.b32.xlu0 %v3743_v57, %s3557_s16  ;;  %474 = vrot.lane.b32.xlu1 %v3743_v57, %s3554_s13  ;;  %v278_v1 = vpop.f32.mrb[11].mxu0 }
 0x10f   :  { %894 = vrot.lane.b32.xlu0 %v3734_v45, %s3558_s17  ;;  %553 = vrot.lane.b32.xlu1 %v3734_v45, %s3555_s20 }
 0x110   :  { %v3796_v2 = vpop.f32.mrb[12].mxu0 }
 0x111   :  { %v283_v4 = vpop.f32.mrb[13].mxu0 }
 0x112   :  { %v3826_v10 = vpop.f32.mrb[14].mxu0 }
 0x113   :  { %898 = vrot.lane.b32.xlu0 %v3743_v57, %s3558_s17  ;;  %557 = vrot.lane.b32.xlu1 %v3743_v57, %s3555_s20  ;;  %v286_v11 = vpop.f32.mrb[15].mxu0 }
 0x117   :  { %981 = vrot.lane.b32.xlu0 %v3734_v45, %s3559_s18  ;;  %640 = vrot.lane.b32.xlu1 %v3734_v45, %s3556_s30 }
 0x11b   :  { %985 = vrot.lane.b32.xlu0 %v3743_v57, %s3559_s18  ;;  %644 = vrot.lane.b32.xlu1 %v3743_v57, %s3556_s30 }
 0x11f   :  { %391 = vrot.lane.b32.xlu0 %v3734_v45, %s3560_s19  ;;  %809 = vrot.lane.b32.xlu1 %v3553_v0, %s3557_s16 }
 0x123   :  { %1070 = vrot.lane.b32.xlu0 %v3553_v0, %s3561_s0  ;;  %813 = vrot.lane.b32.xlu1 %v3553_v0, %s3557_s16 }
 0x127   :  { %1072 = vrot.lane.b32.xlu0 %v3743_v57, %s3561_s0  ;;  %896 = vrot.lane.b32.xlu1 %v3553_v0, %s3558_s17 }
 0x12b   :  { %102 = vperm.xlu0 %3465, %v76_v58   ;;  %900 = vrot.lane.b32.xlu1 %v3553_v0, %s3558_s17 }
 0x12f   :  { %318 = vperm.xlu0 %3465, %v292_v61   ;;  %3468 = vrot.lane.b32.xlu1 %v3553_v0, %s3559_s18 }
 0x133   :  { %112 = vperm.xlu0 %3465, %v78_v62   ;;  %3473 = vrot.lane.b32.xlu1 %v3553_v0, %s3560_s19 }
 0x137   :  { %1146 = vperm.xlu0 %3465, %v1140_v3   ;;  %1068 = vrot.lane.b32.xlu1 %v3734_v45, %s3561_s0 }
 0x13b   :  { %328 = vperm.xlu0 %3465, %v294_v5   ;;  %395 = vrot.lane.b32.xlu1 %v3743_v57, %s3560_s19  ;;  %v3507_v5 = vld [vmem:[%s4323_s5 + $0x58] sm:$0xff]  }
 0x13f   :  { %1156 = vperm.xlu0 %3465, %v1142_v6   ;;  %1074 = vrot.lane.b32.xlu1 %v3553_v0, %s3561_s0  ;;  %v3513_v6 = vld [vmem:[%s4323_s5 + $0x18] sm:$0xff]  }
 0x143   :  { %107 = vperm.xlu1 %3466, %v77_v7   ;;  %1211 = vrot.lane.b32.xlu0 %v3553_v0, %s3560_s19  ;;  %v3508_v7 = vld [vmem:[%s4323_s5 + $0x60] sm:$0xff]  }
 0x147   :  { %323 = vperm.xlu1 %3466, %v293_v8   ;;  %1215 = vrot.lane.b32.xlu0 %v3553_v0, %s3560_s19 }
 0x14b   :  { %117 = vperm.xlu1 %3466, %v79_v9   ;;  %1288 = vrot.lane.b32.xlu0 %v3553_v0, %s3554_s13 }
 0x14f   :  { %1151 = vperm.xlu1 %3466, %v1141_v12   ;;  %1292 = vrot.lane.b32.xlu0 %v3553_v0, %s3554_s13  ;;  %v3509_v12 = vld [vmem:[%s4323_s5 + $0x68] sm:$0xff]  }
 0x153   :  { %333 = vperm.xlu1 %3466, %v295_v13   ;;  %1370 = vrot.lane.b32.xlu0 %v3553_v0, %s3555_s20 }
 0x157   :  { %1161 = vperm.xlu1 %3466, %v1143_v15   ;;  %1374 = vrot.lane.b32.xlu0 %v3553_v0, %s3555_s20 }
 0x15b   :  { %1456 = vrot.lane.b32.xlu0 %v3553_v0, %s3556_s30 }
 0x15f   :  { %1460 = vrot.lane.b32.xlu0 %v3553_v0, %s3556_s30 }
 0x175   :  { %v471_v20 = vpop.permute.xlu1 %470  ;;  %v808_v30 = vpop.permute.xlu0 %807 }
 0x176   :  { %v477_v21 = vsel %vm476_vm2, %v469_v16, %v471_v20 }
 0x177   :  { %3152 = vmatprep.subr.bf16.mxu1 %v477_v21 }
 0x178   :  { %3153 = vmatpush3.bf16.msra.mxu1 %v477_v21 }
 0x17d   :  { %v475_v23 = vpop.permute.xlu1 %474  ;;  %v812_v33 = vpop.permute.xlu0 %811 }
 0x17e   :  { %v478_v24 = vsel %vm476_vm2, %v473_v17, %v475_v23  ;;  %v3515_v23 = vld [vmem:[%s4323_s5 + $0x88] sm:$0xff]  }
 0x17f   :  { %3154 = vmatprep.subr.bf16.mxu1 %v478_v24 }
 0x180   :  { %3155 = vmatpush3.bf16.msra.mxu1 %v478_v24 }
 0x181   :  { %v554_v28 = vpop.permute.xlu1 %553  ;;  %v895_v41 = vpop.permute.xlu0 %894 }
 0x182   :  { %v560_v29 = vsel %vm559_vm3, %v552_v18, %v554_v28  ;;  %v3511_v18 = vld [vmem:[%s4323_s5 + $0x78] sm:$0xff]  }
 0x183   :  { %3157 = vmatmul.mubr.msk.bf16.vlgmr.msra.gmra.mrb[0].mxu1 %vm402_vm1, %v3499_v26  ;;  %3160 = vmatprep.subr.bf16.mxu1 %v560_v29 }
 0x184   :  { %3161 = vmatpush3.bf16.msra.mxu1 %v560_v29  ;;  %3164 = vmatprep.mubr.msk.bf16.mxu1 %vm402_vm1, %v3500_v27 }
 0x185   :  { %v558_v31 = vpop.permute.xlu1 %557  ;;  %v899_v43 = vpop.permute.xlu0 %898 }
 0x186   :  { %v561_v32 = vsel %vm559_vm3, %v556_v19, %v558_v31  ;;  %v3514_v19 = vld [vmem:[%s4323_s5 + $0x80] sm:$0xff]  }
 0x187   :  { %3162 = vmatprep.subr.bf16.mxu1 %v561_v32 }
 0x188   :  { %3163 = vmatpush3.bf16.msra.mxu1 %v561_v32 }
 0x189   :  { %v641_v34 = vpop.permute.xlu1 %640  ;;  %v982_v49 = vpop.permute.xlu0 %981 }
 0x18a   :  { %v647_v35 = vsel %vm646_vm4, %v639_v22, %v641_v34 }
 0x18b   :  { %3168 = vmatprep.subr.bf16.mxu1 %v647_v35 }
 0x18d   :  { %v645_v39 = vpop.permute.xlu1 %644  ;;  %v986_v52 = vpop.permute.xlu0 %985 }
 0x18e   :  { %v648_v40 = vsel %vm646_vm4, %v643_v25, %v645_v39 }
 0x18f   :  { %3165 = vmatmul.mubr.msk.bf16.vlgmr.msra.gmra.mrb[0].mxu1 %vm402_vm1, %v3501_v36 }
 0x190   :  { %3169 = vmatpush3.bf16.msra.mxu1 %v647_v35  ;;  %3172 = vmatprep.mubr.msk.bf16.mxu1 %vm402_vm1, %v3502_v37 }
 0x191   :  { %3170 = vmatprep.subr.bf16.mxu1 %v648_v40  ;;  %v810_v42 = vpop.permute.xlu1 %809  ;;  %v392_v58 = vpop.permute.xlu0 %391 }
 0x192   :  { %v816_v51 = vsel %vm815_vm5, %v808_v30, %v810_v42 }
 0x194   :  { %3171 = vmatpush3.bf16.msra.mxu1 %v648_v40 }
 0x195   :  { %3176 = vmatprep.subr.bf16.mxu1 %v3734_v45  ;;  %v814_v44 = vpop.permute.xlu1 %813  ;;  %v1071_v16 = vpop.permute.xlu0 %1070 }
 0x199   :  { %v897_v48 = vpop.permute.xlu1 %896  ;;  %v1073_v21 = vpop.permute.xlu0 %1072 }
 0x19a   :  { %v903_v1 = vsel %vm902_vm7, %v895_v41, %v897_v48 }
 0x19b   :  { %3173 = vmatmul.mubr.msk.bf16.vlgmr.msra.gmra.mrb[0].mxu1 %vm402_vm1, %v3503_v46 }
 0x19c   :  { %3177 = vmatpush3.bf16.msra.mxu1 %v3734_v45  ;;  %3180 = vmatprep.mubr.msk.bf16.mxu1 %vm402_vm1, %v3504_v47  ;;  %v3506_v45 = vld [vmem:[%s4323_s5 + $0x50] sm:$0xff]  }
 0x19d   :  { %3178 = vmatprep.subr.bf16.mxu1 %v3743_v57  ;;  %v901_v50 = vpop.permute.xlu1 %900 }
 0x19e   :  { %v904_v9 = vsel %vm902_vm7, %v899_v43, %v901_v50 }
 0x1a0   :  { %3179 = vmatpush3.bf16.msra.mxu1 %v3743_v57  ;;  %v817_v57 = vsel %vm815_vm5, %v812_v33, %v814_v44 }
 0x1a1   :  { %3184 = vmatprep.subr.bf16.mxu1 %v816_v51  ;;  %v3469_v53 = vpop.permute.xlu1 %3468 }
 0x1a2   :  { %v3470_v8 = vunpack.i.l.bf16 %v3469_v53  ;;  %v3471_v13 = vunpack.i.h.bf16 %v3469_v53 }
 0x1a4   :  { %v990_v11 = vsel %vm989_vm8, %v982_v49, %v3470_v8  ;;  %v991_v15 = vsel %vm989_vm8, %v986_v52, %v3471_v13  ;;  %v3516_v8 = vld [vmem:[%s4325_s7 + $0x10] sm:$0xff]  }
 0x1a5   :  { %v3474_v55 = vpop.permute.xlu1 %3473 }
 0x1a6   :  { %v3475_v56 = vunpack.i.l.bf16 %v3474_v55  ;;  %v3476_v62 = vunpack.i.h.bf16 %v3474_v55 }
 0x1a7   :  { %3181 = vmatmul.mubr.msk.bf16.vlgmr.msra.gmra.mrb[0].mxu1 %vm402_vm1, %v3505_v54 }
 0x1a8   :  { %3185 = vmatpush3.bf16.msra.mxu1 %v816_v51  ;;  %v398_v60 = vsel %vm397_vm6, %v3475_v56, %v392_v58  ;;  %3188 = vmatprep.mubr.msk.bf16.mxu1 %vm402_vm1, %v3506_v45 }
 0x1a9   :  { %3186 = vmatprep.subr.bf16.mxu1 %v817_v57  ;;  %v1069_v61 = vpop.permute.xlu1 %1068  ;;  %3144 = vmatprep.subr.bf16.mxu0 %v398_v60 }
 0x1aa   :  { %3145 = vmatpush3.bf16.msra.mxu0 %v398_v60  ;;  %v1077_v17 = vsel %vm1076_vm9, %v1069_v61, %v1071_v16  ;;  %v103_v28 = vpop.permute.xlu0 %102 }
 0x1ab   :  { %v274_v39 = vadd.f32 %v3780_v59, %v103_v28  ;;  %v3517_v28 = vld [vmem:[%s4325_s7 + $0x18] sm:$0xff]  }
 0x1ac   :  { %3187 = vmatpush3.bf16.msra.mxu1 %v817_v57 }
 0x1ad   :  { %3192 = vmatprep.subr.bf16.mxu1 %v903_v1  ;;  %v396_v3 = vpop.permute.xlu1 %395 }
 0x1ae   :  { %v399_v4 = vsel %vm397_vm6, %v3476_v62, %v396_v3  ;;  %v319_v30 = vpop.permute.xlu0 %318 }
 0x1af   :  { %3146 = vmatprep.subr.bf16.mxu0 %v399_v4  ;;  %v340_v43 = vmax.f32 %v274_v39, %v319_v30  ;;  %v3519_v39 = vld [vmem:[%s4325_s7 + $0x8] sm:$0xff]  }
 0x1b0   :  { %3147 = vmatpush3.bf16.msra.mxu0 %v399_v4 }
 0x1b1   :  { %v1075_v20 = vpop.permute.xlu1 %1074  ;;  %v354_v55 = vmul.f32 %v3727_v38, %v340_v43 }
 0x1b2   :  { %v1078_v22 = vsel %vm1076_vm9, %v1073_v21, %v1075_v20  ;;  %v113_v32 = vpop.permute.xlu0 %112 }
 0x1b3   :  { %3189 = vmatmul.mubr.msk.bf16.vlgmr.msra.gmra.mrb[0].mxu1 %vm402_vm1, %v3507_v5  ;;  %3149 = vmatmul.mubr.msk.bf16.vlgmr.msra.gmra.mrb[16].mxu0 %vm402_vm1, %v3513_v6  ;;  %v282_v37 = vadd.f32 %v3796_v2, %v113_v32 }
 0x1b4   :  { %3193 = vmatpush3.bf16.msra.mxu1 %v903_v1  ;;  %3196 = vmatprep.mubr.msk.bf16.mxu1 %vm402_vm1, %v3508_v7 }
 0x1b5   :  { %3194 = vmatprep.subr.bf16.mxu1 %v904_v9  ;;  %3220 = vmatprep.mubr.msk.bf16.mxu0 %vm402_vm1, %v3516_v8 }
 0x1b6   :  { %v1147_v34 = vpop.permute.xlu0 %1146 }
 0x1b8   :  { %3195 = vmatpush3.bf16.msra.mxu1 %v904_v9 }
 0x1b9   :  { %3200 = vmatprep.subr.bf16.mxu1 %v990_v11 }
 0x1ba   :  { %v329_v36 = vpop.permute.xlu0 %328 }
 0x1bb   :  { %v342_v41 = vmax.f32 %v282_v37, %v329_v36 }
 0x1bd   :  { %v356_v54 = vmul.f32 %v3727_v38, %v342_v41 }
 0x1be   :  { %v1157_v50 = vpop.permute.xlu0 %1156 }
 0x1bf   :  { %3197 = vmatmul.mubr.msk.bf16.vlgmr.msra.gmra.mrb[0].mxu1 %vm402_vm1, %v3509_v12 }
 0x1c0   :  { %3201 = vmatpush3.bf16.msra.mxu1 %v990_v11  ;;  %3204 = vmatprep.mubr.msk.bf16.mxu1 %vm402_vm1, %v3510_v14 }
 0x1c1   :  { %3202 = vmatprep.subr.bf16.mxu1 %v991_v15 }
 0x1c2   :  { %v108_v29 = vpop.permute.xlu1 %107  ;;  %v1212_v20 = vpop.permute.xlu0 %1211 }
 0x1c3   :  { %v277_v44 = vadd.f32 %v3792_v63, %v108_v29  ;;  %v3518_v29 = vld [vmem:[%s4325_s7] sm:$0xff]  }
 0x1c4   :  { %3203 = vmatpush3.bf16.msra.mxu1 %v991_v15 }
 0x1c5   :  { %3208 = vmatprep.subr.bf16.mxu1 %v1077_v17 }
 0x1c6   :  { %v324_v31 = vpop.permute.xlu1 %323  ;;  %v1216_v21 = vpop.permute.xlu0 %1215 }
 0x1c7   :  { %v341_v51 = vmax.f32 %v277_v44, %v324_v31 }
 0x1c9   :  { %v355_v61 = vmul.f32 %v3727_v38, %v341_v51 }
 0x1ca   :  { %v118_v33 = vpop.permute.xlu1 %117 }
 0x1cb   :  { %3205 = vmatmul.mubr.msk.bf16.vlgmr.msra.gmra.mrb[0].mxu1 %vm402_vm1, %v3511_v18  ;;  %v285_v42 = vadd.f32 %v3826_v10, %v118_v33  ;;  %v1954_v18 = vld [vmem:[%s4326_s8 + $0x8] sm:$0xff] }
 0x1cc   :  { %3209 = vmatpush3.bf16.msra.mxu1 %v1077_v17  ;;  %3212 = vmatprep.mubr.msk.bf16.mxu1 %vm402_vm1, %v3514_v19  ;;  %v1955_v17 = vld [vmem:[%s4326_s8 + $0x10] sm:$0xff]  ;;  %v1956_v19 = vld [vmem:[%s4326_s8 + $0x18] sm:$0xff] }
 0x1cd   :  { %3210 = vmatprep.subr.bf16.mxu1 %v1078_v22 }
 0x1ce   :  { %v1152_v35 = vpop.permute.xlu1 %1151 }
 0x1d0   :  { %3211 = vmatpush3.bf16.msra.mxu1 %v1078_v22  ;;  %v1289_v22 = vpop.permute.xlu0 %1288 }
 0x1d2   :  { %v334_v40 = vpop.permute.xlu1 %333 }
 0x1d3   :  { %v343_v47 = vmax.f32 %v285_v42, %v334_v40  ;;  %v3520_v40 = vld [vmem:[%s4325_s7 + $0x20] sm:$0xff]  }
 0x1d5   :  { %v357_v63 = vmul.f32 %v3727_v38, %v343_v47  ;;  %v3521_v47 = vld [vmem:[%s4325_s7 + $0x28] sm:$0xff]  }
 0x1d6   :  { %v1162_v56 = vpop.permute.xlu1 %1161 }
 0x1d7   :  { %3213 = vmatmul.mubr.msk.bf16.vlgmr.msra.gmra.mrb[0].mxu1 %vm402_vm1, %v3515_v23 }
 0x286   :  { %v3150_v24 = vpop.f32.mrb[16].mxu0 }
 0x287   :  { %v443_v25 = vpop.f32.mrb[17].mxu0 }
 0x288   :  { %v3151_v26 = vpop.f32.mrb[18].mxu0 }
 0x289   :  { %v446_v27 = vpop.f32.mrb[19].mxu0 }
 0x2aa   :  { %v3214_v46 = vpop.f32.mrb[0].mxu1 }
 0x2ab   :  { %v3360_v48 = vadd.f32 %v3214_v46, %v3150_v24  ;;  %v1121_v49 = vpop.f32.mrb[1].mxu1 }
 0x2ac   :  { %v3361_v52 = vadd.f32 %v1121_v49, %v443_v25  ;;  %v3215_v53 = vpop.f32.mrb[2].mxu1 }
 0x2ad   :  { %v1166_v2 = vadd.f32 %v3360_v48, %v1157_v50  ;;  %v3362_v45 = vadd.f32 %v3215_v53, %v3151_v26  ;;  %v1124_v59 = vpop.f32.mrb[3].mxu1  ;;  %v3522_v48 = vld [vmem:[%s4325_s7 + $0x30] sm:$0xff]   ;;  %v3524_v53 = vld [vmem:[%s4325_s7 + $0x40] sm:$0xff]  }
 0x2ae   :  { %v1164_v10 = vadd.f32 %v3361_v52, %v1147_v34  ;;  %v3363_v58 = vadd.f32 %v1124_v59, %v446_v27  ;;  %v1293_v27 = vpop.permute.xlu0 %1292  ;;  %v3523_v52 = vld [vmem:[%s4325_s7 + $0x38] sm:$0xff]  }
 0x2af   :  { %v1170_v57 = vadd.f32 %v1166_v2, %v356_v54  ;;  %v1167_v60 = vadd.f32 %v3362_v45, %v1162_v56  ;;  %v3526_v56 = vld [vmem:[%s4325_s7 + $0x50] sm:$0xff]  }
 0x2b0   :  { %v1168_v62 = vadd.f32 %v1164_v10, %v354_v55  ;;  %v1165_v1 = vadd.f32 %v3363_v58, %v1152_v35  ;;  %v3525_v55 = vld [vmem:[%s4325_s7 + $0x48] sm:$0xff]  }
 0x2b1   :  { %v1171_v3 = vadd.f32 %v1167_v60, %v357_v63  ;;  %v1174_v9 = vmax.f32 %v1170_v57, 0.0 }
 0x2b2   :  { %v1172_v4 = vmax.f32 %v1168_v62, 0.0  ;;  %v1169_v5 = vadd.f32 %v1165_v1, %v355_v61  ;;  %v1371_v32 = vpop.permute.xlu0 %1370  ;;  %v3527_v62 = vld [vmem:[%s4325_s7 + $0x58] sm:$0xff]   ;;  %v3528_v1 = vld [vmem:[%s4325_s7 + $0x60] sm:$0xff]  }
 0x2b3   :  { %v1175_v6 = vmax.f32 %v1171_v3, 0.0  ;;  %v3963_v15 = vmul.f32 %v3727_v38, %v1174_v9  ;;  %v3529_v9 = vld [vmem:[%s4325_s7 + $0x68] sm:$0xff]  }
 0x2b4   :  { %v1173_v7 = vmax.f32 %v1169_v5, 0.0  ;;  %v3949_v11 = vmul.f32 %v3727_v38, %v1172_v4 }
 0x2b5   :  { %v3956_v13 = vmul.f32 %v3727_v38, %v1175_v6 }
 0x2b6   :  { %v3952_v12 = vmul.f32 %v3727_v38, %v1173_v7  ;;  %v1953_v38 = vld [vmem:[%s4326_s8] sm:$0xff]  ;;  %v1375_v37 = vpop.permute.xlu0 %1374 }
 0x2b7   :  { %v3971_v16 = vpack.c.bf16 %v3956_v13, %v3963_v15 }
 0x2b8   :  { %v3960_v14 = vpack.c.bf16 %v3952_v12, %v3949_v11 }
 0x2ba   :  { %1624 = vrot.lane.b32.xlu0 %v3960_v14, %s3557_s16  ;;  %1213 = vrot.lane.b32.xlu1 %v3960_v14, %s3560_s19  ;;  %v1457_v43 = vpop.permute.xlu0 %1456 }
 0x2be   :  { %1628 = vrot.lane.b32.xlu0 %v3971_v16, %s3557_s16  ;;  %1217 = vrot.lane.b32.xlu1 %v3971_v16, %s3560_s19  ;;  %v1461_v50 = vpop.permute.xlu0 %1460 }
 0x2c2   :  { %1710 = vrot.lane.b32.xlu0 %v3960_v14, %s3558_s17  ;;  %1290 = vrot.lane.b32.xlu1 %v3960_v14, %s3554_s13 }
 0x2c6   :  { %1714 = vrot.lane.b32.xlu0 %v3971_v16, %s3558_s17  ;;  %1294 = vrot.lane.b32.xlu1 %v3971_v16, %s3554_s13 }
 0x2ca   :  { %1796 = vrot.lane.b32.xlu0 %v3960_v14, %s3559_s18  ;;  %1372 = vrot.lane.b32.xlu1 %v3960_v14, %s3555_s20 }
 0x2ce   :  { %1800 = vrot.lane.b32.xlu0 %v3971_v16, %s3559_s18  ;;  %1376 = vrot.lane.b32.xlu1 %v3971_v16, %s3555_s20 }
 0x2d2   :  { %1882 = vrot.lane.b32.xlu0 %v3960_v14, %s3561_s0  ;;  %1458 = vrot.lane.b32.xlu1 %v3960_v14, %s3556_s30 }
 0x2d6   :  { %1886 = vrot.lane.b32.xlu0 %v3971_v16, %s3561_s0  ;;  %1462 = vrot.lane.b32.xlu1 %v3971_v16, %s3556_s30 }
 0x2da   :  { %1959 = vperm.xlu0 %3465, %v1953_v38   ;;  %1626 = vrot.lane.b32.xlu1 %v3553_v0, %s3557_s16 }
 0x2de   :  { %1969 = vperm.xlu0 %3465, %v1955_v17   ;;  %1630 = vrot.lane.b32.xlu1 %v3553_v0, %s3557_s16 }
 0x2e2   :  { %1712 = vrot.lane.b32.xlu1 %v3553_v0, %s3558_s17  ;;  %2020 = vrot.lane.b32.xlu0 %v3553_v0, %s3560_s19 }
 0x2e6   :  { %1716 = vrot.lane.b32.xlu1 %v3553_v0, %s3558_s17  ;;  %2024 = vrot.lane.b32.xlu0 %v3553_v0, %s3560_s19 }
 0x2ea   :  { %1798 = vrot.lane.b32.xlu1 %v3553_v0, %s3559_s18  ;;  %2097 = vrot.lane.b32.xlu0 %v3553_v0, %s3554_s13 }
 0x2ee   :  { %1802 = vrot.lane.b32.xlu1 %v3553_v0, %s3559_s18  ;;  %2101 = vrot.lane.b32.xlu0 %v3553_v0, %s3554_s13 }
 0x2f2   :  { %1884 = vrot.lane.b32.xlu1 %v3553_v0, %s3561_s0  ;;  %2179 = vrot.lane.b32.xlu0 %v3553_v0, %s3555_s20 }
 0x2f6   :  { %1888 = vrot.lane.b32.xlu1 %v3553_v0, %s3561_s0  ;;  %2183 = vrot.lane.b32.xlu0 %v3553_v0, %s3555_s20 }
 0x2fa   :  { %1964 = vperm.xlu1 %3466, %v1954_v18   ;;  %2265 = vrot.lane.b32.xlu0 %v3553_v0, %s3556_s30 }
 0x2fe   :  { %1974 = vperm.xlu1 %3466, %v1956_v19   ;;  %2269 = vrot.lane.b32.xlu0 %v3553_v0, %s3556_s30 }
 0x32c   :  { %v1214_v23 = vpop.permute.xlu1 %1213  ;;  %v1625_v2 = vpop.permute.xlu0 %1624 }
 0x32d   :  { %v1219_v24 = vsel %vm397_vm6, %v1212_v20, %v1214_v23  ;;  %v3531_v20 = vld [vmem:[%s4325_s7 + $0x78] sm:$0xff]  }
 0x32e   :  { %3216 = vmatprep.subr.bf16.mxu0 %v1219_v24 }
 0x32f   :  { %3217 = vmatpush3.bf16.msra.mxu0 %v1219_v24 }
 0x330   :  { %v1218_v25 = vpop.permute.xlu1 %1217  ;;  %v1629_v10 = vpop.permute.xlu0 %1628 }
 0x331   :  { %v1220_v26 = vsel %vm397_vm6, %v1216_v21, %v1218_v25  ;;  %v3532_v21 = vld [vmem:[%s4325_s7 + $0x80] sm:$0xff]   ;;  %v3533_v25 = vld [vmem:[%s4325_s7 + $0x88] sm:$0xff]  }
 0x332   :  { %3218 = vmatprep.subr.bf16.mxu0 %v1220_v26 }
 0x333   :  { %3219 = vmatpush3.bf16.msra.mxu0 %v1220_v26 }
 0x334   :  { %v1291_v30 = vpop.permute.xlu1 %1290  ;;  %v1711_v57 = vpop.permute.xlu0 %1710 }
 0x335   :  { %v1296_v31 = vsel %vm476_vm2, %v1289_v22, %v1291_v30 }
 0x336   :  { %3221 = vmatmul.mubr.msk.bf16.vlgmr.msra.gmra.mrb[20].mxu0 %vm402_vm1, %v3517_v28  ;;  %3224 = vmatprep.subr.bf16.mxu0 %v1296_v31 }
 0x337   :  { %3225 = vmatpush3.bf16.msra.mxu0 %v1296_v31  ;;  %3228 = vmatprep.mubr.msk.bf16.mxu0 %vm402_vm1, %v3518_v29 }
 0x338   :  { %v1295_v33 = vpop.permute.xlu1 %1294  ;;  %v1715_v3 = vpop.permute.xlu0 %1714 }
 0x339   :  { %v1297_v34 = vsel %vm476_vm2, %v1293_v27, %v1295_v33 }
 0x33a   :  { %3226 = vmatprep.subr.bf16.mxu0 %v1297_v34 }
 0x33b   :  { %3227 = vmatpush3.bf16.msra.mxu0 %v1297_v34 }
 0x33c   :  { %v1373_v35 = vpop.permute.xlu1 %1372  ;;  %v1797_v6 = vpop.permute.xlu0 %1796 }
 0x33d   :  { %v1378_v36 = vsel %vm559_vm3, %v1371_v32, %v1373_v35 }
 0x33e   :  { %3232 = vmatprep.subr.bf16.mxu0 %v1378_v36 }
 0x340   :  { %v1377_v41 = vpop.permute.xlu1 %1376 }
 0x341   :  { %v1379_v42 = vsel %vm559_vm3, %v1375_v37, %v1377_v41 }
 0x342   :  { %3229 = vmatmul.mubr.msk.bf16.vlgmr.msra.gmra.mrb[20].mxu0 %vm402_vm1, %v3519_v39 }
 0x343   :  { %3233 = vmatpush3.bf16.msra.mxu0 %v1378_v36  ;;  %3236 = vmatprep.mubr.msk.bf16.mxu0 %vm402_vm1, %v3520_v40 }
 0x344   :  { %3234 = vmatprep.subr.bf16.mxu0 %v1379_v42  ;;  %v1459_v44 = vpop.permute.xlu1 %1458 }
 0x345   :  { %v1464_v46 = vsel %vm646_vm4, %v1457_v43, %v1459_v44  ;;  %v3534_v43 = vld [vmem:[%s4327_s9 + $0x10] sm:$0xff]   ;;  %v4139_v44 = vld [vmem:[%s4322_s1] ss:$0 sm:$0xff] }
 0x346   :  { %3292 = vmatprep.mubr.msk.bf16.mxu1 %vm402_vm1, %v3534_v43 }
 0x347   :  { %3235 = vmatpush3.bf16.msra.mxu0 %v1379_v42 }
 0x348   :  { %3240 = vmatprep.subr.bf16.mxu0 %v1464_v46  ;;  %v1463_v49 = vpop.permute.xlu1 %1462 }
 0x349   :  { %v1465_v51 = vsel %vm646_vm4, %v1461_v50, %v1463_v49 }
 0x34c   :  { %v1627_v54 = vpop.permute.xlu1 %1626 }
 0x34d   :  { %v1632_v45 = vsel %vm815_vm5, %v1625_v2, %v1627_v54  ;;  %v2763_v54 = vld [vmem:[%s4328_s10 + $0x8] sm:$0xff]  ;;  %v2765_v2 = vld [vmem:[%s4328_s10 + $0x18] sm:$0xff] }
 0x34e   :  { %3237 = vmatmul.mubr.msk.bf16.vlgmr.msra.gmra.mrb[20].mxu0 %vm402_vm1, %v3521_v47 }
 0x34f   :  { %3241 = vmatpush3.bf16.msra.mxu0 %v1464_v46  ;;  %3244 = vmatprep.mubr.msk.bf16.mxu0 %vm402_vm1, %v3522_v48 }
 0x350   :  { %3242 = vmatprep.subr.bf16.mxu0 %v1465_v51  ;;  %v1631_v59 = vpop.permute.xlu1 %1630 }
 0x351   :  { %v1633_v58 = vsel %vm815_vm5, %v1629_v10, %v1631_v59 }
 0x353   :  { %3243 = vmatpush3.bf16.msra.mxu0 %v1465_v51 }
 0x354   :  { %3248 = vmatprep.subr.bf16.mxu0 %v3960_v14  ;;  %v1713_v63 = vpop.permute.xlu1 %1712 }
 0x355   :  { %v1718_v60 = vsel %vm902_vm7, %v1711_v57, %v1713_v63  ;;  %v3535_v57 = vld [vmem:[%s4327_s9 + $0x18] sm:$0xff]  }
 0x358   :  { %v1717_v61 = vpop.permute.xlu1 %1716 }
 0x359   :  { %v1719_v4 = vsel %vm902_vm7, %v1715_v3, %v1717_v61 }
 0x35a   :  { %3245 = vmatmul.mubr.msk.bf16.vlgmr.msra.gmra.mrb[20].mxu0 %vm402_vm1, %v3523_v52  ;;  %v2762_v52 = vld [vmem:[%s4328_s10] sm:$0xff] }
 0x35b   :  { %3249 = vmatpush3.bf16.msra.mxu0 %v3960_v14  ;;  %3252 = vmatprep.mubr.msk.bf16.mxu0 %vm402_vm1, %v3524_v53  ;;  %v3530_v14 = vld [vmem:[%s4325_s7 + $0x70] sm:$0xff]  }
 0x35c   :  { %3250 = vmatprep.subr.bf16.mxu0 %v3971_v16  ;;  %v1799_v5 = vpop.permute.xlu1 %1798  ;;  %v2764_v53 = vld [vmem:[%s4328_s10 + $0x10] sm:$0xff] }
 0x35d   :  { %v1804_v7 = vsel %vm989_vm8, %v1797_v6, %v1799_v5 }
 0x35f   :  { %3251 = vmatpush3.bf16.msra.mxu0 %v3971_v16  ;;  %v1801_v16 = vpop.permute.xlu0 %1800 }
 0x360   :  { %3256 = vmatprep.subr.bf16.mxu0 %v1632_v45  ;;  %v1803_v8 = vpop.permute.xlu1 %1802 }
 0x361   :  { %v1805_v38 = vsel %vm989_vm8, %v1801_v16, %v1803_v8  ;;  %v3537_v8 = vld [vmem:[%s4327_s9 + $0x8] sm:$0xff]  }
 0x363   :  { %v1883_v18 = vpop.permute.xlu0 %1882 }
 0x364   :  { %v1885_v17 = vpop.permute.xlu1 %1884 }
 0x365   :  { %v1890_v19 = vsel %vm1076_vm9, %v1883_v18, %v1885_v17 }
 0x366   :  { %3253 = vmatmul.mubr.msk.bf16.vlgmr.msra.gmra.mrb[20].mxu0 %vm402_vm1, %v3525_v55 }
 0x367   :  { %3257 = vmatpush3.bf16.msra.mxu0 %v1632_v45  ;;  %3260 = vmatprep.mubr.msk.bf16.mxu0 %vm402_vm1, %v3526_v56  ;;  %v1887_v23 = vpop.permute.xlu0 %1886 }
 0x368   :  { %3258 = vmatprep.subr.bf16.mxu0 %v1633_v58  ;;  %v1889_v22 = vpop.permute.xlu1 %1888 }
 0x369   :  { %v1891_v24 = vsel %vm1076_vm9, %v1887_v23, %v1889_v22 }
 0x36b   :  { %3259 = vmatpush3.bf16.msra.mxu0 %v1633_v58  ;;  %v1960_v26 = vpop.permute.xlu0 %1959 }
 0x36c   :  { %3264 = vmatprep.subr.bf16.mxu0 %v1718_v60 }
 0x36f   :  { %v1970_v28 = vpop.permute.xlu0 %1969 }
 0x372   :  { %3261 = vmatmul.mubr.msk.bf16.vlgmr.msra.gmra.mrb[20].mxu0 %vm402_vm1, %v3527_v62 }
 0x373   :  { %3265 = vmatpush3.bf16.msra.mxu0 %v1718_v60  ;;  %3268 = vmatprep.mubr.msk.bf16.mxu0 %vm402_vm1, %v3528_v1  ;;  %v2021_v45 = vpop.permute.xlu0 %2020  ;;  %v3536_v60 = vld [vmem:[%s4327_s9] sm:$0xff]  }
 0x374   :  { %3266 = vmatprep.subr.bf16.mxu0 %v1719_v4 }
 0x377   :  { %3267 = vmatpush3.bf16.msra.mxu0 %v1719_v4  ;;  %v2025_v59 = vpop.permute.xlu0 %2024 }
 0x378   :  { %3272 = vmatprep.subr.bf16.mxu0 %v1804_v7 }
 0x379   :  { %v1965_v27 = vpop.permute.xlu1 %1964 }
 0x37b   :  { %v2098_v55 = vpop.permute.xlu0 %2097 }
 0x37d   :  { %v1975_v32 = vpop.permute.xlu1 %1974 }
 0x37e   :  { %3269 = vmatmul.mubr.msk.bf16.vlgmr.msra.gmra.mrb[20].mxu0 %vm402_vm1, %v3529_v9  ;;  %v3538_v9 = vld [vmem:[%s4327_s9 + $0x20] sm:$0xff]  }
 0x37f   :  { %3273 = vmatpush3.bf16.msra.mxu0 %v1804_v7  ;;  %3276 = vmatprep.mubr.msk.bf16.mxu0 %vm402_vm1, %v3530_v14  ;;  %v2102_v63 = vpop.permute.xlu0 %2101 }
 0x380   :  { %3274 = vmatprep.subr.bf16.mxu0 %v1805_v38 }
 0x383   :  { %3275 = vmatpush3.bf16.msra.mxu0 %v1805_v38  ;;  %v2180_v1 = vpop.permute.xlu0 %2179 }
 0x384   :  { %3280 = vmatprep.subr.bf16.mxu0 %v1890_v19 }
 0x387   :  { %v2184_v7 = vpop.permute.xlu0 %2183 }
 0x38a   :  { %3277 = vmatmul.mubr.msk.bf16.vlgmr.msra.gmra.mrb[20].mxu0 %vm402_vm1, %v3531_v20  ;;  %v3540_v20 = vld [vmem:[%s4327_s9 + $0x30] sm:$0xff]  }
 0x38b   :  { %3281 = vmatpush3.bf16.msra.mxu0 %v1890_v19  ;;  %3284 = vmatprep.mubr.msk.bf16.mxu0 %vm402_vm1, %v3532_v21  ;;  %v2266_v38 = vpop.permute.xlu0 %2265  ;;  %v3539_v19 = vld [vmem:[%s4327_s9 + $0x28] sm:$0xff]  }
 0x38c   :  { %3282 = vmatprep.subr.bf16.mxu0 %v1891_v24 }
 0x38f   :  { %3283 = vmatpush3.bf16.msra.mxu0 %v1891_v24  ;;  %v2270_v22 = vpop.permute.xlu0 %2269  ;;  %v3541_v24 = vld [vmem:[%s4327_s9 + $0x38] sm:$0xff]  }
 0x396   :  { %3285 = vmatmul.mubr.msk.bf16.vlgmr.msra.gmra.mrb[20].mxu0 %vm402_vm1, %v3533_v25  ;;  %v3542_v25 = vld [vmem:[%s4327_s9 + $0x40] sm:$0xff]  }
 0x469   :  { %v3286_v29 = vpop.f32.mrb[20].mxu0 }
 0x46a   :  { %v1979_v30 = vadd.f32 %v3286_v29, %v1970_v28  ;;  %v1934_v31 = vpop.f32.mrb[21].mxu0 }
 0x46b   :  { %v1977_v33 = vadd.f32 %v1960_v26, %v1934_v31  ;;  %v3287_v34 = vpop.f32.mrb[22].mxu0  ;;  %v3544_v31 = vld [vmem:[%s4327_s9 + $0x50] sm:$0xff]  }
 0x46c   :  { %v1983_v35 = vmax.f32 %v1979_v30, 0.0  ;;  %v1980_v36 = vadd.f32 %v3287_v34, %v1975_v32  ;;  %v1937_v37 = vpop.f32.mrb[23].mxu0  ;;  %v3543_v30 = vld [vmem:[%s4327_s9 + $0x48] sm:$0xff]  }
 0x46d   :  { %v1981_v39 = vmax.f32 %v1977_v33, 0.0  ;;  %v1978_v40 = vadd.f32 %v1965_v27, %v1937_v37 }
 0x46e   :  { %v1984_v41 = vmax.f32 %v1980_v36, 0.0  ;;  %v1987_v46 = vmul.f32 %v4139_v44, %v1983_v35 }
 0x46f   :  { %v1982_v42 = vmax.f32 %v1978_v40, 0.0  ;;  %v1985_v48 = vmul.f32 %v4139_v44, %v1981_v39  ;;  %v3545_v39 = vld [vmem:[%s4327_s9 + $0x58] sm:$0xff]   ;;  %v3546_v40 = vld [vmem:[%s4327_s9 + $0x60] sm:$0xff]  }
 0x470   :  { %v1988_v47 = vmul.f32 %v4139_v44, %v1984_v41 }
 0x471   :  { %v1986_v49 = vmul.f32 %v4139_v44, %v1982_v42 }
 0x472   :  { %v4146_v50 = vpack.c.bf16 %v1988_v47, %v1987_v46 }
 0x473   :  { %v4148_v51 = vpack.c.bf16 %v1986_v49, %v1985_v48  ;;  %v3547_v49 = vld [vmem:[%s4327_s9 + $0x68] sm:$0xff]  }
 0x475   :  { %2433 = vrot.lane.b32.xlu0 %v4148_v51, %s3557_s16  ;;  %2022 = vrot.lane.b32.xlu1 %v4148_v51, %s3560_s19 }
 0x479   :  { %2437 = vrot.lane.b32.xlu0 %v4146_v50, %s3557_s16  ;;  %2026 = vrot.lane.b32.xlu1 %v4146_v50, %s3560_s19 }
 0x47d   :  { %2519 = vrot.lane.b32.xlu0 %v4148_v51, %s3558_s17  ;;  %2099 = vrot.lane.b32.xlu1 %v4148_v51, %s3554_s13 }
 0x481   :  { %2523 = vrot.lane.b32.xlu0 %v4146_v50, %s3558_s17  ;;  %2103 = vrot.lane.b32.xlu1 %v4146_v50, %s3554_s13 }
 0x485   :  { %2605 = vrot.lane.b32.xlu0 %v4148_v51, %s3559_s18  ;;  %2181 = vrot.lane.b32.xlu1 %v4148_v51, %s3555_s20 }
 0x489   :  { %2609 = vrot.lane.b32.xlu0 %v4146_v50, %s3559_s18  ;;  %2185 = vrot.lane.b32.xlu1 %v4146_v50, %s3555_s20 }
 0x48d   :  { %2691 = vrot.lane.b32.xlu0 %v4148_v51, %s3561_s0  ;;  %2267 = vrot.lane.b32.xlu1 %v4148_v51, %s3556_s30 }
 0x491   :  { %2695 = vrot.lane.b32.xlu0 %v4146_v50, %s3561_s0  ;;  %2271 = vrot.lane.b32.xlu1 %v4146_v50, %s3556_s30 }
 0x495   :  { %2768 = vperm.xlu0 %3465, %v2762_v52   ;;  %2435 = vrot.lane.b32.xlu1 %v3553_v0, %s3557_s16 }
 0x499   :  { %2778 = vperm.xlu0 %3465, %v2764_v53   ;;  %2439 = vrot.lane.b32.xlu1 %v3553_v0, %s3557_s16 }
 0x49d   :  { %2521 = vrot.lane.b32.xlu1 %v3553_v0, %s3558_s17 }
 0x4a1   :  { %2525 = vrot.lane.b32.xlu1 %v3553_v0, %s3558_s17 }
 0x4a5   :  { %2607 = vrot.lane.b32.xlu1 %v3553_v0, %s3559_s18 }
 0x4a9   :  { %2611 = vrot.lane.b32.xlu1 %v3553_v0, %s3559_s18 }
 0x4ad   :  { %2693 = vrot.lane.b32.xlu1 %v3553_v0, %s3561_s0 }
 0x4b1   :  { %2697 = vrot.lane.b32.xlu1 %v3553_v0, %s3561_s0 }
 0x4b5   :  { %2773 = vperm.xlu1 %3466, %v2763_v54  }
 0x4b9   :  { %2783 = vperm.xlu1 %3466, %v2765_v2  }
 0x4e7   :  { %v2023_v56 = vpop.permute.xlu1 %2022  ;;  %v2434_v27 = vpop.permute.xlu0 %2433 }
 0x4e8   :  { %v2028_v10 = vsel %vm397_vm6, %v2021_v45, %v2023_v56  ;;  %v3549_v45 = vld [vmem:[%s4327_s9 + $0x78] sm:$0xff]  }
 0x4e9   :  { %3288 = vmatprep.subr.bf16.mxu1 %v2028_v10 }
 0x4ea   :  { %3289 = vmatpush3.bf16.msra.mxu1 %v2028_v10 }
 0x4eb   :  { %v2027_v58 = vpop.permute.xlu1 %2026  ;;  %v2438_v32 = vpop.permute.xlu0 %2437 }
 0x4ec   :  { %v2029_v0 = vsel %vm397_vm6, %v2025_v59, %v2027_v58  ;;  %v3550_v59 = vld [vmem:[%s4327_s9 + $0x80] sm:$0xff]   ;;  %v3551_v58 = vld [vmem:[%s4327_s9 + $0x88] sm:$0xff]  }
 0x4ed   :  { %3290 = vmatprep.subr.bf16.mxu1 %v2029_v0 }
 0x4ee   :  { %3291 = vmatpush3.bf16.msra.mxu1 %v2029_v0 }
 0x4ef   :  { %v2100_v61 = vpop.permute.xlu1 %2099  ;;  %v2520_v35 = vpop.permute.xlu0 %2519 }
 0x4f0   :  { %v2105_v62 = vsel %vm476_vm2, %v2098_v55, %v2100_v61 }
 0x4f1   :  { %3293 = vmatmul.mubr.msk.bf16.vlgmr.msra.gmra.mrb[4].mxu1 %vm402_vm1, %v3535_v57  ;;  %3296 = vmatprep.subr.bf16.mxu1 %v2105_v62 }
 0x4f2   :  { %3297 = vmatpush3.bf16.msra.mxu1 %v2105_v62  ;;  %3300 = vmatprep.mubr.msk.bf16.mxu1 %vm402_vm1, %v3536_v60 }
 0x4f3   :  { %v2104_v3 = vpop.permute.xlu1 %2103  ;;  %v2524_v41 = vpop.permute.xlu0 %2523 }
 0x4f4   :  { %v2106_v4 = vsel %vm476_vm2, %v2102_v63, %v2104_v3 }
 0x4f5   :  { %3298 = vmatprep.subr.bf16.mxu1 %v2106_v4 }
 0x4f6   :  { %3299 = vmatpush3.bf16.msra.mxu1 %v2106_v4 }
 0x4f7   :  { %v2182_v5 = vpop.permute.xlu1 %2181  ;;  %v2606_v46 = vpop.permute.xlu0 %2605 }
 0x4f8   :  { %v2187_v6 = vsel %vm559_vm3, %v2180_v1, %v2182_v5 }
 0x4f9   :  { %3304 = vmatprep.subr.bf16.mxu1 %v2187_v6 }
 0x4fb   :  { %v2186_v14 = vpop.permute.xlu1 %2185 }
 0x4fc   :  { %v2188_v16 = vsel %vm559_vm3, %v2184_v7, %v2186_v14 }
 0x4fd   :  { %3301 = vmatmul.mubr.msk.bf16.vlgmr.msra.gmra.mrb[4].mxu1 %vm402_vm1, %v3537_v8 }
 0x4fe   :  { %3305 = vmatpush3.bf16.msra.mxu1 %v2187_v6  ;;  %3308 = vmatprep.mubr.msk.bf16.mxu1 %vm402_vm1, %v3538_v9 }
 0x4ff   :  { %3306 = vmatprep.subr.bf16.mxu1 %v2188_v16  ;;  %v2268_v17 = vpop.permute.xlu1 %2267 }
 0x500   :  { %v2273_v18 = vsel %vm646_vm4, %v2266_v38, %v2268_v17 }
 0x502   :  { %3307 = vmatpush3.bf16.msra.mxu1 %v2188_v16 }
 0x503   :  { %3312 = vmatprep.subr.bf16.mxu1 %v2273_v18  ;;  %v2272_v21 = vpop.permute.xlu1 %2271 }
 0x504   :  { %v2274_v23 = vsel %vm646_vm4, %v2270_v22, %v2272_v21 }
 0x507   :  { %v2436_v26 = vpop.permute.xlu1 %2435 }
 0x508   :  { %v2441_v28 = vsel %vm815_vm5, %v2434_v27, %v2436_v26 }
 0x509   :  { %3309 = vmatmul.mubr.msk.bf16.vlgmr.msra.gmra.mrb[4].mxu1 %vm402_vm1, %v3539_v19 }
 0x50a   :  { %3313 = vmatpush3.bf16.msra.mxu1 %v2273_v18  ;;  %3316 = vmatprep.mubr.msk.bf16.mxu1 %vm402_vm1, %v3540_v20 }
 0x50b   :  { %3314 = vmatprep.subr.bf16.mxu1 %v2274_v23  ;;  %v2440_v29 = vpop.permute.xlu1 %2439 }
 0x50c   :  { %v2442_v33 = vsel %vm815_vm5, %v2438_v32, %v2440_v29 }
 0x50e   :  { %3315 = vmatpush3.bf16.msra.mxu1 %v2274_v23 }
 0x50f   :  { %3320 = vmatprep.subr.bf16.mxu1 %v4148_v51  ;;  %v2522_v34 = vpop.permute.xlu1 %2521 }
 0x510   :  { %v2527_v36 = vsel %vm902_vm7, %v2520_v35, %v2522_v34 }
 0x513   :  { %v2526_v37 = vpop.permute.xlu1 %2525 }
 0x514   :  { %v2528_v42 = vsel %vm902_vm7, %v2524_v41, %v2526_v37 }
 0x515   :  { %3317 = vmatmul.mubr.msk.bf16.vlgmr.msra.gmra.mrb[4].mxu1 %vm402_vm1, %v3541_v24 }
 0x516   :  { %3321 = vmatpush3.bf16.msra.mxu1 %v4148_v51  ;;  %3324 = vmatprep.mubr.msk.bf16.mxu1 %vm402_vm1, %v3542_v25  ;;  %v2610_v51 = vpop.permute.xlu0 %2609 }
 0x517   :  { %3322 = vmatprep.subr.bf16.mxu1 %v4146_v50  ;;  %v2608_v43 = vpop.permute.xlu1 %2607 }
 0x518   :  { %v2613_v47 = vsel %vm989_vm8, %v2606_v46, %v2608_v43 }
 0x51a   :  { %3323 = vmatpush3.bf16.msra.mxu1 %v4146_v50  ;;  %v3548_v50 = vld [vmem:[%s4327_s9 + $0x70] sm:$0xff]   ;;  %v2692_v54 = vpop.permute.xlu0 %2691 }
 0x51b   :  { %3328 = vmatprep.subr.bf16.mxu1 %v2441_v28  ;;  %v2612_v48 = vpop.permute.xlu1 %2611 }
 0x51c   :  { %v2614_v52 = vsel %vm989_vm8, %v2610_v51, %v2612_v48 }
 0x51e   :  { %v2696_v56 = vpop.permute.xlu0 %2695 }
 0x51f   :  { %v2694_v53 = vpop.permute.xlu1 %2693 }
 0x520   :  { %v2699_v2 = vsel %vm1076_vm9, %v2692_v54, %v2694_v53 }
 0x521   :  { %3325 = vmatmul.mubr.msk.bf16.vlgmr.msra.gmra.mrb[4].mxu1 %vm402_vm1, %v3543_v30 }
 0x522   :  { %3329 = vmatpush3.bf16.msra.mxu1 %v2441_v28  ;;  %3332 = vmatprep.mubr.msk.bf16.mxu1 %vm402_vm1, %v3544_v31  ;;  %v2769_v0 = vpop.permute.xlu0 %2768 }
 0x523   :  { %3330 = vmatprep.subr.bf16.mxu1 %v2442_v33  ;;  %v2698_v55 = vpop.permute.xlu1 %2697 }
 0x524   :  { %v2700_v10 = vsel %vm1076_vm9, %v2696_v56, %v2698_v55 }
 0x526   :  { %3331 = vmatpush3.bf16.msra.mxu1 %v2442_v33  ;;  %v2779_v57 = vpop.permute.xlu0 %2778 }
 0x527   :  { %3336 = vmatprep.subr.bf16.mxu1 %v2527_v36 }
 0x52d   :  { %3333 = vmatmul.mubr.msk.bf16.vlgmr.msra.gmra.mrb[4].mxu1 %vm402_vm1, %v3545_v39 }
 0x52e   :  { %3337 = vmatpush3.bf16.msra.mxu1 %v2527_v36  ;;  %3340 = vmatprep.mubr.msk.bf16.mxu1 %vm402_vm1, %v3546_v40 }
 0x52f   :  { %3338 = vmatprep.subr.bf16.mxu1 %v2528_v42 }
 0x532   :  { %3339 = vmatpush3.bf16.msra.mxu1 %v2528_v42 }
 0x533   :  { %3344 = vmatprep.subr.bf16.mxu1 %v2613_v47 }
 0x534   :  { %v2774_v63 = vpop.permute.xlu1 %2773 }
 0x538   :  { %v2784_v1 = vpop.permute.xlu1 %2783 }
 0x539   :  { %3341 = vmatmul.mubr.msk.bf16.vlgmr.msra.gmra.mrb[4].mxu1 %vm402_vm1, %v3547_v49 }
 0x53a   :  { %3345 = vmatpush3.bf16.msra.mxu1 %v2613_v47  ;;  %3348 = vmatprep.mubr.msk.bf16.mxu1 %vm402_vm1, %v3548_v50 }
 0x53b   :  { %3346 = vmatprep.subr.bf16.mxu1 %v2614_v52 }
 0x53e   :  { %3347 = vmatpush3.bf16.msra.mxu1 %v2614_v52 }
 0x53f   :  { %3352 = vmatprep.subr.bf16.mxu1 %v2699_v2 }
 0x545   :  { %3349 = vmatmul.mubr.msk.bf16.vlgmr.msra.gmra.mrb[4].mxu1 %vm402_vm1, %v3549_v45 }
 0x546   :  { %3353 = vmatpush3.bf16.msra.mxu1 %v2699_v2  ;;  %3356 = vmatprep.mubr.msk.bf16.mxu1 %vm402_vm1, %v3550_v59 }
 0x547   :  { %3354 = vmatprep.subr.bf16.mxu1 %v2700_v10 }
 0x54a   :  { %3355 = vmatpush3.bf16.msra.mxu1 %v2700_v10 }
 0x551   :  { %3357 = vmatmul.mubr.msk.bf16.vlgmr.msra.gmra.mrb[4].mxu1 %vm402_vm1, %v3551_v58 }
 0x624   :  { %v3358_v60 = vpop.f32.mrb[4].mxu1 }
 0x625   :  { %v2788_v61 = vadd.f32 %v3358_v60, %v2779_v57  ;;  %v2743_v62 = vpop.f32.mrb[5].mxu1 }
 0x626   :  { %v2786_v3 = vadd.f32 %v2769_v0, %v2743_v62  ;;  %v3359_v4 = vpop.f32.mrb[6].mxu1 }
 0x627   :  { %v2792_v5 = vadd.f32 %v2788_v61, %v3963_v15  ;;  %v2789_v6 = vadd.f32 %v3359_v4, %v2784_v1  ;;  %v2746_v7 = vpop.f32.mrb[7].mxu1 }
 0x628   :  { %v2790_v8 = vadd.f32 %v2786_v3, %v3949_v11  ;;  %v2787_v9 = vadd.f32 %v2774_v63, %v2746_v7 }
 0x629   :  { %v2796_v14 = vmax.f32 %v2792_v5, 0.0  ;;  %v2793_v16 = vadd.f32 %v2789_v6, %v3956_v13 }
 0x62a   :  { %v2794_v38 = vmax.f32 %v2790_v8, 0.0  ;;  %v2791_v17 = vadd.f32 %v2787_v9, %v3952_v12 }
 0x62b   :  { %v2800_v18 = vmul.f32 %v4139_v44, %v2796_v14  ;;  %v2797_v19 = vmax.f32 %v2793_v16, 0.0 }
 0x62c   :  { %v2798_v20 = vmul.f32 %v4139_v44, %v2794_v38  ;;  %v2795_v21 = vmax.f32 %v2791_v17, 0.0 }
 0x62d   :  { %2804 = vst [vmem:[%s4329_s11 + $0x10] sm:$0xff] %v2800_v18  ;;  %v2801_v15 = vmul.f32 %v4139_v44, %v2797_v19 }
 0x62e   :  { %2802 = vst [vmem:[%s4329_s11] sm:$0xff] %v2798_v20  ;;  %v2799_v11 = vmul.f32 %v4139_v44, %v2795_v21 }
 0x62f   :  { %2805 = vst [vmem:[%s4329_s11 + $0x18] sm:$0xff] %v2801_v15 }
 0x630   :  { %2803 = vst [vmem:[%s4329_s11 + $0x8] sm:$0xff] %v2799_v11 }

</bundles_post_ra>
